<compile_context>
chip_gen: v7x
topology: tpu7x:2x2x1
jax: 0.10.0
libtpu: 0.0.40
codegen_flags: <defaults>
</compile_context>

<pallas_src>
import jax
import jax.numpy as jnp
from jax.experimental import pallas as pl
from jax.experimental.pallas import tpu as pltpu

HIDDEN_LAYER_SIZE = 1024
FT_IN = 768
LANE = 128


def _round_up(x, m):
    return ((x + m - 1) // m) * m


def nnue_kernel(feat_ref, stm_ref,
                ftw_ref, ftb_ref,
                l1w_ref, l1b_ref,
                l2w_ref, l2b_ref,
                l3w_ref, l3b_ref,
                out_ref):
    tb = stm_ref.shape[0]
    H = HIDDEN_LAYER_SIZE

    # Fused feature transform: feat_ref is (2*TB, 768) bf16 with the white tile stacked
    # on top of the black tile (done once in the wrapper) -> one bf16 MXU dot, f32 acc.
    ft = jnp.dot(feat_ref[...], ftw_ref[...],
                 preferred_element_type=jnp.float32) + ftb_ref[...]
    w = ft[:tb]          # white-perspective accumulator (TB, H)
    b = ft[tb:]          # black-perspective accumulator (TB, H)

    # Side-to-move blend done per perspective half — never materializes the (TB, 2H)
    # concats.  left/right == acc[:, :H] / acc[:, H:] of the reference concat blend.
    stm = stm_ref[...]                       # (TB, 1) f32, lane-broadcast
    left = stm * w + (1.0 - stm) * b
    right = (w + b) - left                   # == stm*b + (1-stm)*w
    a_l = jnp.clip(left, 0.0, 1.0).astype(jnp.bfloat16)
    a_r = jnp.clip(right, 0.0, 1.0).astype(jnp.bfloat16)

    # L1: acc @ l1_w expressed as two H-wide bf16 dots summed (same math as the 2H-wide
    # dot).  l1_w / l1_b are lane-padded to 128 output columns (zeros), so h1 and all
    # following intermediates are lane-dense; padded columns are exactly 0 after the clip.
    h1 = (jnp.dot(a_l, l1w_ref[:H, :], preferred_element_type=jnp.float32)
          + jnp.dot(a_r, l1w_ref[H:, :], preferred_element_type=jnp.float32)
          + l1b_ref[...])
    l2_x = jnp.clip(h1, 0.0, 1.0)            # (TB, 128)

    # L2 is a tiny (lane-padded) MXU dot; L3 (32 -> 1) runs on the VPU/XLU as a multiply
    # + lane reduction, avoiding a 1-lane MXU pass in the kernel tail.
    l3_x = jnp.clip(jnp.dot(l2_x, l2w_ref[...], preferred_element_type=jnp.float32)
                    + l2b_ref[...], 0.0, 1.0)
    out_ref[...] = jnp.sum(l3_x * l3w_ref[...], axis=1, keepdims=True) + l3b_ref[...]


def chess_nnue_forward(white_features, black_features, stm, params, *, block_b=None):
    """params must come from prepare_params() (bf16 ft_w/l1_w, lane-padded tail layers)."""
    B = white_features.shape[0]
    H = HIDDEN_LAYER_SIZE

    if block_b is None:
        # Big tiles amortize the ~0.35us/step overhead; cap so small batches still
        # produce >= 2 grid steps (keeps both v7x TensorCores busy via "parallel").
        block_b = min(256, max(8, _round_up(-(-B // 2), 8)))
    block_b = max(8, _round_up(block_b, 8))
    B_pad = _round_up(B, block_b)
    if B_pad != B:
        pad = ((0, B_pad - B), (0, 0))
        white_features = jnp.pad(white_features, pad)
        black_features = jnp.pad(black_features, pad)
        stm = jnp.pad(stm, pad)
    nb = B_pad // block_b

    # Pre-stack the two perspectives per batch tile and cast to bf16 (features are 0/1,
    # so the cast is exact).  One contiguous (2*block_b, 768) DMA per grid step and no
    # in-kernel concat copy.
    feats = jnp.concatenate(
        [white_features.reshape(nb, block_b, FT_IN),
         black_features.reshape(nb, block_b, FT_IN)],
        axis=1).astype(jnp.bfloat16)                       # (nb, 2*block_b, 768)

    stream = lambda i: (i, 0)   # batch-streamed 2-D tiles
    pinned = lambda i: (0, 0)   # weights / biases: DMA'd once, VMEM-resident

    out = pl.pallas_call(
        nnue_kernel,
        out_shape=jax.ShapeDtypeStruct((B_pad, 1), jnp.float32),
        grid=(nb,),
        in_specs=[
            pl.BlockSpec((pl.Squeezed(), 2 * block_b, FT_IN),
                         lambda i: (i, 0, 0)),             # stacked features (bf16)
            pl.BlockSpec((block_b, 1), stream),            # stm (f32)
            pl.BlockSpec((FT_IN, H), pinned),              # ft_w (bf16)
            pl.BlockSpec((1, H), pinned),                  # ft_b (f32)
            pl.BlockSpec((2 * H, LANE), pinned),           # l1_w (bf16, lane-padded)
            pl.BlockSpec((1, LANE), pinned),               # l1_b (lane-padded)
            pl.BlockSpec((LANE, LANE), pinned),            # l2_w (lane-padded)
            pl.BlockSpec((1, LANE), pinned),               # l2_b (lane-padded)
            pl.BlockSpec((1, LANE), pinned),               # l3_w (row vector, padded)
            pl.BlockSpec((1, 1), pinned),                  # l3_b
        ],
        out_specs=pl.BlockSpec((block_b, 1), stream),
        compiler_params=pltpu.CompilerParams(
            dimension_semantics=("parallel",),             # shard batch tiles across TCs
            vmem_limit_bytes=32 * 1024 * 1024,             # > v5e default 16 MiB, < v7x phys
        ),
    )(feats, stm,
      params["ft_w"], params["ft_b"],
      params["l1_w"], params["l1_b"],
      params["l2_w"], params["l2_b"],
      params["l3_w"], params["l3_b"])
    # Padded batch rows produce defined-but-meaningless outputs; slice them off.
    return out[:B]


def init_params(key):
    # f32 master params, mimicking PyTorch's default uniform(-1/sqrt(fan_in), 1/sqrt(fan_in)).
    # Linear weights are kept pre-transposed as (in_features, out_features).
    def linear(key, fan_in, fan_out):
        kw, kb = jax.random.split(key)
        bound = 1.0 / jnp.sqrt(jnp.float32(fan_in))
        w = jax.random.uniform(kw, (fan_in, fan_out), jnp.float32, -bound, bound)
        b = jax.random.uniform(kb, (1, fan_out), jnp.float32, -bound, bound)
        return w, b

    k_ft, k1, k2, k3 = jax.random.split(key, 4)
    ft_w, ft_b = linear(k_ft, FT_IN, HIDDEN_LAYER_SIZE)
    l1_w, l1_b = linear(k1, 2 * HIDDEN_LAYER_SIZE, 8)
    l2_w, l2_b = linear(k2, 8, 32)
    l3_w, l3_b = linear(k3, 32, 1)
    return {
        "ft_w": ft_w, "ft_b": ft_b,
        "l1_w": l1_w, "l1_b": l1_b,
        "l2_w": l2_w, "l2_b": l2_b,
        "l3_w": l3_w, "l3_b": l3_b,
    }


def prepare_params(params):
    """Kernel-side layout: bf16 ft_w/l1_w; tail layers zero-padded to 128 lanes.

    Padded rows/cols are zero, so the padded dots/clips reproduce the original math
    exactly (padded output lanes are 0 and contribute nothing downstream).
    """
    H = HIDDEN_LAYER_SIZE
    l1_w = jnp.zeros((2 * H, LANE), jnp.float32).at[:, :8].set(params["l1_w"])
    l1_b = jnp.zeros((1, LANE), jnp.float32).at[:, :8].set(params["l1_b"])
    l2_w = jnp.zeros((LANE, LANE), jnp.float32).at[:8, :32].set(params["l2_w"])
    l2_b = jnp.zeros((1, LANE), jnp.float32).at[:, :32].set(params["l2_b"])
    l3_w = jnp.zeros((1, LANE), jnp.float32).at[:, :32].set(params["l3_w"].reshape(1, 32))
    return {
        "ft_w": params["ft_w"].astype(jnp.bfloat16),
        "ft_b": params["ft_b"],
        "l1_w": l1_w.astype(jnp.bfloat16),
        "l1_b": l1_b,
        "l2_w": l2_w,
        "l2_b": l2_b,
        "l3_w": l3_w,
        "l3_b": params["l3_b"],
    }


def reference_forward(white_features, black_features, stm, p):
    # Pure-JAX f32 reference replicating the PyTorch module exactly.
    w = white_features @ p["ft_w"] + p["ft_b"]
    b = black_features @ p["ft_w"] + p["ft_b"]
    acc = stm * jnp.concatenate([w, b], axis=1) + (1.0 - stm) * jnp.concatenate([b, w], axis=1)
    l1_x = jnp.clip(acc, 0.0, 1.0)
    l2_x = jnp.clip(l1_x @ p["l1_w"] + p["l1_b"], 0.0, 1.0)
    l3_x = jnp.clip(l2_x @ p["l2_w"] + p["l2_b"], 0.0, 1.0)
    return l3_x @ p["l3_w"] + p["l3_b"]


def _make_inputs(key, batch):
    kw, kb, ks = jax.random.split(key, 3)
    wf = jax.random.bernoulli(kw, 0.05, (batch, FT_IN)).astype(jnp.float32)
    bf = jax.random.bernoulli(kb, 0.05, (batch, FT_IN)).astype(jnp.float32)
    stm = jax.random.bernoulli(ks, 0.5, (batch, 1)).astype(jnp.float32)
    return wf, bf, stm


if __name__ == "__main__":
    key = jax.random.PRNGKey(0)
    k_params, k_in1, k_in2 = jax.random.split(key, 3)

    params = init_params(k_params)
    kparams = prepare_params(params)

    # bf16 ft_w / l1_w / L1 activations (f32 accumulation) -> ~1e-3 error vs f32 reference.
    TOL = dict(atol=1e-2, rtol=1e-2)

    # Case 1: small batch, single grid step.
    B1 = 8
    wf1, bf1, stm1 = _make_inputs(k_in1, B1)
    out1 = jax.block_until_ready(chess_nnue_forward(wf1, bf1, stm1, kparams))
    ref1 = reference_forward(wf1, bf1, stm1, params)
    assert out1.shape == (B1, 1)
    assert jnp.allclose(out1, ref1, **TOL), "case 1 mismatch vs pure-JAX reference"

    # Case 2: batch not a multiple of the tile — explicit tile, batch grid + padding path.
    B2 = 40
    wf2, bf2, stm2 = _make_inputs(k_in2, B2)
    out2 = jax.block_until_ready(chess_nnue_forward(wf2, bf2, stm2, kparams, block_b=16))
    ref2 = reference_forward(wf2, bf2, stm2, params)
    assert out2.shape == (B2, 1)
    assert jnp.allclose(out2, ref2, **TOL), "case 2 mismatch vs pure-JAX reference"

    # Case 3: same inputs, default tile selection (2 grid steps -> v7x two-core path).
    out3 = jax.block_until_ready(chess_nnue_forward(wf2, bf2, stm2, kparams))
    assert out3.shape == (B2, 1)
    assert jnp.allclose(out3, ref2, **TOL), "case 3 mismatch vs pure-JAX reference"

    print("KERNEL_OK")
</pallas_src>

<mosaic_0001>
module attributes {stable_mosaic.version = 11 : i64} {
  func.func @nnue_kernel(%arg0: i32, %arg1: memref<1x16x768xbf16, #tpu.memory_space<vmem>>, %arg2: memref<8x1xf32, #tpu.memory_space<vmem>>, %arg3: memref<768x1024xbf16, #tpu.memory_space<vmem>>, %arg4: memref<1x1024xf32, #tpu.memory_space<vmem>>, %arg5: memref<2048x128xbf16, #tpu.memory_space<vmem>>, %arg6: memref<1x128xf32, #tpu.memory_space<vmem>>, %arg7: memref<128x128xf32, #tpu.memory_space<vmem>>, %arg8: memref<1x128xf32, #tpu.memory_space<vmem>>, %arg9: memref<1x128xf32, #tpu.memory_space<vmem>>, %arg10: memref<1x1xf32, #tpu.memory_space<vmem>>, %arg11: memref<8x1xf32, #tpu.memory_space<vmem>>) attributes {dimension_semantics = [#tpu.dimension_semantics<parallel>], iteration_bounds = array<i64: 1>, scalar_prefetch = 0 : i64, scratch_operands = 0 : i64, tpu.core_type = #tpu.core_type<tc>, window_params = [{transform_indices = @transform_0, window_bounds = array<i64: 1, 16, 768>}, {transform_indices = @transform_1, window_bounds = array<i64: 8, 1>}, {pipeline_mode = #tpu.pipeline_mode<synchronous>, transform_indices = @transform_2, window_bounds = array<i64: 768, 1024>}, {pipeline_mode = #tpu.pipeline_mode<synchronous>, transform_indices = @transform_3, window_bounds = array<i64: 1, 1024>}, {pipeline_mode = #tpu.pipeline_mode<synchronous>, transform_indices = @transform_4, window_bounds = array<i64: 2048, 128>}, {pipeline_mode = #tpu.pipeline_mode<synchronous>, transform_indices = @transform_5, window_bounds = array<i64: 1, 128>}, {pipeline_mode = #tpu.pipeline_mode<synchronous>, transform_indices = @transform_6, window_bounds = array<i64: 128, 128>}, {pipeline_mode = #tpu.pipeline_mode<synchronous>, transform_indices = @transform_7, window_bounds = array<i64: 1, 128>}, {pipeline_mode = #tpu.pipeline_mode<synchronous>, transform_indices = @transform_8, window_bounds = array<i64: 1, 128>}, {pipeline_mode = #tpu.pipeline_mode<synchronous>, transform_indices = @transform_9, window_bounds = array<i64: 1, 1>}, {transform_indices = @transform_10, window_bounds = array<i64: 8, 1>}]} {
    %c0 = arith.constant 0 : index
    %c0_0 = arith.constant 0 : index
    %c0_1 = arith.constant 0 : index
    %0 = vector.load %arg1[%c0, %c0_0, %c0_1] : memref<1x16x768xbf16, #tpu.memory_space<vmem>>, vector<1x16x768xbf16>
    %1 = vector.shape_cast %0 : vector<1x16x768xbf16> to vector<16x768xbf16>
    %c0_2 = arith.constant 0 : index
    %c0_3 = arith.constant 0 : index
    %2 = vector.load %arg3[%c0_2, %c0_3] : memref<768x1024xbf16, #tpu.memory_space<vmem>>, vector<768x1024xbf16>
    %cst = arith.constant dense<0.000000e+00> : vector<16x1024xf32>
    %3 = tpu.matmul %1, %2, %cst {dimension_numbers = #tpu.dot_dimension_numbers<[1], [0], [0], [1], [0, 0, 1, 1], [], []>} : vector<16x768xbf16>, vector<768x1024xbf16>, vector<16x1024xf32> -> vector<16x1024xf32>
    %c0_4 = arith.constant 0 : index
    %c0_5 = arith.constant 0 : index
    %4 = vector.load %arg4[%c0_4, %c0_5] : memref<1x1024xf32, #tpu.memory_space<vmem>>, vector<1x1024xf32>
    %5 = vector.broadcast %4 : vector<1x1024xf32> to vector<16x1024xf32>
    %6 = arith.addf %3, %5 : vector<16x1024xf32>
    %7 = vector.extract_strided_slice %6 {offsets = [0, 0], sizes = [8, 1024], strides = [1, 1]} : vector<16x1024xf32> to vector<8x1024xf32>
    %8 = vector.extract_strided_slice %6 {offsets = [8, 0], sizes = [8, 1024], strides = [1, 1]} : vector<16x1024xf32> to vector<8x1024xf32>
    %c0_6 = arith.constant 0 : index
    %c0_7 = arith.constant 0 : index
    %9 = vector.load %arg2[%c0_6, %c0_7] : memref<8x1xf32, #tpu.memory_space<vmem>>, vector<8x1xf32>
    %10 = vector.broadcast %9 : vector<8x1xf32> to vector<8x1024xf32>
    %11 = arith.mulf %10, %7 : vector<8x1024xf32>
    %cst_8 = arith.constant 1.000000e+00 : f32
    %12 = vector.broadcast %cst_8 : f32 to vector<8x1xf32>
    %13 = arith.subf %12, %9 : vector<8x1xf32>
    %14 = vector.broadcast %13 : vector<8x1xf32> to vector<8x1024xf32>
    %15 = arith.mulf %14, %8 : vector<8x1024xf32>
    %16 = arith.addf %11, %15 : vector<8x1024xf32>
    %17 = arith.addf %7, %8 : vector<8x1024xf32>
    %18 = arith.subf %17, %16 : vector<8x1024xf32>
    %cst_9 = arith.constant 0.000000e+00 : f32
    %cst_10 = arith.constant 1.000000e+00 : f32
    %19 = vector.broadcast %cst_9 : f32 to vector<8x1024xf32>
    %20 = arith.maximumf %19, %16 : vector<8x1024xf32>
    %21 = vector.broadcast %cst_10 : f32 to vector<8x1024xf32>
    %22 = arith.minimumf %21, %20 : vector<8x1024xf32>
    %23 = arith.truncf %22 : vector<8x1024xf32> to vector<8x1024xbf16>
    %cst_11 = arith.constant 0.000000e+00 : f32
    %cst_12 = arith.constant 1.000000e+00 : f32
    %24 = vector.broadcast %cst_11 : f32 to vector<8x1024xf32>
    %25 = arith.maximumf %24, %18 : vector<8x1024xf32>
    %26 = vector.broadcast %cst_12 : f32 to vector<8x1024xf32>
    %27 = arith.minimumf %26, %25 : vector<8x1024xf32>
    %28 = arith.truncf %27 : vector<8x1024xf32> to vector<8x1024xbf16>
    %c0_13 = arith.constant 0 : index
    %c0_14 = arith.constant 0 : index
    %29 = vector.load %arg5[%c0_13, %c0_14] : memref<2048x128xbf16, #tpu.memory_space<vmem>>, vector<1024x128xbf16>
    %cst_15 = arith.constant dense<0.000000e+00> : vector<8x128xf32>
    %30 = tpu.matmul %23, %29, %cst_15 {dimension_numbers = #tpu.dot_dimension_numbers<[1], [0], [0], [1], [0, 0, 1, 1], [], []>} : vector<8x1024xbf16>, vector<1024x128xbf16>, vector<8x128xf32> -> vector<8x128xf32>
    %c1024 = arith.constant 1024 : index
    %c0_16 = arith.constant 0 : index
    %31 = vector.load %arg5[%c1024, %c0_16] : memref<2048x128xbf16, #tpu.memory_space<vmem>>, vector<1024x128xbf16>
    %cst_17 = arith.constant dense<0.000000e+00> : vector<8x128xf32>
    %32 = tpu.matmul %28, %31, %cst_17 {dimension_numbers = #tpu.dot_dimension_numbers<[1], [0], [0], [1], [0, 0, 1, 1], [], []>} : vector<8x1024xbf16>, vector<1024x128xbf16>, vector<8x128xf32> -> vector<8x128xf32>
    %33 = arith.addf %30, %32 : vector<8x128xf32>
    %c0_18 = arith.constant 0 : index
    %c0_19 = arith.constant 0 : index
    %34 = vector.load %arg6[%c0_18, %c0_19] : memref<1x128xf32, #tpu.memory_space<vmem>>, vector<1x128xf32>
    %35 = vector.broadcast %34 : vector<1x128xf32> to vector<8x128xf32>
    %36 = arith.addf %33, %35 : vector<8x128xf32>
    %cst_20 = arith.constant 0.000000e+00 : f32
    %cst_21 = arith.constant 1.000000e+00 : f32
    %37 = vector.broadcast %cst_20 : f32 to vector<8x128xf32>
    %38 = arith.maximumf %37, %36 : vector<8x128xf32>
    %39 = vector.broadcast %cst_21 : f32 to vector<8x128xf32>
    %40 = arith.minimumf %39, %38 : vector<8x128xf32>
    %c0_22 = arith.constant 0 : index
    %c0_23 = arith.constant 0 : index
    %41 = vector.load %arg7[%c0_22, %c0_23] : memref<128x128xf32, #tpu.memory_space<vmem>>, vector<128x128xf32>
    %cst_24 = arith.constant dense<0.000000e+00> : vector<8x128xf32>
    %42 = tpu.matmul %40, %41, %cst_24 {dimension_numbers = #tpu.dot_dimension_numbers<[1], [0], [0], [1], [0, 0, 1, 1], [], []>} : vector<8x128xf32>, vector<128x128xf32>, vector<8x128xf32> -> vector<8x128xf32>
    %c0_25 = arith.constant 0 : index
    %c0_26 = arith.constant 0 : index
    %43 = vector.load %arg8[%c0_25, %c0_26] : memref<1x128xf32, #tpu.memory_space<vmem>>, vector<1x128xf32>
    %44 = vector.broadcast %43 : vector<1x128xf32> to vector<8x128xf32>
    %45 = arith.addf %42, %44 : vector<8x128xf32>
    %cst_27 = arith.constant 0.000000e+00 : f32
    %cst_28 = arith.constant 1.000000e+00 : f32
    %46 = vector.broadcast %cst_27 : f32 to vector<8x128xf32>
    %47 = arith.maximumf %46, %45 : vector<8x128xf32>
    %48 = vector.broadcast %cst_28 : f32 to vector<8x128xf32>
    %49 = arith.minimumf %48, %47 : vector<8x128xf32>
    %c0_29 = arith.constant 0 : index
    %c0_30 = arith.constant 0 : index
    %50 = vector.load %arg9[%c0_29, %c0_30] : memref<1x128xf32, #tpu.memory_space<vmem>>, vector<1x128xf32>
    %51 = vector.broadcast %50 : vector<1x128xf32> to vector<8x128xf32>
    %52 = arith.mulf %49, %51 : vector<8x128xf32>
    %cst_31 = arith.constant dense<0.000000e+00> : vector<8xf32>
    %53 = vector.multi_reduction <add>, %52, %cst_31 [1] : vector<8x128xf32> to vector<8xf32>
    %54 = vector.shape_cast %53 : vector<8xf32> to vector<8x1xf32>
    %c0_32 = arith.constant 0 : index
    %c0_33 = arith.constant 0 : index
    %55 = vector.load %arg10[%c0_32, %c0_33] : memref<1x1xf32, #tpu.memory_space<vmem>>, vector<1x1xf32>
    %56 = vector.broadcast %55 : vector<1x1xf32> to vector<8x1xf32>
    %57 = arith.addf %54, %56 : vector<8x1xf32>
    %c0_34 = arith.constant 0 : index
    %c0_35 = arith.constant 0 : index
    %58 = vector.load %arg11[%c0_34, %c0_35] : memref<8x1xf32, #tpu.memory_space<vmem>>, vector<8x1xf32>
    tpu.vector_store %arg11[%c0_34, %c0_35], %57 {strides = array<i32>} : memref<8x1xf32, #tpu.memory_space<vmem>>, vector<8x1xf32>,
    return
  }
  func.func @transform_0(%arg0: i32) -> (i32, i32, i32) {
    %c0_i32 = arith.constant 0 : i32
    %c0_i32_0 = arith.constant 0 : i32
    %c0_i32_1 = arith.constant 0 : i32
    return %arg0, %c0_i32, %c0_i32_0 : i32, i32, i32
  }
  func.func @transform_1(%arg0: i32) -> (i32, i32) {
    %c0_i32 = arith.constant 0 : i32
    %c0_i32_0 = arith.constant 0 : i32
    return %arg0, %c0_i32 : i32, i32
  }
  func.func @transform_2(%arg0: i32) -> (i32, i32) {
    %c0_i32 = arith.constant 0 : i32
    %c0_i32_0 = arith.constant 0 : i32
    %c0_i32_1 = arith.constant 0 : i32
    return %c0_i32, %c0_i32_0 : i32, i32
  }
  func.func @transform_3(%arg0: i32) -> (i32, i32) {
    %c0_i32 = arith.constant 0 : i32
    %c0_i32_0 = arith.constant 0 : i32
    %c0_i32_1 = arith.constant 0 : i32
    return %c0_i32, %c0_i32_0 : i32, i32
  }
  func.func @transform_4(%arg0: i32) -> (i32, i32) {
    %c0_i32 = arith.constant 0 : i32
    %c0_i32_0 = arith.constant 0 : i32
    %c0_i32_1 = arith.constant 0 : i32
    return %c0_i32, %c0_i32_0 : i32, i32
  }
  func.func @transform_5(%arg0: i32) -> (i32, i32) {
    %c0_i32 = arith.constant 0 : i32
    %c0_i32_0 = arith.constant 0 : i32
    %c0_i32_1 = arith.constant 0 : i32
    return %c0_i32, %c0_i32_0 : i32, i32
  }
  func.func @transform_6(%arg0: i32) -> (i32, i32) {
    %c0_i32 = arith.constant 0 : i32
    %c0_i32_0 = arith.constant 0 : i32
    %c0_i32_1 = arith.constant 0 : i32
    return %c0_i32, %c0_i32_0 : i32, i32
  }
  func.func @transform_7(%arg0: i32) -> (i32, i32) {
    %c0_i32 = arith.constant 0 : i32
    %c0_i32_0 = arith.constant 0 : i32
    %c0_i32_1 = arith.constant 0 : i32
    return %c0_i32, %c0_i32_0 : i32, i32
  }
  func.func @transform_8(%arg0: i32) -> (i32, i32) {
    %c0_i32 = arith.constant 0 : i32
    %c0_i32_0 = arith.constant 0 : i32
    %c0_i32_1 = arith.constant 0 : i32
    return %c0_i32, %c0_i32_0 : i32, i32
  }
  func.func @transform_9(%arg0: i32) -> (i32, i32) {
    %c0_i32 = arith.constant 0 : i32
    %c0_i32_0 = arith.constant 0 : i32
    %c0_i32_1 = arith.constant 0 : i32
    return %c0_i32, %c0_i32_0 : i32, i32
  }
  func.func @transform_10(%arg0: i32) -> (i32, i32) {
    %c0_i32 = arith.constant 0 : i32
    %c0_i32_0 = arith.constant 0 : i32
    return %arg0, %c0_i32 : i32, i32
  }
}

</mosaic_0001>

<bundles_post_ra>
// kernel: tpu_custom_call.1
= control target key start
LH: loop header
LB: loop body
LE: loop exit
PB: predicated region body
PF: predicated region fallthrough
CT: control target
= control target key end

     0   :  { %s6042_s0 = inlined_call_operand.hbm [shape: bf16[1,16,768], index: 0, kind: input, shape index: {}]   ;;  %s6043_s1 = inlined_call_operand.vmem [shape: f32[8,1], index: 1, kind: input, shape index: {}]   ;;  %s6044_s2 = inlined_call_operand.hbm [shape: bf16[768,1024], index: 2, kind: input, shape index: {}]   ;;  %s6045_s3 = inlined_call_operand.hbm [shape: f32[1,1024], index: 3, kind: input, shape index: {}]   ;;  %s6046_s4 = inlined_call_operand.hbm [shape: bf16[2048,128], index: 4, kind: input, shape index: {}]   ;;  %s6047_s5 = inlined_call_operand.hbm [shape: f32[1,128], index: 5, kind: input, shape index: {}]   ;;  %s6048_s6 = inlined_call_operand.hbm [shape: f32[128,128], index: 6, kind: input, shape index: {}]   ;;  %s6049_s7 = inlined_call_operand.hbm [shape: f32[1,128], index: 7, kind: input, shape index: {}]   ;;  %s6050_s8 = inlined_call_operand.hbm [shape: f32[1,128], index: 8, kind: input, shape index: {}]   ;;  %s6051_s9 = inlined_call_operand.<no memory space> [shape: f32[1,1], index: 9, kind: input, shape index: {}]   ;;  %s6052_s10 = inlined_call_operand.vmem [shape: f32[8,1], index: 10, kind: output, shape index: {}]  }
   0x1   :  { %v15_v0 = vstv %s6051_s9 }
   0x2   :  { %16 = vst [vmem:[#allocation2] sm:$0x1] %v15_v0 }
   0x3   :  { %17 = vsyncpa [#allocation4], 0 }
   0x4   :  { %18 = vsyncpa [#allocation6], 0 }
   0x5   :  { %19 = vsyncpa [#allocation9], 0 }
   0x6   :  { %20 = vsyncpa [#allocation12], 0 }
   0x7   :  { %21 = vsyncpa [#allocation15], 0  ;;  %s5787_s15 = smov [#allocation5]   ;;  %s5601_s19 = scalar_lea.hbm %s6044_s2, 49152 }
   0x8   :  { %s41_s16 = sshll.u32 %s5787_s15, 4  ;;  %p5602_p0 = scmp.ne.s32.totalorder %s6044_s2, %s5601_s19  ;;  %s42_s16 = int_to_ptr.vmem [resolvable:$true] %s41_s16 }
   0x9   :  { %p5605_p1 = scmp.lt.u32.totalorder %s5601_s19, %s6044_s2 }
   0xb   :  { %p5607_p2 = pnand %p5605_p1, %p5602_p0 }
   0xd   :  { %5610 = shalt.err (!%p5607_p2)
}
   0xe   :  { %s5611_s9 = scalar_lea.vmem %s42_s16, 49152  ;;  %p5616_p4 = scmp.lt.s32.totalorder %s42_s16, %s42_s16 }
   0xf   :  { %p5612_p3 = scmp.ne.s32.totalorder %s42_s16, %s5611_s9  ;;  %p5617_p5 = scmp.lt.s32.totalorder %s5611_s9, %s5611_s9 }
  0x11   :  { %p5618_p6 = por %p5617_p5, %p5616_p4 }
  0x13   :  { %p5619_p7 = pnand %p5618_p6, %p5612_p3 }
  0x15   :  { %5622 = shalt.err (!%p5619_p7)
}
  0x16   :  { %s5788_s24 = smov 512   ;;  %s5789_s25 = smov 32  }
  0x17   :  { %47 = dma.hbm_to_vmem [thread:$0]  %s6044_s2, 49152, %s42_s16, [#allocation6], %s5788_s24, %s5788_s24, %s5789_s25  }
  0x18   :  { %s5790_s28 = smov [#allocation8]   ;;  %s5623_s12 = scalar_lea.hbm %s6046_s4, 16384 }
  0x19   :  { %s63_s29 = sshll.u32 %s5790_s28, 4  ;;  %p5624_p8 = scmp.ne.s32.totalorder %s6046_s4, %s5623_s12  ;;  %s64_s29 = int_to_ptr.vmem [resolvable:$true] %s63_s29 }
  0x1a   :  { %p5627_p9 = scmp.lt.u32.totalorder %s5623_s12, %s6046_s4 }
  0x1c   :  { %p5629_p10 = pnand %p5627_p9, %p5624_p8 }
  0x1e   :  { %5632 = shalt.err (!%p5629_p10)
}
  0x1f   :  { %s5633_s18 = scalar_lea.vmem %s64_s29, 16384  ;;  %p5638_p12 = scmp.lt.s32.totalorder %s64_s29, %s64_s29 }
  0x20   :  { %p5634_p11 = scmp.ne.s32.totalorder %s64_s29, %s5633_s18  ;;  %p5639_p13 = scmp.lt.s32.totalorder %s5633_s18, %s5633_s18 }
  0x22   :  { %p5640_p0 = por %p5639_p13, %p5638_p12 }
  0x24   :  { %p5641_p1 = pnand %p5640_p0, %p5634_p11 }
  0x26   :  { %5644 = shalt.err (!%p5641_p1)
}
  0x27   :  { %s5791_s2 = smov 64   ;;  %s5792_s16 = smov 4  }
  0x28   :  { %69 = dma.hbm_to_vmem [thread:$0]  %s6046_s4, 16384, %s64_s29, [#allocation9], %s5791_s2, %s5791_s2, %s5792_s16  }
  0x29   :  { %s5793_s21 = smov [#allocation11]   ;;  %s5645_s24 = scalar_lea.hbm %s6048_s6, 2048 }
  0x2a   :  { %s85_s22 = sshll.u32 %s5793_s21, 4  ;;  %p5646_p2 = scmp.ne.s32.totalorder %s6048_s6, %s5645_s24  ;;  %s86_s22 = int_to_ptr.vmem [resolvable:$true] %s85_s22 }
  0x2b   :  { %p5649_p3 = scmp.lt.u32.totalorder %s5645_s24, %s6048_s6 }
  0x2d   :  { %p5651_p4 = pnand %p5649_p3, %p5646_p2 }
  0x2f   :  { %5654 = shalt.err (!%p5651_p4)
}
  0x30   :  { %s5655_s30 = scalar_lea.vmem %s86_s22, 2048  ;;  %p5660_p6 = scmp.lt.s32.totalorder %s86_s22, %s86_s22 }
  0x31   :  { %p5656_p5 = scmp.ne.s32.totalorder %s86_s22, %s5655_s30  ;;  %p5661_p7 = scmp.lt.s32.totalorder %s5655_s30, %s5655_s30 }
  0x33   :  { %p5662_p8 = por %p5661_p7, %p5660_p6 }
  0x35   :  { %p5663_p9 = pnand %p5662_p8, %p5656_p5 }
  0x37   :  { %5666 = shalt.err (!%p5663_p9)
}
  0x38   :  { %s5794_s4 = smov 128   ;;  %s5795_s29 = smov 8  }
  0x39   :  { %91 = dma.hbm_to_vmem [thread:$0]  %s6048_s6, 2048, %s86_s22, [#allocation12], %s5794_s4, %s5794_s4, %s5795_s29  }
  0x3a   :  { %s5796_s13 = smov [#allocation3]   ;;  %s5667_s18 = scalar_lea.hbm %s6042_s0, 768 }
  0x3b   :  { %s27_s14 = sshll.u32 %s5796_s13, 4  ;;  %p5668_p10 = scmp.ne.s32.totalorder %s6042_s0, %s5667_s18  ;;  %s28_s14 = int_to_ptr.vmem [resolvable:$true] %s27_s14 }
  0x3c   :  { %p5671_p11 = scmp.lt.u32.totalorder %s5667_s18, %s6042_s0 }
  0x3e   :  { %p5673_p12 = pnand %p5671_p11, %p5668_p10 }
  0x40   :  { %5676 = shalt.err (!%p5673_p12)
}
  0x41   :  { %s5677_s21 = scalar_lea.vmem %s28_s14, 768  ;;  %p5682_p0 = scmp.lt.s32.totalorder %s28_s14, %s28_s14 }
  0x42   :  { %p5678_p13 = scmp.ne.s32.totalorder %s28_s14, %s5677_s21  ;;  %p5683_p1 = scmp.lt.s32.totalorder %s5677_s21, %s5677_s21 }
  0x44   :  { %p5684_p2 = por %p5683_p1, %p5682_p0 }
  0x46   :  { %p5685_p3 = pnand %p5684_p2, %p5678_p13 }
  0x48   :  { %5688 = shalt.err (!%p5685_p3)
}
  0x49   :  { %s5797_s6 = smov 384   ;;  %s5798_s22 = smov 24  }
  0x4a   :  { %33 = dma.hbm_to_vmem [thread:$0]  %s6042_s0, 768, %s28_s14, [#allocation4], %s5797_s6, %s5797_s6, %s5798_s22  }
  0x4b   :  { %s5799_s24 = smov [#allocation7]   ;;  %s5800_s26 = smov [#allocation10]  }
  0x4c   :  { %s54_s25 = sshll.u32 %s5799_s24, 4  ;;  %s76_s27 = sshll.u32 %s5800_s26, 4  ;;  %s55_s25 = int_to_ptr.vmem [resolvable:$true] %s54_s25  ;;  %s77_s27 = int_to_ptr.vmem [resolvable:$true] %s76_s27 }
  0x4d   :  { %s5689_s4 = scalar_lea.hbm %s6045_s3, 128 }
  0x4e   :  { %p5690_p4 = scmp.ne.s32.totalorder %s6045_s3, %s5689_s4  ;;  %p5693_p5 = scmp.lt.u32.totalorder %s5689_s4, %s6045_s3 }
  0x50   :  { %p5695_p6 = pnand %p5693_p5, %p5690_p4 }
  0x52   :  { %5698 = shalt.err (!%p5695_p6)
}
  0x53   :  { %s5699_s0 = scalar_lea.vmem %s55_s25, 128  ;;  %p5704_p8 = scmp.lt.s32.totalorder %s55_s25, %s55_s25 }
  0x54   :  { %p5700_p7 = scmp.ne.s32.totalorder %s55_s25, %s5699_s0  ;;  %p5705_p9 = scmp.lt.s32.totalorder %s5699_s0, %s5699_s0 }
  0x56   :  { %p5706_p10 = por %p5705_p9, %p5704_p8 }
  0x58   :  { %p5707_p11 = pnand %p5706_p10, %p5700_p7 }
  0x5a   :  { %5710 = shalt.err (!%p5707_p11)
}
  0x5b   :  { %57 = dma.hbm_to_vmem [thread:$0]  %s6045_s3, 128, %s55_s25, [#allocation6]  }
  0x5c   :  { %s5711_s2 = scalar_lea.hbm %s6047_s5, 16 }
  0x5d   :  { %p5712_p12 = scmp.ne.s32.totalorder %s6047_s5, %s5711_s2  ;;  %p5715_p13 = scmp.lt.u32.totalorder %s5711_s2, %s6047_s5 }
  0x5f   :  { %p5717_p0 = pnand %p5715_p13, %p5712_p12 }
  0x61   :  { %5720 = shalt.err (!%p5717_p0)
}
  0x62   :  { %s5721_s6 = scalar_lea.vmem %s77_s27, 16  ;;  %s5725_s22 = scalar_lea.vmem %s77_s27, 32 }
  0x63   :  { %p5722_p1 = scmp.ne.s32.totalorder %s77_s27, %s5721_s6  ;;  %p5726_p2 = scmp.lt.s32.totalorder %s77_s27, %s77_s27 }
  0x64   :  { %p5727_p3 = scmp.lt.s32.totalorder %s5725_s22, %s5721_s6 }
  0x66   :  { %p5728_p4 = por %p5727_p3, %p5726_p2 }
  0x68   :  { %p5729_p5 = pnand %p5728_p4, %p5722_p1 }
  0x6a   :  { %5732 = shalt.err (!%p5729_p5)
}
  0x6b   :  { %79 = dma.hbm_to_vmem [thread:$0]  %s6047_s5, 16, %s77_s27, [#allocation9]  }
  0x6c   :  { %s5801_s9 = smov [#allocation13]   ;;  %s5802_s25 = smov [#allocation14]  }
  0x6d   :  { %s98_s24 = sshll.u32 %s5801_s9, 4  ;;  %s108_s26 = sshll.u32 %s5802_s25, 4  ;;  %s99_s24 = int_to_ptr.vmem [resolvable:$true] %s98_s24  ;;  %s109_s26 = int_to_ptr.vmem [resolvable:$true] %s108_s26 }
  0x6e   :  { %s5733_s4 = scalar_lea.hbm %s6049_s7, 16 }
  0x6f   :  { %p5734_p6 = scmp.ne.s32.totalorder %s6049_s7, %s5733_s4  ;;  %p5737_p7 = scmp.lt.u32.totalorder %s5733_s4, %s6049_s7 }
  0x71   :  { %p5739_p8 = pnand %p5737_p7, %p5734_p6 }
  0x73   :  { %5742 = shalt.err (!%p5739_p8)
}
  0x74   :  { %s5743_s5 = scalar_lea.vmem %s99_s24, 16  ;;  %s5747_s27 = scalar_lea.vmem %s99_s24, 32 }
  0x75   :  { %p5744_p9 = scmp.ne.s32.totalorder %s99_s24, %s5743_s5  ;;  %p5748_p10 = scmp.lt.s32.totalorder %s99_s24, %s99_s24 }
  0x76   :  { %p5749_p11 = scmp.lt.s32.totalorder %s5747_s27, %s5743_s5 }
  0x78   :  { %p5750_p12 = por %p5749_p11, %p5748_p10 }
  0x7a   :  { %p5751_p13 = pnand %p5750_p12, %p5744_p9 }
  0x7c   :  { %5754 = shalt.err (!%p5751_p13)
}
  0x7d   :  { %101 = dma.hbm_to_vmem [thread:$0]  %s6049_s7, 16, %s99_s24, [#allocation12]  }
  0x7e   :  { %s5755_s18 = scalar_lea.hbm %s6050_s8, 16 }
  0x7f   :  { %p5756_p0 = scmp.ne.s32.totalorder %s6050_s8, %s5755_s18  ;;  %p5759_p1 = scmp.lt.u32.totalorder %s5755_s18, %s6050_s8 }
  0x81   :  { %p5761_p2 = pnand %p5759_p1, %p5756_p0 }
  0x83   :  { %5764 = shalt.err (!%p5761_p2)
}
  0x84   :  { %s5765_s21 = scalar_lea.vmem %s109_s26, 16  ;;  %s5769_s6 = scalar_lea.vmem %s109_s26, 32 }
  0x85   :  { %p5766_p3 = scmp.ne.s32.totalorder %s109_s26, %s5765_s21  ;;  %p5770_p4 = scmp.lt.s32.totalorder %s109_s26, %s109_s26 }
  0x86   :  { %p5771_p5 = scmp.lt.s32.totalorder %s5769_s6, %s5765_s21 }
  0x88   :  { %p5772_p6 = por %p5771_p5, %p5770_p4 }
  0x8a   :  { %p5773_p7 = pnand %p5772_p6, %p5766_p3 }
  0x8c   :  { %5776 = shalt.err (!%p5773_p7)
}
  0x8d   :  { %111 = dma.hbm_to_vmem [thread:$0]  %s6050_s8, 16, %s109_s26, [#allocation15]  }
  0x8e   :  { %5777 = dma.done.wait [#allocation4], 768  }
  0x8f   :  { %5778 = vsyncadd [#allocation4], 4294966528 }
  0x90   :  { %5779 = dma.done.wait [#allocation6], 49280  }
  0x91   :  { %5780 = vsyncadd [#allocation6], 4294918016 }
  0x92   :  { %5781 = dma.done.wait [#allocation9], 16400  }
  0x93   :  { %5782 = vsyncadd [#allocation9], 4294950896 }
  0x94   :  { %5783 = dma.done.wait [#allocation12], 2064  }
  0x95   :  { %5784 = vsyncadd [#allocation12], 4294965232 }
  0x96   :  { %5785 = dma.done.wait [#allocation15], 16  }
  0x97   :  { %5786 = vsyncadd [#allocation15], 4294967280  ;;  %v145_v1 = vld [vmem:[#allocation5] sm:$0xff]  ;;  %v146_v3 = vld [vmem:[#allocation5 + $0x8] sm:$0xff]  ;;  %vm5805_vm0 = vmmov 0   ;;  %vm4604_vm1 = vcmask 7168  }
  0x98   :  { %v149_v2 = vld [vmem:[#allocation5 + $0x20] sm:$0xff]  ;;  %v150_v5 = vld [vmem:[#allocation5 + $0x28] sm:$0xff] }
  0x99   :  { %v4622_v4 = vcombine.high %v145_v1, %v149_v2  ;;  %v4621_v6 = vcombine.low %v145_v1, %v149_v2  ;;  %v153_v7 = vld [vmem:[#allocation5 + $0x40] sm:$0xff]  ;;  %v4624_v9 = vcombine.high %v146_v3, %v150_v5  ;;  %v4623_v10 = vcombine.low %v146_v3, %v150_v5  ;;  %v154_v12 = vld [vmem:[#allocation5 + $0x48] sm:$0xff] }
  0x9a   :  { %v157_v8 = vld [vmem:[#allocation5 + $0x60] sm:$0xff]  ;;  %v158_v13 = vld [vmem:[#allocation5 + $0x68] sm:$0xff] }
  0x9b   :  { %v4630_v11 = vcombine.high %v153_v7, %v157_v8  ;;  %v161_v14 = vld [vmem:[#allocation5 + $0x80] sm:$0xff]  ;;  %2521 = vmatprep.subr.bf16.mxu0 %v4622_v4  ;;  %v4632_v15 = vcombine.high %v154_v12, %v158_v13  ;;  %v162_v17 = vld [vmem:[#allocation5 + $0x88] sm:$0xff]  ;;  %2650 = vmatprep.subr.bf16.mxu1 %v4624_v9  ;;  %v4629_v19 = vcombine.low %v153_v7, %v157_v8 }
  0x9c   :  { %v165_v16 = vld [vmem:[#allocation5 + $0xa0] sm:$0xff]  ;;  %v166_v18 = vld [vmem:[#allocation5 + $0xa8] sm:$0xff]  ;;  %2522 = vmatpush1.bf16.msra.mxu0 %v4621_v6  ;;  %2651 = vmatpush1.bf16.msra.mxu1 %v4623_v10  ;;  %v4631_v20 = vcombine.low %v154_v12, %v158_v13 }
  0x9d   :  { %2523 = vmatprep.subr.bf16.mxu0 %v4630_v11  ;;  %v4638_v21 = vcombine.high %v161_v14, %v165_v16  ;;  %2652 = vmatprep.subr.bf16.mxu1 %v4632_v15  ;;  %v4640_v22 = vcombine.high %v162_v17, %v166_v18  ;;  %v169_v23 = vld [vmem:[#allocation5 + $0xc0] sm:$0xff]  ;;  %v170_v25 = vld [vmem:[#allocation5 + $0xc8] sm:$0xff]  ;;  %v4637_v27 = vcombine.low %v161_v14, %v165_v16 }
  0x9e   :  { %v173_v24 = vld [vmem:[#allocation5 + $0xe0] sm:$0xff]  ;;  %v174_v26 = vld [vmem:[#allocation5 + $0xe8] sm:$0xff]  ;;  %v4639_v28 = vcombine.low %v162_v17, %v166_v18 }
  0x9f   :  { %v4646_v29 = vcombine.high %v169_v23, %v173_v24  ;;  %v4648_v30 = vcombine.high %v170_v25, %v174_v26  ;;  %v177_v31 = vld [vmem:[#allocation5 + $0x100] sm:$0xff]  ;;  %v178_v33 = vld [vmem:[#allocation5 + $0x108] sm:$0xff]  ;;  %v4645_v35 = vcombine.low %v169_v23, %v173_v24  ;;  %v4647_v36 = vcombine.low %v170_v25, %v174_v26 }
  0xa0   :  { %2524 = vmatpush1.bf16.msra.mxu0 %v4629_v19  ;;  %2653 = vmatpush1.bf16.msra.mxu1 %v4631_v20  ;;  %v181_v32 = vld [vmem:[#allocation5 + $0x120] sm:$0xff]  ;;  %v182_v34 = vld [vmem:[#allocation5 + $0x128] sm:$0xff] }
  0xa1   :  { %2525 = vmatprep.subr.bf16.mxu0 %v4638_v21  ;;  %2654 = vmatprep.subr.bf16.mxu1 %v4640_v22  ;;  %v4654_v37 = vcombine.high %v177_v31, %v181_v32  ;;  %v4656_v38 = vcombine.high %v178_v33, %v182_v34  ;;  %v185_v39 = vld [vmem:[#allocation5 + $0x140] sm:$0xff]  ;;  %v186_v41 = vld [vmem:[#allocation5 + $0x148] sm:$0xff]  ;;  %v4653_v43 = vcombine.low %v177_v31, %v181_v32 }
  0xa2   :  { %v189_v40 = vld [vmem:[#allocation5 + $0x160] sm:$0xff]  ;;  %v190_v42 = vld [vmem:[#allocation5 + $0x168] sm:$0xff]  ;;  %v4655_v44 = vcombine.low %v178_v33, %v182_v34 }
  0xa3   :  { %v4662_v45 = vcombine.high %v185_v39, %v189_v40  ;;  %v4664_v46 = vcombine.high %v186_v41, %v190_v42  ;;  %v193_v47 = vld [vmem:[#allocation5 + $0x180] sm:$0xff]  ;;  %v194_v49 = vld [vmem:[#allocation5 + $0x188] sm:$0xff]  ;;  %v4661_v51 = vcombine.low %v185_v39, %v189_v40  ;;  %v4663_v52 = vcombine.low %v186_v41, %v190_v42 }
  0xa4   :  { %2526 = vmatpush1.bf16.msra.mxu0 %v4637_v27  ;;  %2655 = vmatpush1.bf16.msra.mxu1 %v4639_v28  ;;  %v197_v48 = vld [vmem:[#allocation5 + $0x1a0] sm:$0xff]  ;;  %v198_v50 = vld [vmem:[#allocation5 + $0x1a8] sm:$0xff] }
  0xa5   :  { %2527 = vmatprep.subr.bf16.mxu0 %v4646_v29  ;;  %2656 = vmatprep.subr.bf16.mxu1 %v4648_v30  ;;  %v4670_v53 = vcombine.high %v193_v47, %v197_v48  ;;  %v4672_v54 = vcombine.high %v194_v49, %v198_v50  ;;  %v201_v55 = vld [vmem:[#allocation5 + $0x1c0] sm:$0xff]  ;;  %v5458_v57 = vld [vmem:[#allocation3 + $0x4] ss:$24 sps:$4 sm:$0xff]   ;;  %v4669_v60 = vcombine.low %v193_v47, %v197_v48 }
  0xa6   :  { %v205_v56 = vld [vmem:[#allocation5 + $0x1e0] sm:$0xff]  ;;  %v202_v58 = vld [vmem:[#allocation5 + $0x1c8] sm:$0xff]  ;;  %2553 = vmatprep.mubr.bf16.mxu0 %v5458_v57  ;;  %v4671_v61 = vcombine.low %v194_v49, %v198_v50  ;;  %2682 = vmatprep.mubr.bf16.mxu1 %v5458_v57 }
  0xa7   :  { %v206_v59 = vld [vmem:[#allocation5 + $0x1e8] sm:$0xff]  ;;  %v4678_v62 = vcombine.high %v201_v55, %v205_v56  ;;  %v209_v0 = vld [vmem:[#allocation5 + $0x200] sm:$0xff]  ;;  %v4677_v4 = vcombine.low %v201_v55, %v205_v56 }
  0xa8   :  { %2528 = vmatpush1.bf16.msra.mxu0 %v4645_v35  ;;  %2657 = vmatpush1.bf16.msra.mxu1 %v4647_v36  ;;  %v4680_v63 = vcombine.high %v202_v58, %v206_v59  ;;  %v213_v1 = vld [vmem:[#allocation5 + $0x220] sm:$0xff]  ;;  %v210_v2 = vld [vmem:[#allocation5 + $0x208] sm:$0xff]  ;;  %v4679_v5 = vcombine.low %v202_v58, %v206_v59 }
  0xa9   :  { %2529 = vmatprep.subr.bf16.mxu0 %v4654_v37  ;;  %2658 = vmatprep.subr.bf16.mxu1 %v4656_v38  ;;  %v214_v3 = vld [vmem:[#allocation5 + $0x228] sm:$0xff]  ;;  %v4686_v6 = vcombine.high %v209_v0, %v213_v1  ;;  %v217_v8 = vld [vmem:[#allocation5 + $0x240] sm:$0xff]  ;;  %v4685_v12 = vcombine.low %v209_v0, %v213_v1 }
  0xaa   :  { %v4688_v7 = vcombine.high %v210_v2, %v214_v3  ;;  %v221_v9 = vld [vmem:[#allocation5 + $0x260] sm:$0xff]  ;;  %v218_v10 = vld [vmem:[#allocation5 + $0x248] sm:$0xff]  ;;  %v4687_v13 = vcombine.low %v210_v2, %v214_v3 }
  0xab   :  { %v222_v11 = vld [vmem:[#allocation5 + $0x268] sm:$0xff]  ;;  %v4694_v14 = vcombine.high %v217_v8, %v221_v9  ;;  %v225_v16 = vld [vmem:[#allocation5 + $0x280] sm:$0xff]  ;;  %v4693_v20 = vcombine.low %v217_v8, %v221_v9 }
  0xac   :  { %2530 = vmatpush1.bf16.msra.mxu0 %v4653_v43  ;;  %2659 = vmatpush1.bf16.msra.mxu1 %v4655_v44  ;;  %v4696_v15 = vcombine.high %v218_v10, %v222_v11  ;;  %v229_v17 = vld [vmem:[#allocation5 + $0x2a0] sm:$0xff]  ;;  %v226_v18 = vld [vmem:[#allocation5 + $0x288] sm:$0xff]  ;;  %v4695_v21 = vcombine.low %v218_v10, %v222_v11 }
  0xad   :  { %2531 = vmatprep.subr.bf16.mxu0 %v4662_v45  ;;  %2660 = vmatprep.subr.bf16.mxu1 %v4664_v46  ;;  %v230_v19 = vld [vmem:[#allocation5 + $0x2a8] sm:$0xff]  ;;  %v4702_v22 = vcombine.high %v225_v16, %v229_v17  ;;  %v233_v24 = vld [vmem:[#allocation5 + $0x2c0] sm:$0xff]  ;;  %v4701_v28 = vcombine.low %v225_v16, %v229_v17 }
  0xae   :  { %v4704_v23 = vcombine.high %v226_v18, %v230_v19  ;;  %v237_v25 = vld [vmem:[#allocation5 + $0x2e0] sm:$0xff]  ;;  %v234_v26 = vld [vmem:[#allocation5 + $0x2c8] sm:$0xff]  ;;  %v4703_v29 = vcombine.low %v226_v18, %v230_v19  ;;  %v5461_v19 = vld [vmem:[#allocation3 + $0xc] ss:$24 sps:$4 sm:$0xff]  }
  0xaf   :  { %v238_v27 = vld [vmem:[#allocation5 + $0x2e8] sm:$0xff]  ;;  %v4710_v30 = vcombine.high %v233_v24, %v237_v25  ;;  %v241_v32 = vld [vmem:[#allocation5 + $0x300] sm:$0xff]  ;;  %v4709_v36 = vcombine.low %v233_v24, %v237_v25 }
  0xb0   :  { %2532 = vmatpush1.bf16.msra.mxu0 %v4661_v51  ;;  %2661 = vmatpush1.bf16.msra.mxu1 %v4663_v52  ;;  %v4712_v31 = vcombine.high %v234_v26, %v238_v27  ;;  %v245_v33 = vld [vmem:[#allocation5 + $0x320] sm:$0xff]  ;;  %v242_v34 = vld [vmem:[#allocation5 + $0x308] sm:$0xff]  ;;  %v4711_v37 = vcombine.low %v234_v26, %v238_v27 }
  0xb1   :  { %2533 = vmatprep.subr.bf16.mxu0 %v4670_v53  ;;  %2662 = vmatprep.subr.bf16.mxu1 %v4672_v54  ;;  %v246_v35 = vld [vmem:[#allocation5 + $0x328] sm:$0xff]  ;;  %v4718_v38 = vcombine.high %v241_v32, %v245_v33  ;;  %v249_v40 = vld [vmem:[#allocation5 + $0x340] sm:$0xff]  ;;  %v4717_v44 = vcombine.low %v241_v32, %v245_v33 }
  0xb2   :  { %v4720_v39 = vcombine.high %v242_v34, %v246_v35  ;;  %v253_v41 = vld [vmem:[#allocation5 + $0x360] sm:$0xff]  ;;  %v250_v42 = vld [vmem:[#allocation5 + $0x348] sm:$0xff]  ;;  %v4719_v45 = vcombine.low %v242_v34, %v246_v35 }
  0xb3   :  { %v254_v43 = vld [vmem:[#allocation5 + $0x368] sm:$0xff]  ;;  %v4726_v46 = vcombine.high %v249_v40, %v253_v41  ;;  %v257_v48 = vld [vmem:[#allocation5 + $0x380] sm:$0xff]  ;;  %v4725_v52 = vcombine.low %v249_v40, %v253_v41 }
  0xb4   :  { %2534 = vmatpush1.bf16.msra.mxu0 %v4669_v60  ;;  %2663 = vmatpush1.bf16.msra.mxu1 %v4671_v61  ;;  %v4728_v47 = vcombine.high %v250_v42, %v254_v43  ;;  %v261_v49 = vld [vmem:[#allocation5 + $0x3a0] sm:$0xff]  ;;  %v258_v50 = vld [vmem:[#allocation5 + $0x388] sm:$0xff]  ;;  %v4727_v53 = vcombine.low %v250_v42, %v254_v43 }
  0xb5   :  { %2535 = vmatprep.subr.bf16.mxu0 %v4678_v62  ;;  %2664 = vmatprep.subr.bf16.mxu1 %v4680_v63  ;;  %v262_v51 = vld [vmem:[#allocation5 + $0x3a8] sm:$0xff]  ;;  %v4734_v54 = vcombine.high %v257_v48, %v261_v49  ;;  %v265_v56 = vld [vmem:[#allocation5 + $0x3c0] sm:$0xff]  ;;  %v4733_v60 = vcombine.low %v257_v48, %v261_v49 }
  0xb6   :  { %v4736_v55 = vcombine.high %v258_v50, %v262_v51  ;;  %v269_v57 = vld [vmem:[#allocation5 + $0x3e0] sm:$0xff]  ;;  %v266_v58 = vld [vmem:[#allocation5 + $0x3c8] sm:$0xff]  ;;  %v4735_v61 = vcombine.low %v258_v50, %v262_v51 }
  0xb7   :  { %v270_v59 = vld [vmem:[#allocation5 + $0x3e8] sm:$0xff]  ;;  %v4742_v62 = vcombine.high %v265_v56, %v269_v57  ;;  %v273_v0 = vld [vmem:[#allocation5 + $0x400] sm:$0xff] }
  0xb8   :  { %2536 = vmatpush1.bf16.msra.mxu0 %v4677_v4  ;;  %2665 = vmatpush1.bf16.msra.mxu1 %v4679_v5  ;;  %v4744_v63 = vcombine.high %v266_v58, %v270_v59  ;;  %v277_v1 = vld [vmem:[#allocation5 + $0x420] sm:$0xff]  ;;  %v274_v2 = vld [vmem:[#allocation5 + $0x408] sm:$0xff]  ;;  %v4741_v4 = vcombine.low %v265_v56, %v269_v57  ;;  %v4743_v5 = vcombine.low %v266_v58, %v270_v59 }
  0xb9   :  { %2537 = vmatprep.subr.bf16.mxu0 %v4686_v6  ;;  %2666 = vmatprep.subr.bf16.mxu1 %v4688_v7  ;;  %v278_v3 = vld [vmem:[#allocation5 + $0x428] sm:$0xff]  ;;  %v4750_v6 = vcombine.high %v273_v0, %v277_v1  ;;  %v281_v8 = vld [vmem:[#allocation5 + $0x440] sm:$0xff] }
  0xba   :  { %v4752_v7 = vcombine.high %v274_v2, %v278_v3  ;;  %v285_v9 = vld [vmem:[#allocation5 + $0x460] sm:$0xff]  ;;  %v5460_v10 = vld [vmem:[#allocation3] ss:$24 sps:$4 sm:$0xff]  }
  0xbb   :  { %v282_v11 = vld [vmem:[#allocation5 + $0x448] sm:$0xff]  ;;  %v289_v16 = vld [vmem:[#allocation5 + $0x480] sm:$0xff] }
  0xbc   :  { %2538 = vmatpush1.bf16.msra.mxu0 %v4685_v12  ;;  %2667 = vmatpush1.bf16.msra.mxu1 %v4687_v13  ;;  %v286_v12 = vld [vmem:[#allocation5 + $0x468] sm:$0xff]  ;;  %v4749_v13 = vcombine.low %v273_v0, %v277_v1  ;;  %v293_v18 = vld [vmem:[#allocation5 + $0x4a0] sm:$0xff] }
  0xbd   :  { %2539 = vmatprep.subr.bf16.mxu0 %v4694_v14  ;;  %2668 = vmatprep.subr.bf16.mxu1 %v4696_v15  ;;  %v4751_v14 = vcombine.low %v274_v2, %v278_v3  ;;  %v4758_v15 = vcombine.high %v281_v8, %v285_v9  ;;  %v4760_v17 = vcombine.high %v282_v11, %v286_v12  ;;  %v297_v25 = vld [vmem:[#allocation5 + $0x4c0] sm:$0xff]  ;;  %v306_v35 = vld [vmem:[#allocation5 + $0x508] sm:$0xff] }
  0xbe   :  { %v4766_v24 = vcombine.high %v289_v16, %v293_v18  ;;  %v301_v26 = vld [vmem:[#allocation5 + $0x4e0] sm:$0xff]  ;;  %v314_v43 = vld [vmem:[#allocation5 + $0x548] sm:$0xff] }
  0xbf   :  { %v4774_v32 = vcombine.high %v297_v25, %v301_v26  ;;  %v305_v33 = vld [vmem:[#allocation5 + $0x500] sm:$0xff]  ;;  %v322_v51 = vld [vmem:[#allocation5 + $0x588] sm:$0xff] }
  0xc0   :  { %2540 = vmatpush1.bf16.msra.mxu0 %v4693_v20  ;;  %2669 = vmatpush1.bf16.msra.mxu1 %v4695_v21  ;;  %v290_v20 = vld [vmem:[#allocation5 + $0x488] sm:$0xff]  ;;  %v309_v34 = vld [vmem:[#allocation5 + $0x520] sm:$0xff] }
  0xc1   :  { %2541 = vmatprep.subr.bf16.mxu0 %v4702_v22  ;;  %2670 = vmatprep.subr.bf16.mxu1 %v4704_v23  ;;  %v294_v21 = vld [vmem:[#allocation5 + $0x4a8] sm:$0xff]  ;;  %v4757_v22 = vcombine.low %v281_v8, %v285_v9  ;;  %v4759_v23 = vcombine.low %v282_v11, %v286_v12  ;;  %v4782_v40 = vcombine.high %v305_v33, %v309_v34  ;;  %v313_v41 = vld [vmem:[#allocation5 + $0x540] sm:$0xff] }
  0xc2   :  { %v4768_v27 = vcombine.high %v290_v20, %v294_v21  ;;  %v317_v42 = vld [vmem:[#allocation5 + $0x560] sm:$0xff]  ;;  %v330_v59 = vld [vmem:[#allocation5 + $0x5c8] sm:$0xff] }
  0xc3   :  { %v4790_v48 = vcombine.high %v313_v41, %v317_v42  ;;  %v321_v49 = vld [vmem:[#allocation5 + $0x580] sm:$0xff]  ;;  %v338_v3 = vld [vmem:[#allocation5 + $0x608] sm:$0xff] }
  0xc4   :  { %2542 = vmatpush1.bf16.msra.mxu0 %v4701_v28  ;;  %2671 = vmatpush1.bf16.msra.mxu1 %v4703_v29  ;;  %v298_v28 = vld [vmem:[#allocation5 + $0x4c8] sm:$0xff]  ;;  %v325_v50 = vld [vmem:[#allocation5 + $0x5a0] sm:$0xff] }
  0xc5   :  { %2543 = vmatprep.subr.bf16.mxu0 %v4710_v30  ;;  %2672 = vmatprep.subr.bf16.mxu1 %v4712_v31  ;;  %v302_v29 = vld [vmem:[#allocation5 + $0x4e8] sm:$0xff]  ;;  %v4765_v30 = vcombine.low %v289_v16, %v293_v18  ;;  %v4767_v31 = vcombine.low %v290_v20, %v294_v21  ;;  %v4798_v56 = vcombine.high %v321_v49, %v325_v50  ;;  %v329_v57 = vld [vmem:[#allocation5 + $0x5c0] sm:$0xff] }
  0xc6   :  { %v333_v58 = vld [vmem:[#allocation5 + $0x5e0] sm:$0xff]  ;;  %v346_v11 = vld [vmem:[#allocation5 + $0x648] sm:$0xff] }
  0xc7   :  { %v4806_v0 = vcombine.high %v329_v57, %v333_v58  ;;  %v337_v1 = vld [vmem:[#allocation5 + $0x600] sm:$0xff]  ;;  %v358_v21 = vld [vmem:[#allocation5 + $0x6a8] sm:$0xff] }
  0xc8   :  { %2544 = vmatpush1.bf16.msra.mxu0 %v4709_v36  ;;  %2673 = vmatpush1.bf16.msra.mxu1 %v4711_v37  ;;  %v4776_v36 = vcombine.high %v298_v28, %v302_v29  ;;  %v310_v37 = vld [vmem:[#allocation5 + $0x528] sm:$0xff]  ;;  %v341_v2 = vld [vmem:[#allocation5 + $0x620] sm:$0xff] }
  0xc9   :  { %2545 = vmatprep.subr.bf16.mxu0 %v4718_v38  ;;  %2674 = vmatprep.subr.bf16.mxu1 %v4720_v39  ;;  %v4773_v38 = vcombine.low %v297_v25, %v301_v26  ;;  %v4775_v39 = vcombine.low %v298_v28, %v302_v29  ;;  %v4814_v8 = vcombine.high %v337_v1, %v341_v2  ;;  %v345_v9 = vld [vmem:[#allocation5 + $0x640] sm:$0xff]  ;;  %v366_v29 = vld [vmem:[#allocation5 + $0x6e8] sm:$0xff] }
  0xca   :  { %v357_v18 = vld [vmem:[#allocation5 + $0x6a0] sm:$0xff] }
  0xcb   :  { %v361_v25 = vld [vmem:[#allocation5 + $0x6c0] sm:$0xff] }
  0xcc   :  { %2546 = vmatpush1.bf16.msra.mxu0 %v4717_v44  ;;  %2675 = vmatpush1.bf16.msra.mxu1 %v4719_v45  ;;  %v4784_v44 = vcombine.high %v306_v35, %v310_v37  ;;  %v318_v45 = vld [vmem:[#allocation5 + $0x568] sm:$0xff]  ;;  %v365_v26 = vld [vmem:[#allocation5 + $0x6e0] sm:$0xff] }
  0xcd   :  { %2547 = vmatprep.subr.bf16.mxu0 %v4726_v46  ;;  %2676 = vmatprep.subr.bf16.mxu1 %v4728_v47  ;;  %v4781_v46 = vcombine.low %v305_v33, %v309_v34  ;;  %v4783_v47 = vcombine.low %v306_v35, %v310_v37  ;;  %v369_v33 = vld [vmem:[#allocation5 + $0x700] sm:$0xff]  ;;  %v370_v35 = vld [vmem:[#allocation5 + $0x708] sm:$0xff] }
  0xce   :  { %v373_v34 = vld [vmem:[#allocation5 + $0x720] sm:$0xff]  ;;  %v374_v37 = vld [vmem:[#allocation5 + $0x728] sm:$0xff] }
  0xd0   :  { %2548 = vmatpush1.bf16.msra.mxu0 %v4725_v52  ;;  %2677 = vmatpush1.bf16.msra.mxu1 %v4727_v53  ;;  %v4792_v52 = vcombine.high %v314_v43, %v318_v45  ;;  %v326_v53 = vld [vmem:[#allocation5 + $0x5a8] sm:$0xff] }
  0xd1   :  { %2549 = vmatprep.subr.bf16.mxu0 %v4734_v54  ;;  %2678 = vmatprep.subr.bf16.mxu1 %v4736_v55  ;;  %v4789_v54 = vcombine.low %v313_v41, %v317_v42  ;;  %v4791_v55 = vcombine.low %v314_v43, %v318_v45  ;;  %v377_v41 = vld [vmem:[#allocation5 + $0x740] sm:$0xff]  ;;  %v378_v43 = vld [vmem:[#allocation5 + $0x748] sm:$0xff] }
  0xd2   :  { %v381_v42 = vld [vmem:[#allocation5 + $0x760] sm:$0xff]  ;;  %v382_v45 = vld [vmem:[#allocation5 + $0x768] sm:$0xff] }
  0xd4   :  { %2550 = vmatpush1.bf16.msra.mxu0 %v4733_v60  ;;  %2679 = vmatpush1.bf16.msra.mxu1 %v4735_v61  ;;  %v4800_v60 = vcombine.high %v322_v51, %v326_v53  ;;  %v334_v61 = vld [vmem:[#allocation5 + $0x5e8] sm:$0xff] }
  0xd5   :  { %2551 = vmatprep.subr.bf16.mxu0 %v4742_v62  ;;  %2680 = vmatprep.subr.bf16.mxu1 %v4744_v63  ;;  %v4797_v62 = vcombine.low %v321_v49, %v325_v50  ;;  %v4799_v63 = vcombine.low %v322_v51, %v326_v53  ;;  %v385_v49 = vld [vmem:[#allocation5 + $0x780] sm:$0xff]  ;;  %v386_v51 = vld [vmem:[#allocation5 + $0x788] sm:$0xff] }
  0xd6   :  { %v389_v50 = vld [vmem:[#allocation5 + $0x7a0] sm:$0xff]  ;;  %v390_v53 = vld [vmem:[#allocation5 + $0x7a8] sm:$0xff] }
  0xd8   :  { %2552 = vmatpush1.bf16.msra.mxu0 %v4741_v4  ;;  %2681 = vmatpush1.bf16.msra.mxu1 %v4743_v5  ;;  %v4808_v4 = vcombine.high %v330_v59, %v334_v61  ;;  %v342_v5 = vld [vmem:[#allocation5 + $0x628] sm:$0xff] }
  0xd9   :  { %2564 = vmatprep.subr.bf16.mxu0 %v4750_v6  ;;  %2693 = vmatprep.subr.bf16.mxu1 %v4752_v7  ;;  %v4805_v6 = vcombine.low %v329_v57, %v333_v58  ;;  %v4807_v7 = vcombine.low %v330_v59, %v334_v61  ;;  %v4816_v12 = vcombine.high %v338_v3, %v342_v5  ;;  %v393_v57 = vld [vmem:[#allocation5 + $0x7c0] sm:$0xff]  ;;  %v394_v59 = vld [vmem:[#allocation5 + $0x7c8] sm:$0xff] }
  0xda   :  { %v397_v58 = vld [vmem:[#allocation5 + $0x7e0] sm:$0xff]  ;;  %v398_v61 = vld [vmem:[#allocation5 + $0x7e8] sm:$0xff] }
  0xdb   :  { %2554 = vmatmul.mubr.bf16.vlgmr.msra.gmra.mrb[0].mxu0 %v5460_v10  ;;  %2683 = vmatmul.mubr.bf16.vlgmr.msra.gmra.mrb[0].mxu1 %v5460_v10  ;;  %v349_v10 = vld [vmem:[#allocation5 + $0x660] sm:$0xff] }
  0xdc   :  { %2565 = vmatpush1.bf16.msra.mxu0 %v4749_v13  ;;  %2694 = vmatpush1.bf16.msra.mxu1 %v4751_v14  ;;  %v350_v13 = vld [vmem:[#allocation5 + $0x668] sm:$0xff]  ;;  %v4813_v14 = vcombine.low %v337_v1, %v341_v2  ;;  %v4822_v16 = vcombine.high %v345_v9, %v349_v10  ;;  %v401_v1 = vld [vmem:[#allocation5 + $0x800] sm:$0xff] }
  0xdd   :  { %2566 = vmatprep.subr.bf16.mxu0 %v4758_v15  ;;  %2695 = vmatprep.subr.bf16.mxu1 %v4760_v17  ;;  %v4815_v15 = vcombine.low %v338_v3, %v342_v5  ;;  %v353_v17 = vld [vmem:[#allocation5 + $0x680] sm:$0xff]  ;;  %v4824_v20 = vcombine.high %v346_v11, %v350_v13  ;;  %v402_v3 = vld [vmem:[#allocation5 + $0x808] sm:$0xff] }
  0xde   :  { %2596 = vmatprep.mubr.bf16.mxu0 %v5461_v19  ;;  %2725 = vmatprep.mubr.bf16.mxu1 %v5461_v19  ;;  %v354_v19 = vld [vmem:[#allocation5 + $0x688] sm:$0xff]  ;;  %v405_v2 = vld [vmem:[#allocation5 + $0x820] sm:$0xff] }
  0xdf   :  { %v4832_v28 = vcombine.high %v354_v19, %v358_v21  ;;  %v406_v5 = vld [vmem:[#allocation5 + $0x828] sm:$0xff] }
  0xe0   :  { %2567 = vmatpush1.bf16.msra.mxu0 %v4757_v22  ;;  %2696 = vmatpush1.bf16.msra.mxu1 %v4759_v23  ;;  %v4821_v22 = vcombine.low %v345_v9, %v349_v10  ;;  %v4823_v23 = vcombine.low %v346_v11, %v350_v13  ;;  %v5463_v9 = vld [vmem:[#allocation3 + $0x8] ss:$24 sps:$4 sm:$0xff]   ;;  %v409_v10 = vld [vmem:[#allocation5 + $0x840] sm:$0xff]  ;;  %v4880_v13 = vcombine.high %v402_v3, %v406_v5 }
  0xe1   :  { %2568 = vmatprep.subr.bf16.mxu0 %v4766_v24  ;;  %2697 = vmatprep.subr.bf16.mxu1 %v4768_v27  ;;  %v4830_v24 = vcombine.high %v353_v17, %v357_v18  ;;  %v362_v27 = vld [vmem:[#allocation5 + $0x6c8] sm:$0xff]  ;;  %v413_v11 = vld [vmem:[#allocation5 + $0x860] sm:$0xff] }
  0xe4   :  { %2569 = vmatpush1.bf16.msra.mxu0 %v4765_v30  ;;  %2698 = vmatpush1.bf16.msra.mxu1 %v4767_v31  ;;  %v4829_v30 = vcombine.low %v353_v17, %v357_v18  ;;  %v4831_v31 = vcombine.low %v354_v19, %v358_v21  ;;  %v4879_v17 = vcombine.low %v402_v3, %v406_v5  ;;  %v421_v19 = vld [vmem:[#allocation5 + $0x8a0] sm:$0xff]  ;;  %v422_v21 = vld [vmem:[#allocation5 + $0x8a8] sm:$0xff] }
  0xe5   :  { %2570 = vmatprep.subr.bf16.mxu0 %v4774_v32  ;;  %2699 = vmatprep.subr.bf16.mxu1 %v4776_v36  ;;  %v4838_v32 = vcombine.high %v361_v25, %v365_v26  ;;  %v4840_v36 = vcombine.high %v362_v27, %v366_v29  ;;  %v4886_v18 = vcombine.high %v409_v10, %v413_v11 }
  0xe8   :  { %2571 = vmatpush1.bf16.msra.mxu0 %v4773_v38  ;;  %2700 = vmatpush1.bf16.msra.mxu1 %v4775_v39  ;;  %v4837_v38 = vcombine.low %v361_v25, %v365_v26  ;;  %v4839_v39 = vcombine.low %v362_v27, %v366_v29  ;;  %v425_v27 = vld [vmem:[#allocation5 + $0x8c0] sm:$0xff]  ;;  %v426_v29 = vld [vmem:[#allocation5 + $0x8c8] sm:$0xff] }
  0xe9   :  { %2572 = vmatprep.subr.bf16.mxu0 %v4782_v40  ;;  %2701 = vmatprep.subr.bf16.mxu1 %v4784_v44  ;;  %v4846_v40 = vcombine.high %v369_v33, %v373_v34  ;;  %v4848_v44 = vcombine.high %v370_v35, %v374_v37 }
  0xec   :  { %2573 = vmatpush1.bf16.msra.mxu0 %v4781_v46  ;;  %2702 = vmatpush1.bf16.msra.mxu1 %v4783_v47  ;;  %v4845_v46 = vcombine.low %v369_v33, %v373_v34  ;;  %v4847_v47 = vcombine.low %v370_v35, %v374_v37  ;;  %v433_v35 = vld [vmem:[#allocation5 + $0x900] sm:$0xff]  ;;  %v434_v37 = vld [vmem:[#allocation5 + $0x908] sm:$0xff] }
  0xed   :  { %2574 = vmatprep.subr.bf16.mxu0 %v4790_v48  ;;  %2703 = vmatprep.subr.bf16.mxu1 %v4792_v52  ;;  %v4854_v48 = vcombine.high %v377_v41, %v381_v42  ;;  %v4856_v52 = vcombine.high %v378_v43, %v382_v45 }
  0xf0   :  { %2575 = vmatpush1.bf16.msra.mxu0 %v4789_v54  ;;  %2704 = vmatpush1.bf16.msra.mxu1 %v4791_v55  ;;  %v4853_v54 = vcombine.low %v377_v41, %v381_v42  ;;  %v4855_v55 = vcombine.low %v378_v43, %v382_v45  ;;  %v441_v43 = vld [vmem:[#allocation5 + $0x940] sm:$0xff]  ;;  %v442_v45 = vld [vmem:[#allocation5 + $0x948] sm:$0xff] }
  0xf1   :  { %2576 = vmatprep.subr.bf16.mxu0 %v4798_v56  ;;  %2705 = vmatprep.subr.bf16.mxu1 %v4800_v60  ;;  %v4862_v56 = vcombine.high %v385_v49, %v389_v50  ;;  %v4864_v60 = vcombine.high %v386_v51, %v390_v53 }
  0xf4   :  { %2577 = vmatpush1.bf16.msra.mxu0 %v4797_v62  ;;  %2706 = vmatpush1.bf16.msra.mxu1 %v4799_v63  ;;  %v4861_v62 = vcombine.low %v385_v49, %v389_v50  ;;  %v4863_v63 = vcombine.low %v386_v51, %v390_v53  ;;  %v449_v51 = vld [vmem:[#allocation5 + $0x980] sm:$0xff]  ;;  %v450_v53 = vld [vmem:[#allocation5 + $0x988] sm:$0xff] }
  0xf5   :  { %2578 = vmatprep.subr.bf16.mxu0 %v4806_v0  ;;  %2707 = vmatprep.subr.bf16.mxu1 %v4808_v4  ;;  %v4870_v0 = vcombine.high %v393_v57, %v397_v58  ;;  %v4872_v4 = vcombine.high %v394_v59, %v398_v61 }
  0xf8   :  { %2579 = vmatpush1.bf16.msra.mxu0 %v4805_v6  ;;  %2708 = vmatpush1.bf16.msra.mxu1 %v4807_v7  ;;  %v4869_v6 = vcombine.low %v393_v57, %v397_v58  ;;  %v4871_v7 = vcombine.low %v394_v59, %v398_v61  ;;  %v457_v59 = vld [vmem:[#allocation5 + $0x9c0] sm:$0xff]  ;;  %v3037_v61 = vld [vmem:[%s6043_s1] sm:$0xff] }
  0xf9   :  { %2580 = vmatprep.subr.bf16.mxu0 %v4814_v8  ;;  %2709 = vmatprep.subr.bf16.mxu1 %v4816_v12  ;;  %v4878_v8 = vcombine.high %v401_v1, %v405_v2  ;;  %v410_v12 = vld [vmem:[#allocation5 + $0x848] sm:$0xff] }
  0xfc   :  { %2581 = vmatpush1.bf16.msra.mxu0 %v4813_v14  ;;  %2710 = vmatpush1.bf16.msra.mxu1 %v4815_v15  ;;  %v414_v14 = vld [vmem:[#allocation5 + $0x868] sm:$0xff]  ;;  %v4877_v15 = vcombine.low %v401_v1, %v405_v2  ;;  %v5803_v1 = vmov 0   ;;  %v3051_v2 = vsub.f32 1.0, %v3037_v61 }
  0xfd   :  { %2582 = vmatprep.subr.bf16.mxu0 %v4822_v16  ;;  %2711 = vmatprep.subr.bf16.mxu1 %v4824_v20  ;;  %v417_v16 = vld [vmem:[#allocation5 + $0x880] sm:$0xff]  ;;  %v418_v20 = vld [vmem:[#allocation5 + $0x888] sm:$0xff]  ;;  %v4887_v25 = vcombine.low %v410_v12, %v414_v14 }
  0xfe   :  { %v4894_v26 = vcombine.high %v417_v16, %v421_v19  ;;  %v4895_v33 = vcombine.low %v418_v20, %v422_v21  ;;  %5457 = vset.pattern.permute.xlu0 %v5803_v1 }
  0xff   :  { %3040 = vperm.xlu0 %5457, %v3037_v61  }
 0x100   :  { %2583 = vmatpush1.bf16.msra.mxu0 %v4821_v22  ;;  %2712 = vmatpush1.bf16.msra.mxu1 %v4823_v23  ;;  %v4888_v22 = vcombine.high %v410_v12, %v414_v14  ;;  %v5464_v23 = vld [vmem:[#allocation3 + $0x14] ss:$24 sps:$4 sm:$0xff]  }
 0x101   :  { %2584 = vmatprep.subr.bf16.mxu0 %v4830_v24  ;;  %2713 = vmatprep.subr.bf16.mxu1 %v4832_v28  ;;  %v4885_v24 = vcombine.low %v409_v10, %v413_v11  ;;  %v429_v28 = vld [vmem:[#allocation5 + $0x8e0] sm:$0xff]  ;;  %v470_v10 = vld [vmem:[#allocation5 + $0xa28] sm:$0xff] }
 0x102   :  { %v4902_v34 = vcombine.high %v425_v27, %v429_v28  ;;  %v473_v14 = vld [vmem:[#allocation5 + $0xa40] sm:$0xff] }
 0x103   :  { %3054 = vperm.xlu0 %5457, %v3051_v2   ;;  %v526_v2 = vld [vmem:[#allocation5 + $0xbe8] sm:$0xff] }
 0x104   :  { %2585 = vmatpush1.bf16.msra.mxu0 %v4829_v30  ;;  %2714 = vmatpush1.bf16.msra.mxu1 %v4831_v31  ;;  %v4896_v30 = vcombine.high %v418_v20, %v422_v21  ;;  %v430_v31 = vld [vmem:[#allocation5 + $0x8e8] sm:$0xff] }
 0x105   :  { %2586 = vmatprep.subr.bf16.mxu0 %v4838_v32  ;;  %2715 = vmatprep.subr.bf16.mxu1 %v4840_v36  ;;  %v4893_v32 = vcombine.low %v417_v16, %v421_v19  ;;  %v437_v36 = vld [vmem:[#allocation5 + $0x920] sm:$0xff]  ;;  %v4903_v41 = vcombine.low %v426_v29, %v430_v31  ;;  %v474_v16 = vld [vmem:[#allocation5 + $0xa48] sm:$0xff] }
 0x106   :  { %v4910_v42 = vcombine.high %v433_v35, %v437_v36 }
 0x108   :  { %2587 = vmatpush1.bf16.msra.mxu0 %v4837_v38  ;;  %2716 = vmatpush1.bf16.msra.mxu1 %v4839_v39  ;;  %v4904_v38 = vcombine.high %v426_v29, %v430_v31  ;;  %v438_v39 = vld [vmem:[#allocation5 + $0x928] sm:$0xff]  ;;  %v493_v31 = vld [vmem:[#allocation5 + $0xae0] sm:$0xff] }
 0x109   :  { %2588 = vmatprep.subr.bf16.mxu0 %v4846_v40  ;;  %2717 = vmatprep.subr.bf16.mxu1 %v4848_v44  ;;  %v4901_v40 = vcombine.low %v425_v27, %v429_v28  ;;  %v445_v44 = vld [vmem:[#allocation5 + $0x960] sm:$0xff]  ;;  %v4911_v49 = vcombine.low %v434_v37, %v438_v39 }
 0x10a   :  { %v4918_v50 = vcombine.high %v441_v43, %v445_v44 }
 0x10c   :  { %2589 = vmatpush1.bf16.msra.mxu0 %v4845_v46  ;;  %2718 = vmatpush1.bf16.msra.mxu1 %v4847_v47  ;;  %v4912_v46 = vcombine.high %v434_v37, %v438_v39  ;;  %v446_v47 = vld [vmem:[#allocation5 + $0x968] sm:$0xff]  ;;  %v501_v39 = vld [vmem:[#allocation5 + $0xb20] sm:$0xff] }
 0x10d   :  { %2590 = vmatprep.subr.bf16.mxu0 %v4854_v48  ;;  %2719 = vmatprep.subr.bf16.mxu1 %v4856_v52  ;;  %v4909_v48 = vcombine.low %v433_v35, %v437_v36  ;;  %v453_v52 = vld [vmem:[#allocation5 + $0x9a0] sm:$0xff]  ;;  %v4919_v57 = vcombine.low %v442_v45, %v446_v47 }
 0x10e   :  { %v4926_v58 = vcombine.high %v449_v51, %v453_v52  ;;  %v4925_v3 = vcombine.low %v449_v51, %v453_v52 }
 0x110   :  { %2591 = vmatpush1.bf16.msra.mxu0 %v4853_v54  ;;  %2720 = vmatpush1.bf16.msra.mxu1 %v4855_v55  ;;  %v4920_v54 = vcombine.high %v442_v45, %v446_v47  ;;  %v454_v55 = vld [vmem:[#allocation5 + $0x9a8] sm:$0xff]  ;;  %v509_v47 = vld [vmem:[#allocation5 + $0xb60] sm:$0xff] }
 0x111   :  { %2592 = vmatprep.subr.bf16.mxu0 %v4862_v56  ;;  %2721 = vmatprep.subr.bf16.mxu1 %v4864_v60  ;;  %v4917_v56 = vcombine.low %v441_v43, %v445_v44  ;;  %v461_v60 = vld [vmem:[#allocation5 + $0x9e0] sm:$0xff] }
 0x112   :  { %v4934_v5 = vcombine.high %v457_v59, %v461_v60  ;;  %v4933_v11 = vcombine.low %v457_v59, %v461_v60 }
 0x114   :  { %2593 = vmatpush1.bf16.msra.mxu0 %v4861_v62  ;;  %2722 = vmatpush1.bf16.msra.mxu1 %v4863_v63  ;;  %v4928_v62 = vcombine.high %v450_v53, %v454_v55  ;;  %v458_v63 = vld [vmem:[#allocation5 + $0x9c8] sm:$0xff] }
 0x115   :  { %2594 = vmatprep.subr.bf16.mxu0 %v4870_v0  ;;  %2723 = vmatprep.subr.bf16.mxu1 %v4872_v4  ;;  %v462_v0 = vld [vmem:[#allocation5 + $0x9e8] sm:$0xff]  ;;  %v4927_v4 = vcombine.low %v450_v53, %v454_v55  ;;  %v517_v55 = vld [vmem:[#allocation5 + $0xba0] sm:$0xff] }
 0x116   :  { %v4935_v12 = vcombine.low %v458_v63, %v462_v0 }
 0x118   :  { %2595 = vmatpush1.bf16.msra.mxu0 %v4869_v6  ;;  %2724 = vmatpush1.bf16.msra.mxu1 %v4871_v7  ;;  %v465_v6 = vld [vmem:[#allocation5 + $0xa00] sm:$0xff] }
 0x119   :  { %2607 = vmatprep.subr.bf16.mxu0 %v4878_v8  ;;  %2736 = vmatprep.subr.bf16.mxu1 %v4880_v13  ;;  %v469_v7 = vld [vmem:[#allocation5 + $0xa20] sm:$0xff]  ;;  %v466_v8 = vld [vmem:[#allocation5 + $0xa08] sm:$0xff] }
 0x11a   :  { %v4942_v13 = vcombine.high %v465_v6, %v469_v7  ;;  %v4941_v19 = vcombine.low %v465_v6, %v469_v7  ;;  %v4943_v20 = vcombine.low %v466_v8, %v470_v10  ;;  %v147_v6 = vld [vmem:[#allocation5 + $0x10] sm:$0xff] }
 0x11b   :  { %2597 = vmatmul.mubr.bf16.vlgmr.msra.gmra.mrb[0].mxu0 %v5463_v9  ;;  %2726 = vmatmul.mubr.bf16.vlgmr.msra.gmra.mrb[0].mxu1 %v5463_v9  ;;  %v4936_v9 = vcombine.high %v458_v63, %v462_v0  ;;  %v525_v63 = vld [vmem:[#allocation5 + $0xbe0] sm:$0xff]  ;;  %v522_v0 = vld [vmem:[#allocation5 + $0xbc8] sm:$0xff]  ;;  %v151_v7 = vld [vmem:[#allocation5 + $0x30] sm:$0xff] }
 0x11c   :  { %2608 = vmatpush1.bf16.msra.mxu0 %v4877_v15  ;;  %2737 = vmatpush1.bf16.msra.mxu1 %v4879_v17  ;;  %v477_v15 = vld [vmem:[#allocation5 + $0xa60] sm:$0xff]  ;;  %v4944_v17 = vcombine.high %v466_v8, %v470_v10  ;;  %v148_v8 = vld [vmem:[#allocation5 + $0x18] sm:$0xff] }
 0x11d   :  { %2609 = vmatprep.subr.bf16.mxu0 %v4886_v18  ;;  %2738 = vmatprep.subr.bf16.mxu1 %v4888_v22  ;;  %v478_v18 = vld [vmem:[#allocation5 + $0xa68] sm:$0xff]  ;;  %v4950_v21 = vcombine.high %v473_v14, %v477_v15  ;;  %v481_v22 = vld [vmem:[#allocation5 + $0xa80] sm:$0xff]  ;;  %v4949_v27 = vcombine.low %v473_v14, %v477_v15  ;;  %v152_v10 = vld [vmem:[#allocation5 + $0x38] sm:$0xff]  ;;  %v4626_v14 = vcombine.high %v147_v6, %v151_v7 }
 0x11e   :  { %2639 = vmatprep.mubr.bf16.mxu0 %v5464_v23  ;;  %2768 = vmatprep.mubr.bf16.mxu1 %v5464_v23  ;;  %v485_v23 = vld [vmem:[#allocation5 + $0xaa0] sm:$0xff]  ;;  %v4951_v28 = vcombine.low %v474_v16, %v478_v18  ;;  %v155_v15 = vld [vmem:[#allocation5 + $0x50] sm:$0xff] }
 0x11f   :  { %v4958_v29 = vcombine.high %v481_v22, %v485_v23  ;;  %v4957_v35 = vcombine.low %v481_v22, %v485_v23  ;;  %v163_v23 = vld [vmem:[#allocation5 + $0x90] sm:$0xff] }
 0x120   :  { %2610 = vmatpush1.bf16.msra.mxu0 %v4885_v24  ;;  %2739 = vmatpush1.bf16.msra.mxu1 %v4887_v25  ;;  %v482_v24 = vld [vmem:[#allocation5 + $0xa88] sm:$0xff]  ;;  %v4952_v25 = vcombine.high %v474_v16, %v478_v18  ;;  %v159_v16 = vld [vmem:[#allocation5 + $0x70] sm:$0xff]  ;;  %v4628_v18 = vcombine.high %v148_v8, %v152_v10 }
 0x121   :  { %2611 = vmatprep.subr.bf16.mxu0 %v4894_v26  ;;  %2740 = vmatprep.subr.bf16.mxu1 %v4896_v30  ;;  %v486_v26 = vld [vmem:[#allocation5 + $0xaa8] sm:$0xff]  ;;  %v489_v30 = vld [vmem:[#allocation5 + $0xac0] sm:$0xff]  ;;  %v4634_v22 = vcombine.high %v155_v15, %v159_v16 }
 0x122   :  { %v4959_v36 = vcombine.low %v482_v24, %v486_v26  ;;  %v4966_v37 = vcombine.high %v489_v30, %v493_v31  ;;  %v4965_v43 = vcombine.low %v489_v30, %v493_v31  ;;  %v171_v31 = vld [vmem:[#allocation5 + $0xd0] sm:$0xff] }
 0x124   :  { %2612 = vmatpush1.bf16.msra.mxu0 %v4893_v32  ;;  %2741 = vmatpush1.bf16.msra.mxu1 %v4895_v33  ;;  %v490_v32 = vld [vmem:[#allocation5 + $0xac8] sm:$0xff]  ;;  %v4960_v33 = vcombine.high %v482_v24, %v486_v26  ;;  %v167_v24 = vld [vmem:[#allocation5 + $0xb0] sm:$0xff] }
 0x125   :  { %2613 = vmatprep.subr.bf16.mxu0 %v4902_v34  ;;  %2742 = vmatprep.subr.bf16.mxu1 %v4904_v38  ;;  %v494_v34 = vld [vmem:[#allocation5 + $0xae8] sm:$0xff]  ;;  %v497_v38 = vld [vmem:[#allocation5 + $0xb00] sm:$0xff]  ;;  %v4642_v30 = vcombine.high %v163_v23, %v167_v24 }
 0x126   :  { %v4967_v44 = vcombine.low %v490_v32, %v494_v34  ;;  %v4974_v45 = vcombine.high %v497_v38, %v501_v39  ;;  %v4973_v51 = vcombine.low %v497_v38, %v501_v39 }
 0x128   :  { %2614 = vmatpush1.bf16.msra.mxu0 %v4901_v40  ;;  %2743 = vmatpush1.bf16.msra.mxu1 %v4903_v41  ;;  %v498_v40 = vld [vmem:[#allocation5 + $0xb08] sm:$0xff]  ;;  %v4968_v41 = vcombine.high %v490_v32, %v494_v34 }
 0x129   :  { %2615 = vmatprep.subr.bf16.mxu0 %v4910_v42  ;;  %2744 = vmatprep.subr.bf16.mxu1 %v4912_v46  ;;  %v502_v42 = vld [vmem:[#allocation5 + $0xb28] sm:$0xff]  ;;  %v505_v46 = vld [vmem:[#allocation5 + $0xb40] sm:$0xff] }
 0x12a   :  { %v4975_v52 = vcombine.low %v498_v40, %v502_v42  ;;  %v4982_v53 = vcombine.high %v505_v46, %v509_v47  ;;  %v4981_v59 = vcombine.low %v505_v46, %v509_v47  ;;  %v5595_v34 = vld [vmem:[#allocation3 + $0x4] ss:$24 sps:$4 sm:$0xff]  }
 0x12c   :  { %2616 = vmatpush1.bf16.msra.mxu0 %v4909_v48  ;;  %2745 = vmatpush1.bf16.msra.mxu1 %v4911_v49  ;;  %v506_v48 = vld [vmem:[#allocation5 + $0xb48] sm:$0xff]  ;;  %v4976_v49 = vcombine.high %v498_v40, %v502_v42  ;;  %v183_v42 = vld [vmem:[#allocation5 + $0x130] sm:$0xff] }
 0x12d   :  { %2617 = vmatprep.subr.bf16.mxu0 %v4918_v50  ;;  %2746 = vmatprep.subr.bf16.mxu1 %v4920_v54  ;;  %v510_v50 = vld [vmem:[#allocation5 + $0xb68] sm:$0xff]  ;;  %v513_v54 = vld [vmem:[#allocation5 + $0xb80] sm:$0xff] }
 0x12e   :  { %v4983_v60 = vcombine.low %v506_v48, %v510_v50  ;;  %v4990_v61 = vcombine.high %v513_v54, %v517_v55 }
 0x130   :  { %2618 = vmatpush1.bf16.msra.mxu0 %v4917_v56  ;;  %2747 = vmatpush1.bf16.msra.mxu1 %v4919_v57  ;;  %v514_v56 = vld [vmem:[#allocation5 + $0xb88] sm:$0xff]  ;;  %v4984_v57 = vcombine.high %v506_v48, %v510_v50  ;;  %v191_v50 = vld [vmem:[#allocation5 + $0x170] sm:$0xff] }
 0x131   :  { %2619 = vmatprep.subr.bf16.mxu0 %v4926_v58  ;;  %2748 = vmatprep.subr.bf16.mxu1 %v4928_v62  ;;  %v518_v58 = vld [vmem:[#allocation5 + $0xba8] sm:$0xff]  ;;  %v521_v62 = vld [vmem:[#allocation5 + $0xbc0] sm:$0xff] }
 0x132   :  { %v4992_v1 = vcombine.high %v514_v56, %v518_v58 }
 0x134   :  { %2620 = vmatpush1.bf16.msra.mxu0 %v4925_v3  ;;  %2749 = vmatpush1.bf16.msra.mxu1 %v4927_v4  ;;  %v4989_v3 = vcombine.low %v513_v54, %v517_v55  ;;  %v4991_v4 = vcombine.low %v514_v56, %v518_v58  ;;  %v199_v58 = vld [vmem:[#allocation5 + $0x1b0] sm:$0xff] }
 0x135   :  { %2621 = vmatprep.subr.bf16.mxu0 %v4934_v5  ;;  %2750 = vmatprep.subr.bf16.mxu1 %v4936_v9  ;;  %v4998_v5 = vcombine.high %v521_v62, %v525_v63  ;;  %v5000_v9 = vcombine.high %v522_v0, %v526_v2 }
 0x138   :  { %2622 = vmatpush1.bf16.msra.mxu0 %v4933_v11  ;;  %2751 = vmatpush1.bf16.msra.mxu1 %v4935_v12  ;;  %v4997_v11 = vcombine.low %v521_v62, %v525_v63  ;;  %v4999_v12 = vcombine.low %v522_v0, %v526_v2  ;;  %v207_v2 = vld [vmem:[#allocation5 + $0x1f0] sm:$0xff] }
 0x139   :  { %2623 = vmatprep.subr.bf16.mxu0 %v4942_v13  ;;  %2752 = vmatprep.subr.bf16.mxu1 %v4944_v17  ;;  %v5466_v13 = vld [vmem:[#allocation3 + $0x10] ss:$24 sps:$4 sm:$0xff]  }
 0x13a   :  { %v156_v17 = vld [vmem:[#allocation5 + $0x58] sm:$0xff] }
 0x13c   :  { %2624 = vmatpush1.bf16.msra.mxu0 %v4941_v19  ;;  %2753 = vmatpush1.bf16.msra.mxu1 %v4943_v20  ;;  %v160_v19 = vld [vmem:[#allocation5 + $0x78] sm:$0xff]  ;;  %v4625_v20 = vcombine.low %v147_v6, %v151_v7 }
 0x13d   :  { %2625 = vmatprep.subr.bf16.mxu0 %v4950_v21  ;;  %2754 = vmatprep.subr.bf16.mxu1 %v4952_v25  ;;  %v4627_v21 = vcombine.low %v148_v8, %v152_v10  ;;  %v164_v25 = vld [vmem:[#allocation5 + $0x98] sm:$0xff]  ;;  %v4636_v26 = vcombine.high %v156_v17, %v160_v19  ;;  %v215_v10 = vld [vmem:[#allocation5 + $0x230] sm:$0xff] }
 0x140   :  { %2626 = vmatpush1.bf16.msra.mxu0 %v4949_v27  ;;  %2755 = vmatpush1.bf16.msra.mxu1 %v4951_v28  ;;  %v168_v27 = vld [vmem:[#allocation5 + $0xb8] sm:$0xff]  ;;  %v4633_v28 = vcombine.low %v155_v15, %v159_v16 }
 0x141   :  { %2627 = vmatprep.subr.bf16.mxu0 %v4958_v29  ;;  %2756 = vmatprep.subr.bf16.mxu1 %v4960_v33  ;;  %v4635_v29 = vcombine.low %v156_v17, %v160_v19  ;;  %v4644_v32 = vcombine.high %v164_v25, %v168_v27  ;;  %v175_v33 = vld [vmem:[#allocation5 + $0xf0] sm:$0xff]  ;;  %v4643_v38 = vcombine.low %v164_v25, %v168_v27  ;;  %v220_v19 = vld [vmem:[#allocation5 + $0x258] sm:$0xff] }
 0x142   :  { %v4650_v39 = vcombine.high %v171_v31, %v175_v33  ;;  %v219_v17 = vld [vmem:[#allocation5 + $0x250] sm:$0xff]  ;;  %v228_v27 = vld [vmem:[#allocation5 + $0x298] sm:$0xff] }
 0x143   :  { %v227_v25 = vld [vmem:[#allocation5 + $0x290] sm:$0xff] }
 0x144   :  { %2628 = vmatpush1.bf16.msra.mxu0 %v4957_v35  ;;  %2757 = vmatpush1.bf16.msra.mxu1 %v4959_v36  ;;  %v172_v35 = vld [vmem:[#allocation5 + $0xd8] sm:$0xff] }
 0x145   :  { %2629 = vmatprep.subr.bf16.mxu0 %v4966_v37  ;;  %2758 = vmatprep.subr.bf16.mxu1 %v4968_v41  ;;  %v176_v36 = vld [vmem:[#allocation5 + $0xf8] sm:$0xff]  ;;  %v4641_v37 = vcombine.low %v163_v23, %v167_v24  ;;  %v179_v41 = vld [vmem:[#allocation5 + $0x110] sm:$0xff] }
 0x146   :  { %v4652_v40 = vcombine.high %v172_v35, %v176_v36  ;;  %v4651_v46 = vcombine.low %v172_v35, %v176_v36  ;;  %v4658_v47 = vcombine.high %v179_v41, %v183_v42  ;;  %v236_v35 = vld [vmem:[#allocation5 + $0x2d8] sm:$0xff] }
 0x147   :  { %v240_v36 = vld [vmem:[#allocation5 + $0x2f8] sm:$0xff] }
 0x148   :  { %2630 = vmatpush1.bf16.msra.mxu0 %v4965_v43  ;;  %2759 = vmatpush1.bf16.msra.mxu1 %v4967_v44  ;;  %v180_v43 = vld [vmem:[#allocation5 + $0x118] sm:$0xff] }
 0x149   :  { %2631 = vmatprep.subr.bf16.mxu0 %v4974_v45  ;;  %2760 = vmatprep.subr.bf16.mxu1 %v4976_v49  ;;  %v184_v44 = vld [vmem:[#allocation5 + $0x138] sm:$0xff]  ;;  %v4649_v45 = vcombine.low %v171_v31, %v175_v33  ;;  %v187_v49 = vld [vmem:[#allocation5 + $0x150] sm:$0xff] }
 0x14a   :  { %v4660_v48 = vcombine.high %v180_v43, %v184_v44  ;;  %v4659_v54 = vcombine.low %v180_v43, %v184_v44  ;;  %v4666_v55 = vcombine.high %v187_v49, %v191_v50  ;;  %v235_v33 = vld [vmem:[#allocation5 + $0x2d0] sm:$0xff]  ;;  %v244_v43 = vld [vmem:[#allocation5 + $0x318] sm:$0xff] }
 0x14b   :  { %v248_v44 = vld [vmem:[#allocation5 + $0x338] sm:$0xff] }
 0x14c   :  { %2632 = vmatpush1.bf16.msra.mxu0 %v4973_v51  ;;  %2761 = vmatpush1.bf16.msra.mxu1 %v4975_v52  ;;  %v188_v51 = vld [vmem:[#allocation5 + $0x158] sm:$0xff] }
 0x14d   :  { %2633 = vmatprep.subr.bf16.mxu0 %v4982_v53  ;;  %2762 = vmatprep.subr.bf16.mxu1 %v4984_v57  ;;  %v192_v52 = vld [vmem:[#allocation5 + $0x178] sm:$0xff]  ;;  %v4657_v53 = vcombine.low %v179_v41, %v183_v42  ;;  %v195_v57 = vld [vmem:[#allocation5 + $0x190] sm:$0xff] }
 0x14e   :  { %v4668_v56 = vcombine.high %v188_v51, %v192_v52  ;;  %v4667_v62 = vcombine.low %v188_v51, %v192_v52  ;;  %v4674_v63 = vcombine.high %v195_v57, %v199_v58  ;;  %v243_v41 = vld [vmem:[#allocation5 + $0x310] sm:$0xff]  ;;  %v252_v51 = vld [vmem:[#allocation5 + $0x358] sm:$0xff] }
 0x14f   :  { %v247_v42 = vld [vmem:[#allocation5 + $0x330] sm:$0xff]  ;;  %v256_v52 = vld [vmem:[#allocation5 + $0x378] sm:$0xff] }
 0x150   :  { %2634 = vmatpush1.bf16.msra.mxu0 %v4981_v59  ;;  %2763 = vmatpush1.bf16.msra.mxu1 %v4983_v60  ;;  %v196_v59 = vld [vmem:[#allocation5 + $0x198] sm:$0xff] }
 0x151   :  { %2635 = vmatprep.subr.bf16.mxu0 %v4990_v61  ;;  %2764 = vmatprep.subr.bf16.mxu1 %v4992_v1  ;;  %v200_v60 = vld [vmem:[#allocation5 + $0x1b8] sm:$0xff]  ;;  %v4665_v61 = vcombine.low %v187_v49, %v191_v50  ;;  %v203_v1 = vld [vmem:[#allocation5 + $0x1d0] sm:$0xff] }
 0x152   :  { %v4676_v0 = vcombine.high %v196_v59, %v200_v60  ;;  %v4675_v6 = vcombine.low %v196_v59, %v200_v60  ;;  %v4682_v7 = vcombine.high %v203_v1, %v207_v2  ;;  %v251_v49 = vld [vmem:[#allocation5 + $0x350] sm:$0xff]  ;;  %v260_v59 = vld [vmem:[#allocation5 + $0x398] sm:$0xff] }
 0x153   :  { %v255_v50 = vld [vmem:[#allocation5 + $0x370] sm:$0xff]  ;;  %v264_v60 = vld [vmem:[#allocation5 + $0x3b8] sm:$0xff] }
 0x154   :  { %2636 = vmatpush1.bf16.msra.mxu0 %v4989_v3  ;;  %2765 = vmatpush1.bf16.msra.mxu1 %v4991_v4  ;;  %v204_v3 = vld [vmem:[#allocation5 + $0x1d8] sm:$0xff] }
 0x155   :  { %2637 = vmatprep.subr.bf16.mxu0 %v4998_v5  ;;  %2766 = vmatprep.subr.bf16.mxu1 %v5000_v9  ;;  %v208_v4 = vld [vmem:[#allocation5 + $0x1f8] sm:$0xff]  ;;  %v4673_v5 = vcombine.low %v195_v57, %v199_v58  ;;  %v211_v9 = vld [vmem:[#allocation5 + $0x210] sm:$0xff] }
 0x156   :  { %v4684_v8 = vcombine.high %v204_v3, %v208_v4  ;;  %v4690_v15 = vcombine.high %v211_v9, %v215_v10  ;;  %v259_v57 = vld [vmem:[#allocation5 + $0x390] sm:$0xff] }
 0x157   :  { %v263_v58 = vld [vmem:[#allocation5 + $0x3b0] sm:$0xff] }
 0x158   :  { %2638 = vmatpush1.bf16.msra.mxu0 %v4997_v11  ;;  %2767 = vmatpush1.bf16.msra.mxu1 %v4999_v12  ;;  %v212_v11 = vld [vmem:[#allocation5 + $0x218] sm:$0xff] }
 0x159   :  { %2779 = vmatprep.subr.bf16.mxu0 %v4626_v14  ;;  %2908 = vmatprep.subr.bf16.mxu1 %v4628_v18  ;;  %v216_v12 = vld [vmem:[#allocation5 + $0x238] sm:$0xff]  ;;  %v4683_v14 = vcombine.low %v204_v3, %v208_v4  ;;  %v223_v18 = vld [vmem:[#allocation5 + $0x270] sm:$0xff] }
 0x15a   :  { %v4692_v16 = vcombine.high %v212_v11, %v216_v12  ;;  %v4698_v23 = vcombine.high %v219_v17, %v223_v18  ;;  %v268_v3 = vld [vmem:[#allocation5 + $0x3d8] sm:$0xff] }
 0x15b   :  { %2640 = vmatmul.mubr.bf16.vlgmr.msra.gmra.mrb[0].mxu0 %v5466_v13  ;;  %2769 = vmatmul.mubr.bf16.vlgmr.msra.gmra.mrb[0].mxu1 %v5466_v13  ;;  %v4681_v13 = vcombine.low %v203_v1, %v207_v2  ;;  %v267_v1 = vld [vmem:[#allocation5 + $0x3d0] sm:$0xff]  ;;  %v272_v4 = vld [vmem:[#allocation5 + $0x3f8] sm:$0xff] }
 0x15c   :  { %2780 = vmatpush1.bf16.msra.mxu0 %v4625_v20  ;;  %2909 = vmatpush1.bf16.msra.mxu1 %v4627_v21  ;;  %v224_v20 = vld [vmem:[#allocation5 + $0x278] sm:$0xff]  ;;  %v4689_v21 = vcombine.low %v211_v9, %v215_v10  ;;  %v271_v2 = vld [vmem:[#allocation5 + $0x3f0] sm:$0xff] }
 0x15d   :  { %2781 = vmatprep.subr.bf16.mxu0 %v4634_v22  ;;  %2910 = vmatprep.subr.bf16.mxu1 %v4636_v26  ;;  %v4691_v22 = vcombine.low %v212_v11, %v216_v12  ;;  %v4700_v24 = vcombine.high %v220_v19, %v224_v20  ;;  %v231_v26 = vld [vmem:[#allocation5 + $0x2b0] sm:$0xff]  ;;  %v276_v11 = vld [vmem:[#allocation5 + $0x418] sm:$0xff] }
 0x15e   :  { %2811 = vmatprep.mubr.bf16.mxu0 %v5595_v34  ;;  %2940 = vmatprep.mubr.bf16.mxu1 %v5595_v34  ;;  %v4706_v31 = vcombine.high %v227_v25, %v231_v26  ;;  %v239_v34 = vld [vmem:[#allocation5 + $0x2f0] sm:$0xff]  ;;  %v280_v12 = vld [vmem:[#allocation5 + $0x438] sm:$0xff] }
 0x15f   :  { %v275_v9 = vld [vmem:[#allocation5 + $0x410] sm:$0xff] }
 0x160   :  { %2782 = vmatpush1.bf16.msra.mxu0 %v4633_v28  ;;  %2911 = vmatpush1.bf16.msra.mxu1 %v4635_v29  ;;  %v232_v28 = vld [vmem:[#allocation5 + $0x2b8] sm:$0xff]  ;;  %v4697_v29 = vcombine.low %v219_v17, %v223_v18  ;;  %v279_v10 = vld [vmem:[#allocation5 + $0x430] sm:$0xff] }
 0x161   :  { %2783 = vmatprep.subr.bf16.mxu0 %v4642_v30  ;;  %2912 = vmatprep.subr.bf16.mxu1 %v4644_v32  ;;  %v4699_v30 = vcombine.low %v220_v19, %v224_v20  ;;  %v4708_v32 = vcombine.high %v228_v27, %v232_v28  ;;  %v283_v17 = vld [vmem:[#allocation5 + $0x450] sm:$0xff]  ;;  %v284_v19 = vld [vmem:[#allocation5 + $0x458] sm:$0xff] }
 0x162   :  { %v287_v18 = vld [vmem:[#allocation5 + $0x470] sm:$0xff]  ;;  %v288_v20 = vld [vmem:[#allocation5 + $0x478] sm:$0xff] }
 0x164   :  { %2784 = vmatpush1.bf16.msra.mxu0 %v4641_v37  ;;  %2913 = vmatpush1.bf16.msra.mxu1 %v4643_v38  ;;  %v4705_v37 = vcombine.low %v227_v25, %v231_v26  ;;  %v4707_v38 = vcombine.low %v228_v27, %v232_v28  ;;  %v291_v25 = vld [vmem:[#allocation5 + $0x490] sm:$0xff]  ;;  %v292_v28 = vld [vmem:[#allocation5 + $0x498] sm:$0xff] }
 0x165   :  { %2785 = vmatprep.subr.bf16.mxu0 %v4650_v39  ;;  %2914 = vmatprep.subr.bf16.mxu1 %v4652_v40  ;;  %v4714_v39 = vcombine.high %v235_v33, %v239_v34  ;;  %v4716_v40 = vcombine.high %v236_v35, %v240_v36  ;;  %v295_v26 = vld [vmem:[#allocation5 + $0x4b0] sm:$0xff] }
 0x166   :  { %v5596_v27 = vld [vmem:[#allocation3] ss:$24 sps:$4 sm:$0xff]  }
 0x168   :  { %2786 = vmatpush1.bf16.msra.mxu0 %v4649_v45  ;;  %2915 = vmatpush1.bf16.msra.mxu1 %v4651_v46  ;;  %v4713_v45 = vcombine.low %v235_v33, %v239_v34  ;;  %v4715_v46 = vcombine.low %v236_v35, %v240_v36  ;;  %v299_v34 = vld [vmem:[#allocation5 + $0x4d0] sm:$0xff] }
 0x169   :  { %2787 = vmatprep.subr.bf16.mxu0 %v4658_v47  ;;  %2916 = vmatprep.subr.bf16.mxu1 %v4660_v48  ;;  %v4722_v47 = vcombine.high %v243_v41, %v247_v42  ;;  %v4724_v48 = vcombine.high %v244_v43, %v248_v44  ;;  %v303_v35 = vld [vmem:[#allocation5 + $0x4f0] sm:$0xff] }
 0x16a   :  { %v5597_v36 = vld [vmem:[#allocation3 + $0xc] ss:$24 sps:$4 sm:$0xff]  }
 0x16c   :  { %2788 = vmatpush1.bf16.msra.mxu0 %v4657_v53  ;;  %2917 = vmatpush1.bf16.msra.mxu1 %v4659_v54  ;;  %v4721_v53 = vcombine.low %v243_v41, %v247_v42  ;;  %v4723_v54 = vcombine.low %v244_v43, %v248_v44  ;;  %v4778_v41 = vcombine.high %v299_v34, %v303_v35  ;;  %v307_v43 = vld [vmem:[#allocation5 + $0x510] sm:$0xff] }
 0x16d   :  { %2789 = vmatprep.subr.bf16.mxu0 %v4666_v55  ;;  %2918 = vmatprep.subr.bf16.mxu1 %v4668_v56  ;;  %v4730_v55 = vcombine.high %v251_v49, %v255_v50  ;;  %v4732_v56 = vcombine.high %v252_v51, %v256_v52  ;;  %v311_v44 = vld [vmem:[#allocation5 + $0x530] sm:$0xff] }
 0x170   :  { %2790 = vmatpush1.bf16.msra.mxu0 %v4665_v61  ;;  %2919 = vmatpush1.bf16.msra.mxu1 %v4667_v62  ;;  %v4729_v61 = vcombine.low %v251_v49, %v255_v50  ;;  %v4731_v62 = vcombine.low %v252_v51, %v256_v52  ;;  %v4786_v49 = vcombine.high %v307_v43, %v311_v44  ;;  %v315_v51 = vld [vmem:[#allocation5 + $0x550] sm:$0xff] }
 0x171   :  { %2791 = vmatprep.subr.bf16.mxu0 %v4674_v63  ;;  %2920 = vmatprep.subr.bf16.mxu1 %v4676_v0  ;;  %v4738_v63 = vcombine.high %v259_v57, %v263_v58  ;;  %v4740_v0 = vcombine.high %v260_v59, %v264_v60  ;;  %v319_v52 = vld [vmem:[#allocation5 + $0x570] sm:$0xff] }
 0x174   :  { %2792 = vmatpush1.bf16.msra.mxu0 %v4673_v5  ;;  %2921 = vmatpush1.bf16.msra.mxu1 %v4675_v6  ;;  %v4737_v5 = vcombine.low %v259_v57, %v263_v58  ;;  %v4739_v6 = vcombine.low %v260_v59, %v264_v60  ;;  %v4794_v57 = vcombine.high %v315_v51, %v319_v52  ;;  %v323_v59 = vld [vmem:[#allocation5 + $0x590] sm:$0xff] }
 0x175   :  { %2793 = vmatprep.subr.bf16.mxu0 %v4682_v7  ;;  %2922 = vmatprep.subr.bf16.mxu1 %v4684_v8  ;;  %v4746_v7 = vcombine.high %v267_v1, %v271_v2  ;;  %v4748_v8 = vcombine.high %v268_v3, %v272_v4  ;;  %v327_v60 = vld [vmem:[#allocation5 + $0x5b0] sm:$0xff] }
 0x178   :  { %2794 = vmatpush1.bf16.msra.mxu0 %v4681_v13  ;;  %2923 = vmatpush1.bf16.msra.mxu1 %v4683_v14  ;;  %v4745_v13 = vcombine.low %v267_v1, %v271_v2  ;;  %v4747_v14 = vcombine.low %v268_v3, %v272_v4  ;;  %v4802_v1 = vcombine.high %v323_v59, %v327_v60  ;;  %v331_v3 = vld [vmem:[#allocation5 + $0x5d0] sm:$0xff] }
 0x179   :  { %2795 = vmatprep.subr.bf16.mxu0 %v4690_v15  ;;  %2924 = vmatprep.subr.bf16.mxu1 %v4692_v16  ;;  %v4754_v15 = vcombine.high %v275_v9, %v279_v10  ;;  %v4756_v16 = vcombine.high %v276_v11, %v280_v12  ;;  %v335_v4 = vld [vmem:[#allocation5 + $0x5f0] sm:$0xff] }
 0x17c   :  { %2796 = vmatpush1.bf16.msra.mxu0 %v4689_v21  ;;  %2925 = vmatpush1.bf16.msra.mxu1 %v4691_v22  ;;  %v4753_v21 = vcombine.low %v275_v9, %v279_v10  ;;  %v4755_v22 = vcombine.low %v276_v11, %v280_v12  ;;  %v4810_v9 = vcombine.high %v331_v3, %v335_v4  ;;  %v339_v11 = vld [vmem:[#allocation5 + $0x610] sm:$0xff] }
 0x17d   :  { %2797 = vmatprep.subr.bf16.mxu0 %v4698_v23  ;;  %2926 = vmatprep.subr.bf16.mxu1 %v4700_v24  ;;  %v4762_v23 = vcombine.high %v283_v17, %v287_v18  ;;  %v4764_v24 = vcombine.high %v284_v19, %v288_v20  ;;  %v343_v12 = vld [vmem:[#allocation5 + $0x630] sm:$0xff] }
 0x180   :  { %2798 = vmatpush1.bf16.msra.mxu0 %v4697_v29  ;;  %2927 = vmatpush1.bf16.msra.mxu1 %v4699_v30  ;;  %v296_v29 = vld [vmem:[#allocation5 + $0x4b8] sm:$0xff]  ;;  %v4761_v30 = vcombine.low %v283_v17, %v287_v18  ;;  %v4818_v17 = vcombine.high %v339_v11, %v343_v12 }
 0x181   :  { %2799 = vmatprep.subr.bf16.mxu0 %v4706_v31  ;;  %2928 = vmatprep.subr.bf16.mxu1 %v4708_v32  ;;  %v4763_v31 = vcombine.low %v284_v19, %v288_v20  ;;  %v4770_v32 = vcombine.high %v291_v25, %v295_v26  ;;  %v4772_v33 = vcombine.high %v292_v28, %v296_v29  ;;  %v347_v19 = vld [vmem:[#allocation5 + $0x650] sm:$0xff] }
 0x182   :  { %v351_v20 = vld [vmem:[#allocation5 + $0x670] sm:$0xff] }
 0x184   :  { %2800 = vmatpush1.bf16.msra.mxu0 %v4705_v37  ;;  %2929 = vmatpush1.bf16.msra.mxu1 %v4707_v38  ;;  %v300_v37 = vld [vmem:[#allocation5 + $0x4d8] sm:$0xff] }
 0x185   :  { %2801 = vmatprep.subr.bf16.mxu0 %v4714_v39  ;;  %2930 = vmatprep.subr.bf16.mxu1 %v4716_v40  ;;  %v304_v38 = vld [vmem:[#allocation5 + $0x4f8] sm:$0xff]  ;;  %v4769_v39 = vcombine.low %v291_v25, %v295_v26  ;;  %v4771_v40 = vcombine.low %v292_v28, %v296_v29  ;;  %v4826_v25 = vcombine.high %v347_v19, %v351_v20  ;;  %v359_v28 = vld [vmem:[#allocation5 + $0x6b0] sm:$0xff] }
 0x186   :  { %v4780_v42 = vcombine.high %v300_v37, %v304_v38  ;;  %v356_v29 = vld [vmem:[#allocation5 + $0x698] sm:$0xff] }
 0x188   :  { %2802 = vmatpush1.bf16.msra.mxu0 %v4713_v45  ;;  %2931 = vmatpush1.bf16.msra.mxu1 %v4715_v46  ;;  %v308_v45 = vld [vmem:[#allocation5 + $0x518] sm:$0xff] }
 0x189   :  { %2803 = vmatprep.subr.bf16.mxu0 %v4722_v47  ;;  %2932 = vmatprep.subr.bf16.mxu1 %v4724_v48  ;;  %v312_v46 = vld [vmem:[#allocation5 + $0x538] sm:$0xff]  ;;  %v4777_v47 = vcombine.low %v299_v34, %v303_v35  ;;  %v4779_v48 = vcombine.low %v300_v37, %v304_v38  ;;  %v363_v35 = vld [vmem:[#allocation5 + $0x6d0] sm:$0xff] }
 0x18a   :  { %v4788_v50 = vcombine.high %v308_v45, %v312_v46  ;;  %v364_v37 = vld [vmem:[#allocation5 + $0x6d8] sm:$0xff] }
 0x18b   :  { %v368_v38 = vld [vmem:[#allocation5 + $0x6f8] sm:$0xff] }
 0x18c   :  { %2804 = vmatpush1.bf16.msra.mxu0 %v4721_v53  ;;  %2933 = vmatpush1.bf16.msra.mxu1 %v4723_v54  ;;  %v316_v53 = vld [vmem:[#allocation5 + $0x558] sm:$0xff] }
 0x18d   :  { %2805 = vmatprep.subr.bf16.mxu0 %v4730_v55  ;;  %2934 = vmatprep.subr.bf16.mxu1 %v4732_v56  ;;  %v320_v54 = vld [vmem:[#allocation5 + $0x578] sm:$0xff]  ;;  %v4785_v55 = vcombine.low %v307_v43, %v311_v44  ;;  %v4787_v56 = vcombine.low %v308_v45, %v312_v46  ;;  %v371_v43 = vld [vmem:[#allocation5 + $0x710] sm:$0xff] }
 0x18e   :  { %v4796_v58 = vcombine.high %v316_v53, %v320_v54  ;;  %v375_v44 = vld [vmem:[#allocation5 + $0x730] sm:$0xff]  ;;  %v372_v45 = vld [vmem:[#allocation5 + $0x718] sm:$0xff] }
 0x18f   :  { %v376_v46 = vld [vmem:[#allocation5 + $0x738] sm:$0xff] }
 0x190   :  { %2806 = vmatpush1.bf16.msra.mxu0 %v4729_v61  ;;  %2935 = vmatpush1.bf16.msra.mxu1 %v4731_v62  ;;  %v324_v61 = vld [vmem:[#allocation5 + $0x598] sm:$0xff] }
 0x191   :  { %2807 = vmatprep.subr.bf16.mxu0 %v4738_v63  ;;  %2936 = vmatprep.subr.bf16.mxu1 %v4740_v0  ;;  %v328_v62 = vld [vmem:[#allocation5 + $0x5b8] sm:$0xff]  ;;  %v4793_v63 = vcombine.low %v315_v51, %v319_v52  ;;  %v4795_v0 = vcombine.low %v316_v53, %v320_v54  ;;  %v379_v51 = vld [vmem:[#allocation5 + $0x750] sm:$0xff] }
 0x192   :  { %v4804_v2 = vcombine.high %v324_v61, %v328_v62  ;;  %v383_v52 = vld [vmem:[#allocation5 + $0x770] sm:$0xff]  ;;  %v380_v53 = vld [vmem:[#allocation5 + $0x758] sm:$0xff] }
 0x193   :  { %v384_v54 = vld [vmem:[#allocation5 + $0x778] sm:$0xff] }
 0x194   :  { %2808 = vmatpush1.bf16.msra.mxu0 %v4737_v5  ;;  %2937 = vmatpush1.bf16.msra.mxu1 %v4739_v6  ;;  %v332_v5 = vld [vmem:[#allocation5 + $0x5d8] sm:$0xff] }
 0x195   :  { %2809 = vmatprep.subr.bf16.mxu0 %v4746_v7  ;;  %2938 = vmatprep.subr.bf16.mxu1 %v4748_v8  ;;  %v336_v6 = vld [vmem:[#allocation5 + $0x5f8] sm:$0xff]  ;;  %v4801_v7 = vcombine.low %v323_v59, %v327_v60  ;;  %v4803_v8 = vcombine.low %v324_v61, %v328_v62  ;;  %v387_v59 = vld [vmem:[#allocation5 + $0x790] sm:$0xff] }
 0x196   :  { %v4812_v10 = vcombine.high %v332_v5, %v336_v6  ;;  %v391_v60 = vld [vmem:[#allocation5 + $0x7b0] sm:$0xff]  ;;  %v388_v61 = vld [vmem:[#allocation5 + $0x798] sm:$0xff] }
 0x197   :  { %v392_v62 = vld [vmem:[#allocation5 + $0x7b8] sm:$0xff] }
 0x198   :  { %2810 = vmatpush1.bf16.msra.mxu0 %v4745_v13  ;;  %2939 = vmatpush1.bf16.msra.mxu1 %v4747_v14  ;;  %v340_v13 = vld [vmem:[#allocation5 + $0x618] sm:$0xff] }
 0x199   :  { %2822 = vmatprep.subr.bf16.mxu0 %v4754_v15  ;;  %2951 = vmatprep.subr.bf16.mxu1 %v4756_v16  ;;  %v344_v14 = vld [vmem:[#allocation5 + $0x638] sm:$0xff]  ;;  %v4809_v15 = vcombine.low %v331_v3, %v335_v4  ;;  %v4811_v16 = vcombine.low %v332_v5, %v336_v6  ;;  %v395_v3 = vld [vmem:[#allocation5 + $0x7d0] sm:$0xff] }
 0x19a   :  { %v4820_v18 = vcombine.high %v340_v13, %v344_v14  ;;  %v399_v4 = vld [vmem:[#allocation5 + $0x7f0] sm:$0xff]  ;;  %v396_v5 = vld [vmem:[#allocation5 + $0x7d8] sm:$0xff] }
 0x19b   :  { %2812 = vmatmul.mubr.bf16.vlgmr.msra.gmra.mrb[4].mxu0 %v5596_v27  ;;  %2941 = vmatmul.mubr.bf16.vlgmr.msra.gmra.mrb[4].mxu1 %v5596_v27  ;;  %v355_v27 = vld [vmem:[#allocation5 + $0x690] sm:$0xff]  ;;  %v400_v6 = vld [vmem:[#allocation5 + $0x7f8] sm:$0xff] }
 0x19c   :  { %2823 = vmatpush1.bf16.msra.mxu0 %v4753_v21  ;;  %2952 = vmatpush1.bf16.msra.mxu1 %v4755_v22  ;;  %v348_v21 = vld [vmem:[#allocation5 + $0x658] sm:$0xff] }
 0x19d   :  { %2824 = vmatprep.subr.bf16.mxu0 %v4762_v23  ;;  %2953 = vmatprep.subr.bf16.mxu1 %v4764_v24  ;;  %v352_v22 = vld [vmem:[#allocation5 + $0x678] sm:$0xff]  ;;  %v4817_v23 = vcombine.low %v339_v11, %v343_v12  ;;  %v4819_v24 = vcombine.low %v340_v13, %v344_v14  ;;  %v403_v11 = vld [vmem:[#allocation5 + $0x810] sm:$0xff] }
 0x19e   :  { %2854 = vmatprep.mubr.bf16.mxu0 %v5597_v36  ;;  %2983 = vmatprep.mubr.bf16.mxu1 %v5597_v36  ;;  %v4828_v26 = vcombine.high %v348_v21, %v352_v22  ;;  %v367_v36 = vld [vmem:[#allocation5 + $0x6f0] sm:$0xff]  ;;  %v404_v13 = vld [vmem:[#allocation5 + $0x818] sm:$0xff] }
 0x19f   :  { %v407_v12 = vld [vmem:[#allocation5 + $0x830] sm:$0xff]  ;;  %v408_v14 = vld [vmem:[#allocation5 + $0x838] sm:$0xff] }
 0x1a0   :  { %2825 = vmatpush1.bf16.msra.mxu0 %v4761_v30  ;;  %2954 = vmatpush1.bf16.msra.mxu1 %v4763_v31  ;;  %v360_v30 = vld [vmem:[#allocation5 + $0x6b8] sm:$0xff]  ;;  %v4825_v31 = vcombine.low %v347_v19, %v351_v20  ;;  %v411_v19 = vld [vmem:[#allocation5 + $0x850] sm:$0xff] }
 0x1a1   :  { %2826 = vmatprep.subr.bf16.mxu0 %v4770_v32  ;;  %2955 = vmatprep.subr.bf16.mxu1 %v4772_v33  ;;  %v4827_v32 = vcombine.low %v348_v21, %v352_v22  ;;  %v4834_v33 = vcombine.high %v355_v27, %v359_v28  ;;  %v4836_v34 = vcombine.high %v356_v29, %v360_v30  ;;  %v415_v20 = vld [vmem:[#allocation5 + $0x870] sm:$0xff]  ;;  %v412_v21 = vld [vmem:[#allocation5 + $0x858] sm:$0xff] }
 0x1a2   :  { %v416_v22 = vld [vmem:[#allocation5 + $0x878] sm:$0xff] }
 0x1a4   :  { %2827 = vmatpush1.bf16.msra.mxu0 %v4769_v39  ;;  %2956 = vmatpush1.bf16.msra.mxu1 %v4771_v40  ;;  %v4833_v39 = vcombine.low %v355_v27, %v359_v28  ;;  %v4835_v40 = vcombine.low %v356_v29, %v360_v30  ;;  %v419_v27 = vld [vmem:[#allocation5 + $0x890] sm:$0xff]  ;;  %v420_v30 = vld [vmem:[#allocation5 + $0x898] sm:$0xff] }
 0x1a5   :  { %2828 = vmatprep.subr.bf16.mxu0 %v4778_v41  ;;  %2957 = vmatprep.subr.bf16.mxu1 %v4780_v42  ;;  %v4842_v41 = vcombine.high %v363_v35, %v367_v36  ;;  %v4844_v42 = vcombine.high %v364_v37, %v368_v38  ;;  %v423_v28 = vld [vmem:[#allocation5 + $0x8b0] sm:$0xff] }
 0x1a6   :  { %v5598_v29 = vld [vmem:[#allocation3 + $0x8] ss:$24 sps:$4 sm:$0xff]  }
 0x1a8   :  { %2829 = vmatpush1.bf16.msra.mxu0 %v4777_v47  ;;  %2958 = vmatpush1.bf16.msra.mxu1 %v4779_v48  ;;  %v4841_v47 = vcombine.low %v363_v35, %v367_v36  ;;  %v4843_v48 = vcombine.low %v364_v37, %v368_v38  ;;  %v427_v36 = vld [vmem:[#allocation5 + $0x8d0] sm:$0xff]  ;;  %v5599_v38 = vld [vmem:[#allocation3 + $0x14] ss:$24 sps:$4 sm:$0xff]  }
 0x1a9   :  { %2830 = vmatprep.subr.bf16.mxu0 %v4786_v49  ;;  %2959 = vmatprep.subr.bf16.mxu1 %v4788_v50  ;;  %v4850_v49 = vcombine.high %v371_v43, %v375_v44  ;;  %v4852_v50 = vcombine.high %v372_v45, %v376_v46  ;;  %v431_v37 = vld [vmem:[#allocation5 + $0x8f0] sm:$0xff] }
 0x1ac   :  { %2831 = vmatpush1.bf16.msra.mxu0 %v4785_v55  ;;  %2960 = vmatpush1.bf16.msra.mxu1 %v4787_v56  ;;  %v4849_v55 = vcombine.low %v371_v43, %v375_v44  ;;  %v4851_v56 = vcombine.low %v372_v45, %v376_v46  ;;  %v4906_v43 = vcombine.high %v427_v36, %v431_v37  ;;  %v435_v45 = vld [vmem:[#allocation5 + $0x910] sm:$0xff] }
 0x1ad   :  { %2832 = vmatprep.subr.bf16.mxu0 %v4794_v57  ;;  %2961 = vmatprep.subr.bf16.mxu1 %v4796_v58  ;;  %v4858_v57 = vcombine.high %v379_v51, %v383_v52  ;;  %v4860_v58 = vcombine.high %v380_v53, %v384_v54  ;;  %v439_v46 = vld [vmem:[#allocation5 + $0x930] sm:$0xff] }
 0x1b0   :  { %2833 = vmatpush1.bf16.msra.mxu0 %v4793_v63  ;;  %2962 = vmatpush1.bf16.msra.mxu1 %v4795_v0  ;;  %v4857_v63 = vcombine.low %v379_v51, %v383_v52  ;;  %v4859_v0 = vcombine.low %v380_v53, %v384_v54  ;;  %v4914_v51 = vcombine.high %v435_v45, %v439_v46  ;;  %v443_v53 = vld [vmem:[#allocation5 + $0x950] sm:$0xff] }
 0x1b1   :  { %2834 = vmatprep.subr.bf16.mxu0 %v4802_v1  ;;  %2963 = vmatprep.subr.bf16.mxu1 %v4804_v2  ;;  %v4866_v1 = vcombine.high %v387_v59, %v391_v60  ;;  %v4868_v2 = vcombine.high %v388_v61, %v392_v62  ;;  %v447_v54 = vld [vmem:[#allocation5 + $0x970] sm:$0xff] }
 0x1b4   :  { %2835 = vmatpush1.bf16.msra.mxu0 %v4801_v7  ;;  %2964 = vmatpush1.bf16.msra.mxu1 %v4803_v8  ;;  %v4865_v7 = vcombine.low %v387_v59, %v391_v60  ;;  %v4867_v8 = vcombine.low %v388_v61, %v392_v62  ;;  %v4922_v59 = vcombine.high %v443_v53, %v447_v54  ;;  %v451_v61 = vld [vmem:[#allocation5 + $0x990] sm:$0xff] }
 0x1b5   :  { %2836 = vmatprep.subr.bf16.mxu0 %v4810_v9  ;;  %2965 = vmatprep.subr.bf16.mxu1 %v4812_v10  ;;  %v4874_v9 = vcombine.high %v395_v3, %v399_v4  ;;  %v4876_v10 = vcombine.high %v396_v5, %v400_v6  ;;  %v455_v62 = vld [vmem:[#allocation5 + $0x9b0] sm:$0xff] }
 0x1b8   :  { %2837 = vmatpush1.bf16.msra.mxu0 %v4809_v15  ;;  %2966 = vmatpush1.bf16.msra.mxu1 %v4811_v16  ;;  %v4873_v15 = vcombine.low %v395_v3, %v399_v4  ;;  %v4875_v16 = vcombine.low %v396_v5, %v400_v6  ;;  %v4930_v3 = vcombine.high %v451_v61, %v455_v62  ;;  %v459_v5 = vld [vmem:[#allocation5 + $0x9d0] sm:$0xff] }
 0x1b9   :  { %2838 = vmatprep.subr.bf16.mxu0 %v4818_v17  ;;  %2967 = vmatprep.subr.bf16.mxu1 %v4820_v18  ;;  %v4882_v17 = vcombine.high %v403_v11, %v407_v12  ;;  %v4884_v18 = vcombine.high %v404_v13, %v408_v14  ;;  %v463_v6 = vld [vmem:[#allocation5 + $0x9f0] sm:$0xff] }
 0x1bc   :  { %2839 = vmatpush1.bf16.msra.mxu0 %v4817_v23  ;;  %2968 = vmatpush1.bf16.msra.mxu1 %v4819_v24  ;;  %v4881_v23 = vcombine.low %v403_v11, %v407_v12  ;;  %v4883_v24 = vcombine.low %v404_v13, %v408_v14  ;;  %v4938_v11 = vcombine.high %v459_v5, %v463_v6  ;;  %v467_v13 = vld [vmem:[#allocation5 + $0xa10] sm:$0xff] }
 0x1bd   :  { %2840 = vmatprep.subr.bf16.mxu0 %v4826_v25  ;;  %2969 = vmatprep.subr.bf16.mxu1 %v4828_v26  ;;  %v4890_v25 = vcombine.high %v411_v19, %v415_v20  ;;  %v4892_v26 = vcombine.high %v412_v21, %v416_v22  ;;  %v471_v14 = vld [vmem:[#allocation5 + $0xa30] sm:$0xff] }
 0x1c0   :  { %2841 = vmatpush1.bf16.msra.mxu0 %v4825_v31  ;;  %2970 = vmatpush1.bf16.msra.mxu1 %v4827_v32  ;;  %v424_v31 = vld [vmem:[#allocation5 + $0x8b8] sm:$0xff]  ;;  %v4889_v32 = vcombine.low %v411_v19, %v415_v20  ;;  %v4946_v19 = vcombine.high %v467_v13, %v471_v14 }
 0x1c1   :  { %2842 = vmatprep.subr.bf16.mxu0 %v4834_v33  ;;  %2971 = vmatprep.subr.bf16.mxu1 %v4836_v34  ;;  %v4891_v33 = vcombine.low %v412_v21, %v416_v22  ;;  %v4898_v34 = vcombine.high %v419_v27, %v423_v28  ;;  %v4900_v35 = vcombine.high %v420_v30, %v424_v31  ;;  %v475_v21 = vld [vmem:[#allocation5 + $0xa50] sm:$0xff] }
 0x1c2   :  { %v479_v22 = vld [vmem:[#allocation5 + $0xa70] sm:$0xff] }
 0x1c4   :  { %2843 = vmatpush1.bf16.msra.mxu0 %v4833_v39  ;;  %2972 = vmatpush1.bf16.msra.mxu1 %v4835_v40  ;;  %v428_v39 = vld [vmem:[#allocation5 + $0x8d8] sm:$0xff] }
 0x1c5   :  { %2844 = vmatprep.subr.bf16.mxu0 %v4842_v41  ;;  %2973 = vmatprep.subr.bf16.mxu1 %v4844_v42  ;;  %v432_v40 = vld [vmem:[#allocation5 + $0x8f8] sm:$0xff]  ;;  %v4897_v41 = vcombine.low %v419_v27, %v423_v28  ;;  %v4899_v42 = vcombine.low %v420_v30, %v424_v31  ;;  %v4954_v27 = vcombine.high %v475_v21, %v479_v22  ;;  %v487_v30 = vld [vmem:[#allocation5 + $0xab0] sm:$0xff] }
 0x1c6   :  { %v4908_v44 = vcombine.high %v428_v39, %v432_v40  ;;  %v484_v31 = vld [vmem:[#allocation5 + $0xa98] sm:$0xff] }
 0x1c8   :  { %2845 = vmatpush1.bf16.msra.mxu0 %v4841_v47  ;;  %2974 = vmatpush1.bf16.msra.mxu1 %v4843_v48  ;;  %v436_v47 = vld [vmem:[#allocation5 + $0x918] sm:$0xff] }
 0x1c9   :  { %2846 = vmatprep.subr.bf16.mxu0 %v4850_v49  ;;  %2975 = vmatprep.subr.bf16.mxu1 %v4852_v50  ;;  %v440_v48 = vld [vmem:[#allocation5 + $0x938] sm:$0xff]  ;;  %v4905_v49 = vcombine.low %v427_v36, %v431_v37  ;;  %v4907_v50 = vcombine.low %v428_v39, %v432_v40  ;;  %v491_v37 = vld [vmem:[#allocation5 + $0xad0] sm:$0xff] }
 0x1ca   :  { %v4916_v52 = vcombine.high %v436_v47, %v440_v48  ;;  %v492_v39 = vld [vmem:[#allocation5 + $0xad8] sm:$0xff] }
 0x1cb   :  { %v496_v40 = vld [vmem:[#allocation5 + $0xaf8] sm:$0xff] }
 0x1cc   :  { %2847 = vmatpush1.bf16.msra.mxu0 %v4849_v55  ;;  %2976 = vmatpush1.bf16.msra.mxu1 %v4851_v56  ;;  %v444_v55 = vld [vmem:[#allocation5 + $0x958] sm:$0xff] }
 0x1cd   :  { %2848 = vmatprep.subr.bf16.mxu0 %v4858_v57  ;;  %2977 = vmatprep.subr.bf16.mxu1 %v4860_v58  ;;  %v448_v56 = vld [vmem:[#allocation5 + $0x978] sm:$0xff]  ;;  %v4913_v57 = vcombine.low %v435_v45, %v439_v46  ;;  %v4915_v58 = vcombine.low %v436_v47, %v440_v48  ;;  %v499_v45 = vld [vmem:[#allocation5 + $0xb10] sm:$0xff] }
 0x1ce   :  { %v4924_v60 = vcombine.high %v444_v55, %v448_v56  ;;  %v503_v46 = vld [vmem:[#allocation5 + $0xb30] sm:$0xff]  ;;  %v500_v47 = vld [vmem:[#allocation5 + $0xb18] sm:$0xff] }
 0x1cf   :  { %v504_v48 = vld [vmem:[#allocation5 + $0xb38] sm:$0xff] }
 0x1d0   :  { %2849 = vmatpush1.bf16.msra.mxu0 %v4857_v63  ;;  %2978 = vmatpush1.bf16.msra.mxu1 %v4859_v0  ;;  %v452_v63 = vld [vmem:[#allocation5 + $0x998] sm:$0xff] }
 0x1d1   :  { %2850 = vmatprep.subr.bf16.mxu0 %v4866_v1  ;;  %2979 = vmatprep.subr.bf16.mxu1 %v4868_v2  ;;  %v456_v0 = vld [vmem:[#allocation5 + $0x9b8] sm:$0xff]  ;;  %v4921_v1 = vcombine.low %v443_v53, %v447_v54  ;;  %v4923_v2 = vcombine.low %v444_v55, %v448_v56  ;;  %v507_v53 = vld [vmem:[#allocation5 + $0xb50] sm:$0xff] }
 0x1d2   :  { %v4932_v4 = vcombine.high %v452_v63, %v456_v0  ;;  %v511_v54 = vld [vmem:[#allocation5 + $0xb70] sm:$0xff]  ;;  %v508_v55 = vld [vmem:[#allocation5 + $0xb58] sm:$0xff] }
 0x1d3   :  { %v512_v56 = vld [vmem:[#allocation5 + $0xb78] sm:$0xff] }
 0x1d4   :  { %2851 = vmatpush1.bf16.msra.mxu0 %v4865_v7  ;;  %2980 = vmatpush1.bf16.msra.mxu1 %v4867_v8  ;;  %v460_v7 = vld [vmem:[#allocation5 + $0x9d8] sm:$0xff] }
 0x1d5   :  { %2852 = vmatprep.subr.bf16.mxu0 %v4874_v9  ;;  %2981 = vmatprep.subr.bf16.mxu1 %v4876_v10  ;;  %v464_v8 = vld [vmem:[#allocation5 + $0x9f8] sm:$0xff]  ;;  %v4929_v9 = vcombine.low %v451_v61, %v455_v62  ;;  %v4931_v10 = vcombine.low %v452_v63, %v456_v0  ;;  %v515_v61 = vld [vmem:[#allocation5 + $0xb90] sm:$0xff] }
 0x1d6   :  { %v4940_v12 = vcombine.high %v460_v7, %v464_v8  ;;  %v519_v62 = vld [vmem:[#allocation5 + $0xbb0] sm:$0xff]  ;;  %v516_v63 = vld [vmem:[#allocation5 + $0xb98] sm:$0xff] }
 0x1d7   :  { %v520_v0 = vld [vmem:[#allocation5 + $0xbb8] sm:$0xff] }
 0x1d8   :  { %2853 = vmatpush1.bf16.msra.mxu0 %v4873_v15  ;;  %2982 = vmatpush1.bf16.msra.mxu1 %v4875_v16  ;;  %v468_v15 = vld [vmem:[#allocation5 + $0xa18] sm:$0xff] }
 0x1d9   :  { %2865 = vmatprep.subr.bf16.mxu0 %v4882_v17  ;;  %2994 = vmatprep.subr.bf16.mxu1 %v4884_v18  ;;  %v472_v16 = vld [vmem:[#allocation5 + $0xa38] sm:$0xff]  ;;  %v4937_v17 = vcombine.low %v459_v5, %v463_v6  ;;  %v4939_v18 = vcombine.low %v460_v7, %v464_v8  ;;  %v523_v5 = vld [vmem:[#allocation5 + $0xbd0] sm:$0xff] }
 0x1da   :  { %v4948_v20 = vcombine.high %v468_v15, %v472_v16  ;;  %v527_v6 = vld [vmem:[#allocation5 + $0xbf0] sm:$0xff]  ;;  %v524_v7 = vld [vmem:[#allocation5 + $0xbd8] sm:$0xff] }
 0x1db   :  { %2855 = vmatmul.mubr.bf16.vlgmr.msra.gmra.mrb[4].mxu0 %v5598_v29  ;;  %2984 = vmatmul.mubr.bf16.vlgmr.msra.gmra.mrb[4].mxu1 %v5598_v29  ;;  %v483_v29 = vld [vmem:[#allocation5 + $0xa90] sm:$0xff]  ;;  %v528_v8 = vld [vmem:[#allocation5 + $0xbf8] sm:$0xff] }
 0x1dc   :  { %2866 = vmatpush1.bf16.msra.mxu0 %v4881_v23  ;;  %2995 = vmatpush1.bf16.msra.mxu1 %v4883_v24  ;;  %v476_v23 = vld [vmem:[#allocation5 + $0xa58] sm:$0xff] }
 0x1dd   :  { %2867 = vmatprep.subr.bf16.mxu0 %v4890_v25  ;;  %2996 = vmatprep.subr.bf16.mxu1 %v4892_v26  ;;  %v480_v24 = vld [vmem:[#allocation5 + $0xa78] sm:$0xff]  ;;  %v4945_v25 = vcombine.low %v467_v13, %v471_v14  ;;  %v4947_v26 = vcombine.low %v468_v15, %v472_v16  ;;  %v5001_v13 = vcombine.low %v523_v5, %v527_v6  ;;  %v5467_v15 = vld [vmem:[#allocation8 + $0x240] sm:$0xff]  }
 0x1de   :  { %2897 = vmatprep.mubr.bf16.mxu0 %v5599_v38  ;;  %3026 = vmatprep.mubr.bf16.mxu1 %v5599_v38  ;;  %v4956_v28 = vcombine.high %v476_v23, %v480_v24  ;;  %v495_v38 = vld [vmem:[#allocation5 + $0xaf0] sm:$0xff]  ;;  %v5003_v14 = vcombine.low %v524_v7, %v528_v8  ;;  %v5468_v16 = vld [vmem:[#allocation8 + $0x2c0] sm:$0xff]  }
 0x1e0   :  { %2868 = vmatpush1.bf16.msra.mxu0 %v4889_v32  ;;  %2997 = vmatpush1.bf16.msra.mxu1 %v4891_v33  ;;  %v488_v32 = vld [vmem:[#allocation5 + $0xab8] sm:$0xff]  ;;  %v4953_v33 = vcombine.low %v475_v21, %v479_v22  ;;  %v5473_v22 = vld [vmem:[#allocation8 + $0x208] sm:$0xff]  }
 0x1e1   :  { %2869 = vmatprep.subr.bf16.mxu0 %v4898_v34  ;;  %2998 = vmatprep.subr.bf16.mxu1 %v4900_v35  ;;  %v4955_v34 = vcombine.low %v476_v23, %v480_v24  ;;  %v4962_v35 = vcombine.high %v483_v29, %v487_v30  ;;  %v4964_v36 = vcombine.high %v484_v31, %v488_v32  ;;  %v5600_v21 = vld [vmem:[#allocation3 + $0x10] ss:$24 sps:$4 sm:$0xff]   ;;  %v5474_v23 = vld [vmem:[#allocation8 + $0x288] sm:$0xff]  }
 0x1e2   :  { %v5475_v24 = vld [vmem:[#allocation8 + $0x250] sm:$0xff]  }
 0x1e4   :  { %2870 = vmatpush1.bf16.msra.mxu0 %v4897_v41  ;;  %2999 = vmatpush1.bf16.msra.mxu1 %v4899_v42  ;;  %v4961_v41 = vcombine.low %v483_v29, %v487_v30  ;;  %v4963_v42 = vcombine.low %v484_v31, %v488_v32  ;;  %v5479_v29 = vld [vmem:[#allocation8 + $0x258] sm:$0xff]  }
 0x1e5   :  { %2871 = vmatprep.subr.bf16.mxu0 %v4906_v43  ;;  %3000 = vmatprep.subr.bf16.mxu1 %v4908_v44  ;;  %v4970_v43 = vcombine.high %v491_v37, %v495_v38  ;;  %v4972_v44 = vcombine.high %v492_v39, %v496_v40  ;;  %v5480_v30 = vld [vmem:[#allocation8 + $0x2d8] sm:$0xff]  }
 0x1e6   :  { %v5481_v32 = vld [vmem:[#allocation8 + $0x218] sm:$0xff]  }
 0x1e8   :  { %2872 = vmatpush1.bf16.msra.mxu0 %v4905_v49  ;;  %3001 = vmatpush1.bf16.msra.mxu1 %v4907_v50  ;;  %v4969_v49 = vcombine.low %v491_v37, %v495_v38  ;;  %v4971_v50 = vcombine.low %v492_v39, %v496_v40  ;;  %v5967_v37 = vpop.permute.xlu0 %3040  ;;  %v5969_v38 = vld [vmem:[#allocation7] sm:$0xff] }
 0x1e9   :  { %2873 = vmatprep.subr.bf16.mxu0 %v4914_v51  ;;  %3002 = vmatprep.subr.bf16.mxu1 %v4916_v52  ;;  %v4978_v51 = vcombine.high %v499_v45, %v503_v46  ;;  %v4980_v52 = vcombine.high %v500_v47, %v504_v48 }
 0x1ec   :  { %2874 = vmatpush1.bf16.msra.mxu0 %v4913_v57  ;;  %3003 = vmatpush1.bf16.msra.mxu1 %v4915_v58  ;;  %v4977_v57 = vcombine.low %v499_v45, %v503_v46  ;;  %v4979_v58 = vcombine.low %v500_v47, %v504_v48  ;;  %v5488_v45 = vld [vmem:[#allocation8 + $0x2e8] sm:$0xff]  }
 0x1ed   :  { %2875 = vmatprep.subr.bf16.mxu0 %v4922_v59  ;;  %3004 = vmatprep.subr.bf16.mxu1 %v4924_v60  ;;  %v4986_v59 = vcombine.high %v507_v53, %v511_v54  ;;  %v4988_v60 = vcombine.high %v508_v55, %v512_v56 }
 0x1f0   :  { %2876 = vmatpush1.bf16.msra.mxu0 %v4921_v1  ;;  %3005 = vmatpush1.bf16.msra.mxu1 %v4923_v2  ;;  %v4985_v1 = vcombine.low %v507_v53, %v511_v54  ;;  %v4987_v2 = vcombine.low %v508_v55, %v512_v56  ;;  %v5978_v54 = vpop.permute.xlu0 %3054  ;;  %v5492_v55 = vld [vmem:[#allocation8 + $0x2f0] sm:$0xff]  }
 0x1f1   :  { %2877 = vmatprep.subr.bf16.mxu0 %v4930_v3  ;;  %3006 = vmatprep.subr.bf16.mxu1 %v4932_v4  ;;  %v4994_v3 = vcombine.high %v515_v61, %v519_v62  ;;  %v4996_v4 = vcombine.high %v516_v63, %v520_v0 }
 0x1f4   :  { %2878 = vmatpush1.bf16.msra.mxu0 %v4929_v9  ;;  %3007 = vmatpush1.bf16.msra.mxu1 %v4931_v10  ;;  %v4993_v9 = vcombine.low %v515_v61, %v519_v62  ;;  %v4995_v10 = vcombine.low %v516_v63, %v520_v0  ;;  %v5493_v63 = vld [vmem:[#allocation8 + $0x230] sm:$0xff]  }
 0x1f5   :  { %2879 = vmatprep.subr.bf16.mxu0 %v4938_v11  ;;  %3008 = vmatprep.subr.bf16.mxu1 %v4940_v12  ;;  %v5002_v11 = vcombine.high %v523_v5, %v527_v6  ;;  %v5004_v12 = vcombine.high %v524_v7, %v528_v8  ;;  %v5494_v5 = vld [vmem:[#allocation8 + $0x2b0] sm:$0xff]   ;;  %v5495_v6 = vld [vmem:[#allocation8 + $0x278] sm:$0xff]  }
 0x1f8   :  { %2880 = vmatpush1.bf16.msra.mxu0 %v4937_v17  ;;  %3009 = vmatpush1.bf16.msra.mxu1 %v4939_v18  ;;  %v5469_v17 = vld [vmem:[#allocation8 + $0x200] sm:$0xff]  }
 0x1f9   :  { %2881 = vmatprep.subr.bf16.mxu0 %v4946_v19  ;;  %3010 = vmatprep.subr.bf16.mxu1 %v4948_v20  ;;  %v5470_v18 = vld [vmem:[#allocation8 + $0x280] sm:$0xff]   ;;  %v5471_v19 = vld [vmem:[#allocation8 + $0x248] sm:$0xff]  }
 0x1fa   :  { %v5472_v20 = vld [vmem:[#allocation8 + $0x2c8] sm:$0xff]  }
 0x1fc   :  { %2882 = vmatpush1.bf16.msra.mxu0 %v4945_v25  ;;  %3011 = vmatpush1.bf16.msra.mxu1 %v4947_v26  ;;  %v5476_v25 = vld [vmem:[#allocation8 + $0x2d0] sm:$0xff]   ;;  %v531_v26 = vlaneseq }
 0x1fd   :  { %2883 = vmatprep.subr.bf16.mxu0 %v4954_v27  ;;  %3012 = vmatprep.subr.bf16.mxu1 %v4956_v28  ;;  %v5477_v27 = vld [vmem:[#allocation8 + $0x210] sm:$0xff]  }
 0x1fe   :  { %v5478_v28 = vld [vmem:[#allocation8 + $0x290] sm:$0xff]   ;;  %v5964_v31 = vshrl.u32 %v531_v26, 7  ;;  %v5499_v26 = vld [vmem:[#allocation8 + $0x340] sm:$0xff]  }
 0x200   :  { %2884 = vmatpush1.bf16.msra.mxu0 %v4953_v33  ;;  %3013 = vmatpush1.bf16.msra.mxu1 %v4955_v34  ;;  %v5482_v33 = vld [vmem:[#allocation8 + $0x298] sm:$0xff]   ;;  %v5483_v34 = vld [vmem:[#allocation8 + $0x260] sm:$0xff]   ;;  %v541_v39 = vsub.s32 2, %v5964_v31  ;;  %v537_v40 = vsub.s32 1, %v5964_v31 }
 0x201   :  { %2885 = vmatprep.subr.bf16.mxu0 %v4962_v35  ;;  %3014 = vmatprep.subr.bf16.mxu1 %v4964_v36  ;;  %v5484_v35 = vld [vmem:[#allocation8 + $0x2e0] sm:$0xff]   ;;  %v533_v36 = vsub.s32 0, %v5964_v31 }
 0x202   :  { %v542_v47 = vrot.slane %v5969_v38, %v541_v39  ;;  %v538_v48 = vrot.slane %v5969_v38, %v537_v40 }
 0x203   :  { %v534_v46 = vrot.slane %v5969_v38, %v533_v36 }
 0x204   :  { %2886 = vmatpush1.bf16.msra.mxu0 %v4961_v41  ;;  %3015 = vmatpush1.bf16.msra.mxu1 %v4963_v42  ;;  %v5485_v41 = vld [vmem:[#allocation8 + $0x220] sm:$0xff]   ;;  %v545_v42 = vsub.s32 3, %v5964_v31 }
 0x205   :  { %2887 = vmatprep.subr.bf16.mxu0 %v4970_v43  ;;  %3016 = vmatprep.subr.bf16.mxu1 %v4972_v44  ;;  %v5486_v43 = vld [vmem:[#allocation8 + $0x2a0] sm:$0xff]   ;;  %v5487_v44 = vld [vmem:[#allocation8 + $0x268] sm:$0xff]  }
 0x208   :  { %2888 = vmatpush1.bf16.msra.mxu0 %v4969_v49  ;;  %3017 = vmatpush1.bf16.msra.mxu1 %v4971_v50  ;;  %v5489_v49 = vld [vmem:[#allocation8 + $0x228] sm:$0xff]   ;;  %v546_v50 = vrot.slane %v5969_v38, %v545_v42 }
 0x209   :  { %2889 = vmatprep.subr.bf16.mxu0 %v4978_v51  ;;  %3018 = vmatprep.subr.bf16.mxu1 %v4980_v52  ;;  %v5490_v51 = vld [vmem:[#allocation8 + $0x2a8] sm:$0xff]   ;;  %v5491_v52 = vld [vmem:[#allocation8 + $0x270] sm:$0xff]  }
 0x20c   :  { %2890 = vmatpush1.bf16.msra.mxu0 %v4977_v57  ;;  %3019 = vmatpush1.bf16.msra.mxu1 %v4979_v58 }
 0x20d   :  { %2891 = vmatprep.subr.bf16.mxu0 %v4986_v59  ;;  %3020 = vmatprep.subr.bf16.mxu1 %v4988_v60 }
 0x210   :  { %2892 = vmatpush1.bf16.msra.mxu0 %v4985_v1  ;;  %3021 = vmatpush1.bf16.msra.mxu1 %v4987_v2 }
 0x211   :  { %2893 = vmatprep.subr.bf16.mxu0 %v4994_v3  ;;  %3022 = vmatprep.subr.bf16.mxu1 %v4996_v4 }
 0x214   :  { %2894 = vmatpush1.bf16.msra.mxu0 %v4993_v9  ;;  %3023 = vmatpush1.bf16.msra.mxu1 %v4995_v10 }
 0x215   :  { %2895 = vmatprep.subr.bf16.mxu0 %v5002_v11  ;;  %3024 = vmatprep.subr.bf16.mxu1 %v5004_v12  ;;  %v5496_v12 = vld [vmem:[#allocation8 + $0x2f8] sm:$0xff]  }
 0x218   :  { %2896 = vmatpush1.bf16.msra.mxu0 %v5001_v13  ;;  %3025 = vmatpush1.bf16.msra.mxu1 %v5003_v14 }
 0x219   :  { %5137 = vmatprep.subr.bf16.mxu0 %v5467_v15  ;;  %5159 = vmatprep.subr.bf16.mxu1 %v5468_v16 }
 0x21b   :  { %2898 = vmatmul.mubr.bf16.vlgmr.msra.gmra.mrb[4].mxu0 %v5600_v21  ;;  %3027 = vmatmul.mubr.bf16.vlgmr.msra.gmra.mrb[4].mxu1 %v5600_v21 }
 0x21c   :  { %5138 = vmatpush3.bf16.msra.mxu0 %v5469_v17  ;;  %5160 = vmatpush3.bf16.msra.mxu1 %v5470_v18 }
 0x21d   :  { %5139 = vmatprep.subr.bf16.mxu0 %v5471_v19  ;;  %5161 = vmatprep.subr.bf16.mxu1 %v5472_v20  ;;  %v5497_v19 = vld [vmem:[#allocation8 + $0x238] sm:$0xff]  }
 0x220   :  { %5140 = vmatpush3.bf16.msra.mxu0 %v5473_v22  ;;  %5162 = vmatpush3.bf16.msra.mxu1 %v5474_v23  ;;  %v5498_v23 = vld [vmem:[#allocation8 + $0x2b8] sm:$0xff]  }
 0x221   :  { %5141 = vmatprep.subr.bf16.mxu0 %v5475_v24  ;;  %5163 = vmatprep.subr.bf16.mxu1 %v5476_v25 }
 0x224   :  { %5142 = vmatpush3.bf16.msra.mxu0 %v5477_v27  ;;  %5164 = vmatpush3.bf16.msra.mxu1 %v5478_v28 }
 0x225   :  { %5143 = vmatprep.subr.bf16.mxu0 %v5479_v29  ;;  %5165 = vmatprep.subr.bf16.mxu1 %v5480_v30  ;;  %v5500_v29 = vld [vmem:[#allocation8 + $0x3c0] sm:$0xff]  }
 0x228   :  { %5144 = vmatpush3.bf16.msra.mxu0 %v5481_v32  ;;  %5166 = vmatpush3.bf16.msra.mxu1 %v5482_v33 }
 0x229   :  { %5145 = vmatprep.subr.bf16.mxu0 %v5483_v34  ;;  %5167 = vmatprep.subr.bf16.mxu1 %v5484_v35 }
 0x22c   :  { %5146 = vmatpush3.bf16.msra.mxu0 %v5485_v41  ;;  %5168 = vmatpush3.bf16.msra.mxu1 %v5486_v43 }
 0x22d   :  { %5147 = vmatprep.subr.bf16.mxu0 %v5487_v44  ;;  %5169 = vmatprep.subr.bf16.mxu1 %v5488_v45 }
 0x22e   :  { %v2641_v53 = vpop.f32.mrb[0].mxu0  ;;  %v2770_v57 = vpop.f32.mrb[0].mxu1 }
 0x22f   :  { %v5389_v56 = vadd.f32 %v2641_v53, %v534_v46  ;;  %v2643_v58 = vpop.f32.mrb[1].mxu0  ;;  %v5393_v59 = vadd.f32 %v2770_v57, %v542_v47  ;;  %v2772_v61 = vpop.f32.mrb[1].mxu1  ;;  %v5504_v53 = vld [vmem:[#allocation8 + $0x3c8] sm:$0xff]   ;;  %v5507_v57 = vld [vmem:[#allocation8 + $0x350] sm:$0xff]  }
 0x230   :  { %v5390_v60 = vadd.f32 %v2643_v58, %v538_v48  ;;  %v2645_v62 = vpop.f32.mrb[2].mxu0  ;;  %5148 = vmatpush3.bf16.msra.mxu0 %v5489_v49  ;;  %v5394_v1 = vadd.f32 %v2772_v61, %v546_v50  ;;  %v2774_v3 = vpop.f32.mrb[2].mxu1  ;;  %5170 = vmatpush3.bf16.msra.mxu1 %v5490_v51  ;;  %v5503_v51 = vld [vmem:[#allocation8 + $0x348] sm:$0xff]   ;;  %v5508_v58 = vld [vmem:[#allocation8 + $0x3d0] sm:$0xff]   ;;  %v5511_v61 = vld [vmem:[#allocation8 + $0x358] sm:$0xff]  }
 0x231   :  { %v3043_v0 = vmul.f32 %v5389_v56, %v5967_v37  ;;  %v5391_v2 = vadd.f32 %v2645_v62, %v534_v46  ;;  %v2647_v4 = vpop.f32.mrb[3].mxu0  ;;  %5149 = vmatprep.subr.bf16.mxu0 %v5491_v52  ;;  %v3045_v7 = vmul.f32 %v5393_v59, %v5967_v37  ;;  %v5395_v9 = vadd.f32 %v2774_v3, %v542_v47  ;;  %v2776_v11 = vpop.f32.mrb[3].mxu1  ;;  %v5501_v47 = vld [vmem:[#allocation8 + $0x300] sm:$0xff]   ;;  %v5512_v62 = vld [vmem:[#allocation8 + $0x3d8] sm:$0xff]  }
 0x232   :  { %v3044_v8 = vmul.f32 %v5390_v60, %v5967_v37  ;;  %v5392_v10 = vadd.f32 %v2647_v4, %v538_v48  ;;  %5171 = vmatprep.subr.bf16.mxu1 %v5492_v55  ;;  %v3046_v13 = vmul.f32 %v5394_v1, %v5967_v37  ;;  %v5396_v15 = vadd.f32 %v2776_v11, %v546_v50  ;;  %v5502_v50 = vld [vmem:[#allocation8 + $0x380] sm:$0xff]   ;;  %v5505_v55 = vld [vmem:[#allocation8 + $0x308] sm:$0xff]   ;;  %v5525_v11 = vld [vmem:[#allocation8 + $0x330] sm:$0xff]  }
 0x233   :  { %v3073_v14 = vadd.f32 %v5391_v2, %v5389_v56  ;;  %v3057_v16 = vmul.f32 %v5391_v2, %v5978_v54  ;;  %v3075_v17 = vadd.f32 %v5395_v9, %v5393_v59  ;;  %v3059_v21 = vmul.f32 %v5395_v9, %v5978_v54  ;;  %v5506_v56 = vld [vmem:[#allocation8 + $0x388] sm:$0xff]   ;;  %v5509_v59 = vld [vmem:[#allocation8 + $0x310] sm:$0xff]   ;;  %v5516_v2 = vld [vmem:[#allocation8 + $0x3e0] sm:$0xff]  }
 0x234   :  { %v3074_v18 = vadd.f32 %v5392_v10, %v5390_v60  ;;  %5150 = vmatpush3.bf16.msra.mxu0 %v5493_v63  ;;  %v3058_v20 = vmul.f32 %v5392_v10, %v5978_v54  ;;  %v3076_v22 = vadd.f32 %v5396_v15, %v5394_v1  ;;  %5172 = vmatpush3.bf16.msra.mxu1 %v5494_v5  ;;  %v5510_v60 = vld [vmem:[#allocation8 + $0x390] sm:$0xff]   ;;  %v5513_v63 = vld [vmem:[#allocation8 + $0x318] sm:$0xff]   ;;  %v5515_v1 = vld [vmem:[#allocation8 + $0x360] sm:$0xff]  }
 0x235   :  { %5151 = vmatprep.subr.bf16.mxu0 %v5495_v6  ;;  %v3060_v24 = vmul.f32 %v5396_v15, %v5978_v54  ;;  %v5988_v25 = vadd.f32 %v3057_v16, %v3043_v0  ;;  %5173 = vmatprep.subr.bf16.mxu1 %v5496_v12  ;;  %v5992_v28 = vadd.f32 %v3059_v21, %v3045_v7  ;;  %v5514_v0 = vld [vmem:[#allocation8 + $0x398] sm:$0xff]   ;;  %v5517_v3 = vld [vmem:[#allocation8 + $0x320] sm:$0xff]   ;;  %v5519_v5 = vld [vmem:[#allocation8 + $0x368] sm:$0xff]   ;;  %v553_v21 = vsub.s32 5, %v5964_v31 }
 0x236   :  { %v5990_v27 = vadd.f32 %v3058_v20, %v3044_v8  ;;  %v5518_v4 = vld [vmem:[#allocation8 + $0x3a0] sm:$0xff]   ;;  %v5520_v6 = vld [vmem:[#allocation8 + $0x3e8] sm:$0xff]   ;;  %v5523_v9 = vld [vmem:[#allocation8 + $0x370] sm:$0xff]   ;;  %v557_v20 = vsub.s32 6, %v5964_v31 }
 0x237   :  { %v5994_v30 = vadd.f32 %v3060_v24, %v3046_v13  ;;  %v3081_v32 = vsub.f32 %v3073_v14, %v5988_v25  ;;  %v3083_v34 = vsub.f32 %v3075_v17, %v5992_v28  ;;  %v5521_v7 = vld [vmem:[#allocation8 + $0x328] sm:$0xff]   ;;  %v5524_v10 = vld [vmem:[#allocation8 + $0x3f0] sm:$0xff]   ;;  %v5527_v13 = vld [vmem:[#allocation8 + $0x378] sm:$0xff]  }
 0x238   :  { %5152 = vmatpush3.bf16.msra.mxu0 %v5497_v19  ;;  %v3082_v33 = vsub.f32 %v3074_v18, %v5990_v27  ;;  %5174 = vmatpush3.bf16.msra.mxu1 %v5498_v23  ;;  %v5522_v8 = vld [vmem:[#allocation8 + $0x3a8] sm:$0xff]   ;;  %v5526_v12 = vld [vmem:[#allocation8 + $0x3b0] sm:$0xff]   ;;  %v5528_v14 = vld [vmem:[#allocation8 + $0x3f8] sm:$0xff]   ;;  %v549_v19 = vsub.s32 4, %v5964_v31  ;;  %v558_v24 = vrot.slane %v5969_v38, %v557_v20 }
 0x239   :  { %v3084_v35 = vsub.f32 %v3076_v22, %v5994_v30  ;;  %v3113_v36 = vmax.f32 %v3081_v32, 0.0  ;;  %5181 = vmatprep.subr.bf16.mxu0 %v5499_v26  ;;  %v3115_v40 = vmax.f32 %v3083_v34, 0.0  ;;  %5203 = vmatprep.subr.bf16.mxu1 %v5500_v29  ;;  %v5529_v15 = vld [vmem:[#allocation8 + $0x338] sm:$0xff]   ;;  %v5531_v17 = vld [vmem:[#allocation8 + $0x40] sm:$0xff]   ;;  %v561_v22 = vsub.s32 7, %v5964_v31 }
 0x23a   :  { %v3114_v39 = vmax.f32 %v3082_v33, 0.0  ;;  %v5530_v16 = vld [vmem:[#allocation8 + $0x3b8] sm:$0xff]   ;;  %v5532_v18 = vld [vmem:[#allocation8 + $0xc0] sm:$0xff]   ;;  %v550_v23 = vrot.slane %v5969_v38, %v549_v19  ;;  %v554_v26 = vrot.slane %v5969_v38, %v553_v21  ;;  %v5535_v21 = vld [vmem:[#allocation8 + $0x48] sm:$0xff]  }
 0x23b   :  { %v3116_v41 = vmax.f32 %v3084_v35, 0.0  ;;  %v3121_v42 = vmin.f32 %v3113_v36, 1.0  ;;  %v3123_v44 = vmin.f32 %v3115_v40, 1.0  ;;  %v562_v29 = vrot.slane %v5969_v38, %v561_v22  ;;  %v5534_v19 = vld [vmem:[#allocation8 + $0x80] sm:$0xff]   ;;  %v5536_v22 = vld [vmem:[#allocation8 + $0xc8] sm:$0xff]  }
 0x23c   :  { %v3122_v43 = vmin.f32 %v3114_v39, 1.0 }
 0x23d   :  { %v3124_v45 = vmin.f32 %v3116_v41, 1.0  ;;  %v3129_v49 = vpack.c.bf16 %v3121_v42, %v3121_v42  ;;  %v3131_v52 = vpack.c.bf16 %v3123_v44, %v3123_v44 }
 0x23e   :  { %v3130_v46 = vpack.c.bf16 %v3122_v43, %v3122_v43 }
 0x23f   :  { %v3132_v48 = vpack.c.bf16 %v3124_v45, %v3124_v45 }
 0x240   :  { %3809 = vmatprep.mubr.bf16.mxu0 %v3130_v46 }
 0x241   :  { %3849 = vmatprep.mubr.bf16.mxu1 %v3132_v48  ;;  %3810 = vmatmul.mubr.bf16.vlgmr.msra.gmra.mrb[8].mxu0 %v3129_v49 }
 0x242   :  { %3850 = vmatmul.mubr.bf16.vlgmr.msra.gmra.mrb[8].mxu1 %v3131_v52  ;;  %5182 = vmatpush3.bf16.msra.mxu0 %v5501_v47 }
 0x243   :  { %5204 = vmatpush3.bf16.msra.mxu1 %v5502_v50  ;;  %5183 = vmatprep.subr.bf16.mxu0 %v5503_v51 }
 0x244   :  { %5205 = vmatprep.subr.bf16.mxu1 %v5504_v53 }
 0x246   :  { %5184 = vmatpush3.bf16.msra.mxu0 %v5505_v55 }
 0x247   :  { %5206 = vmatpush3.bf16.msra.mxu1 %v5506_v56  ;;  %5185 = vmatprep.subr.bf16.mxu0 %v5507_v57 }
 0x248   :  { %5207 = vmatprep.subr.bf16.mxu1 %v5508_v58 }
 0x24a   :  { %5186 = vmatpush3.bf16.msra.mxu0 %v5509_v59 }
 0x24b   :  { %5208 = vmatpush3.bf16.msra.mxu1 %v5510_v60  ;;  %5187 = vmatprep.subr.bf16.mxu0 %v5511_v61 }
 0x24c   :  { %5209 = vmatprep.subr.bf16.mxu1 %v5512_v62 }
 0x24e   :  { %5188 = vmatpush3.bf16.msra.mxu0 %v5513_v63 }
 0x24f   :  { %5210 = vmatpush3.bf16.msra.mxu1 %v5514_v0  ;;  %5189 = vmatprep.subr.bf16.mxu0 %v5515_v1 }
 0x250   :  { %5211 = vmatprep.subr.bf16.mxu1 %v5516_v2 }
 0x252   :  { %5190 = vmatpush3.bf16.msra.mxu0 %v5517_v3 }
 0x253   :  { %5212 = vmatpush3.bf16.msra.mxu1 %v5518_v4  ;;  %5191 = vmatprep.subr.bf16.mxu0 %v5519_v5  ;;  %v3090_v5 = vmax.f32 %v5990_v27, 0.0 }
 0x254   :  { %5213 = vmatprep.subr.bf16.mxu1 %v5520_v6 }
 0x256   :  { %5192 = vmatpush3.bf16.msra.mxu0 %v5521_v7  ;;  %v3092_v7 = vmax.f32 %v5994_v30, 0.0 }
 0x257   :  { %5214 = vmatpush3.bf16.msra.mxu1 %v5522_v8  ;;  %5193 = vmatprep.subr.bf16.mxu0 %v5523_v9 }
 0x258   :  { %5215 = vmatprep.subr.bf16.mxu1 %v5524_v10 }
 0x25a   :  { %5194 = vmatpush3.bf16.msra.mxu0 %v5525_v11 }
 0x25b   :  { %5216 = vmatpush3.bf16.msra.mxu1 %v5526_v12  ;;  %5195 = vmatprep.subr.bf16.mxu0 %v5527_v13  ;;  %v3098_v13 = vmin.f32 %v3090_v5, 1.0 }
 0x25c   :  { %5217 = vmatprep.subr.bf16.mxu1 %v5528_v14 }
 0x25d   :  { %v3106_v27 = vpack.c.bf16 %v3098_v13, %v3098_v13 }
 0x25e   :  { %5196 = vmatpush3.bf16.msra.mxu0 %v5529_v15  ;;  %v5533_v15 = vld [vmem:[#allocation8] sm:$0xff]  }
 0x25f   :  { %5218 = vmatpush3.bf16.msra.mxu1 %v5530_v16  ;;  %5225 = vmatprep.subr.bf16.mxu0 %v5531_v17  ;;  %v3100_v16 = vmin.f32 %v3092_v7, 1.0  ;;  %v5562_v7 = vld [vmem:[#allocation8 + $0xb8] sm:$0xff]  }
 0x260   :  { %5247 = vmatprep.subr.bf16.mxu1 %v5532_v18 }
 0x261   :  { %v3108_v30 = vpack.c.bf16 %v3100_v16, %v3100_v16  ;;  %v5568_v16 = vld [vmem:[#allocation8 + $0x1c8] sm:$0xff]  }
 0x2ee   :  { %v2899_v32 = vpop.f32.mrb[4].mxu0  ;;  %v3028_v34 = vpop.f32.mrb[4].mxu1 }
 0x2ef   :  { %v5397_v33 = vadd.f32 %v2899_v32, %v550_v23  ;;  %v2901_v35 = vpop.f32.mrb[5].mxu0  ;;  %v5401_v36 = vadd.f32 %v3028_v34, %v558_v24  ;;  %v3030_v40 = vpop.f32.mrb[5].mxu1  ;;  %v5541_v32 = vld [vmem:[#allocation8 + $0x10] sm:$0xff]   ;;  %v5543_v34 = vld [vmem:[#allocation8 + $0x58] sm:$0xff]  }
 0x2f0   :  { %v5398_v39 = vadd.f32 %v2901_v35, %v554_v26  ;;  %v2903_v41 = vpop.f32.mrb[6].mxu0  ;;  %v5402_v42 = vadd.f32 %v3030_v40, %v562_v29  ;;  %v3032_v44 = vpop.f32.mrb[6].mxu1  ;;  %v5544_v35 = vld [vmem:[#allocation8 + $0xd8] sm:$0xff]   ;;  %v5547_v40 = vld [vmem:[#allocation8 + $0x60] sm:$0xff]  }
 0x2f1   :  { %v5399_v43 = vadd.f32 %v2903_v41, %v550_v23  ;;  %v2905_v31 = vpop.f32.mrb[7].mxu0  ;;  %v3047_v45 = vmul.f32 %v5397_v33, %v5967_v37  ;;  %v3049_v46 = vmul.f32 %v5401_v36, %v5967_v37  ;;  %v5403_v47 = vadd.f32 %v3032_v44, %v558_v24  ;;  %v3034_v49 = vpop.f32.mrb[7].mxu1  ;;  %v5537_v23 = vld [vmem:[#allocation8 + $0x8] sm:$0xff]   ;;  %v5548_v41 = vld [vmem:[#allocation8 + $0xe0] sm:$0xff]  }
 0x2f2   :  { %v5400_v48 = vadd.f32 %v2905_v31, %v554_v26  ;;  %v3048_v38 = vmul.f32 %v5398_v39, %v5967_v37  ;;  %v5404_v52 = vadd.f32 %v3034_v49, %v562_v29  ;;  %v3050_v58 = vmul.f32 %v5402_v42, %v5967_v37  ;;  %v5538_v24 = vld [vmem:[#allocation8 + $0x88] sm:$0xff]   ;;  %v5539_v26 = vld [vmem:[#allocation8 + $0x50] sm:$0xff]  }
 0x2f3   :  { %v3061_v50 = vmul.f32 %v5399_v43, %v5978_v54  ;;  %v3077_v51 = vadd.f32 %v5399_v43, %v5397_v33  ;;  %v3063_v53 = vmul.f32 %v5403_v47, %v5978_v54  ;;  %v3079_v55 = vadd.f32 %v5403_v47, %v5401_v36  ;;  %v5540_v29 = vld [vmem:[#allocation8 + $0xd0] sm:$0xff]   ;;  %v5545_v36 = vld [vmem:[#allocation8 + $0x18] sm:$0xff]   ;;  %v5550_v43 = vld [vmem:[#allocation8 + $0xa0] sm:$0xff]  }
 0x2f4   :  { %v3062_v56 = vmul.f32 %v5400_v48, %v5978_v54  ;;  %v3078_v57 = vadd.f32 %v5400_v48, %v5398_v39  ;;  %v3064_v60 = vmul.f32 %v5404_v52, %v5978_v54  ;;  %v3080_v61 = vadd.f32 %v5404_v52, %v5402_v42  ;;  %v5542_v33 = vld [vmem:[#allocation8 + $0x90] sm:$0xff]   ;;  %v5546_v39 = vld [vmem:[#allocation8 + $0x98] sm:$0xff]   ;;  %v5549_v42 = vld [vmem:[#allocation8 + $0x20] sm:$0xff]  }
 0x2f5   :  { %v6015_v59 = vadd.f32 %v3061_v50, %v3047_v45  ;;  %v6018_v62 = vadd.f32 %v3063_v53, %v3049_v46  ;;  %v5551_v44 = vld [vmem:[#allocation8 + $0x68] sm:$0xff]   ;;  %v5555_v47 = vld [vmem:[#allocation8 + $0x70] sm:$0xff]  }
 0x2f6   :  { %v6020_v63 = vadd.f32 %v3062_v56, %v3048_v38  ;;  %v6023_v1 = vadd.f32 %v3064_v60, %v3050_v58  ;;  %v5552_v31 = vld [vmem:[#allocation8 + $0xe8] sm:$0xff]   ;;  %v5556_v49 = vld [vmem:[#allocation8 + $0xf0] sm:$0xff]  }
 0x2f7   :  { %v3085_v0 = vsub.f32 %v3077_v51, %v6015_v59  ;;  %v3087_v2 = vsub.f32 %v3079_v55, %v6018_v62  ;;  %v5553_v45 = vld [vmem:[#allocation8 + $0x28] sm:$0xff]   ;;  %v5557_v55 = vld [vmem:[#allocation8 + $0x30] sm:$0xff]  }
 0x2f8   :  { %v3086_v3 = vsub.f32 %v3078_v57, %v6020_v63  ;;  %v3088_v37 = vsub.f32 %v3080_v61, %v6023_v1  ;;  %v5554_v46 = vld [vmem:[#allocation8 + $0xa8] sm:$0xff]   ;;  %v5558_v60 = vld [vmem:[#allocation8 + $0xb0] sm:$0xff]   ;;  %v5559_v61 = vld [vmem:[#allocation8 + $0x78] sm:$0xff]   ;;  %v3094_v5 = vmax.f32 %v6020_v63, 0.0 }
 0x2f9   :  { %v3117_v4 = vmax.f32 %v3085_v0, 0.0  ;;  %v3119_v6 = vmax.f32 %v3087_v2, 0.0  ;;  %v3089_v0 = vmax.f32 %v5988_v25, 0.0  ;;  %v5566_v63 = vld [vmem:[#allocation8 + $0x180] sm:$0xff]  }
 0x2fa   :  { %v3118_v54 = vmax.f32 %v3086_v3, 0.0  ;;  %v3120_v9 = vmax.f32 %v3088_v37, 0.0  ;;  %v5560_v3 = vld [vmem:[#allocation8 + $0xf8] sm:$0xff]  }
 0x2fb   :  { %v3125_v8 = vmin.f32 %v3117_v4, 1.0  ;;  %v3127_v10 = vmin.f32 %v3119_v6, 1.0  ;;  %v3091_v4 = vmax.f32 %v5992_v28, 0.0  ;;  %v5561_v6 = vld [vmem:[#allocation8 + $0x38] sm:$0xff]  }
 0x2fc   :  { %v3126_v11 = vmin.f32 %v3118_v54, 1.0  ;;  %v3128_v12 = vmin.f32 %v3120_v9, 1.0  ;;  %v3096_v54 = vmax.f32 %v6023_v1, 0.0  ;;  %v5563_v9 = vld [vmem:[#allocation8 + $0x140] sm:$0xff]  }
 0x2fd   :  { %v3133_v17 = vpack.c.bf16 %v3125_v8, %v3125_v8  ;;  %v3135_v20 = vpack.c.bf16 %v3127_v10, %v3127_v10  ;;  %v3097_v8 = vmin.f32 %v3089_v0, 1.0  ;;  %v3099_v25 = vmin.f32 %v3091_v4, 1.0  ;;  %v5564_v10 = vld [vmem:[#allocation8 + $0x1c0] sm:$0xff]  }
 0x2fe   :  { %v3134_v14 = vpack.c.bf16 %v3126_v11, %v3126_v11  ;;  %v3136_v18 = vpack.c.bf16 %v3128_v12, %v3128_v12  ;;  %v3102_v11 = vmin.f32 %v3094_v5, 1.0  ;;  %v5565_v12 = vld [vmem:[#allocation8 + $0x100] sm:$0xff]   ;;  %v3104_v28 = vmin.f32 %v3096_v54, 1.0 }
 0x2ff   :  { %v3105_v13 = vpack.c.bf16 %v3097_v8, %v3097_v8  ;;  %v4499_v5 = vld [vmem:[#allocation11 + $0x40] sm:$0xff]  ;;  %v4502_v8 = vld [vmem:[#allocation11 + $0x58] sm:$0xff] }
 0x300   :  { %3889 = vmatprep.mubr.bf16.mxu0 %v3134_v14  ;;  %3929 = vmatprep.mubr.bf16.mxu1 %v3136_v18  ;;  %v3107_v14 = vpack.c.bf16 %v3099_v25, %v3099_v25  ;;  %v3110_v1 = vpack.c.bf16 %v3102_v11, %v3102_v11  ;;  %v5569_v18 = vld [vmem:[#allocation8 + $0x108] sm:$0xff]  }
 0x301   :  { %3890 = vmatmul.mubr.bf16.vlgmr.msra.gmra.mrb[12].mxu0 %v3133_v17  ;;  %3930 = vmatmul.mubr.bf16.vlgmr.msra.gmra.mrb[12].mxu1 %v3135_v20  ;;  %v3112_v17 = vpack.c.bf16 %v3104_v28, %v3104_v28  ;;  %v5571_v20 = vld [vmem:[#allocation8 + $0x150] sm:$0xff]   ;;  %v4503_v25 = vld [vmem:[#allocation11 + $0x60] sm:$0xff]  ;;  %v4506_v28 = vld [vmem:[#allocation11 + $0x78] sm:$0xff] }
 0x302   :  { %5226 = vmatpush3.bf16.msra.mxu0 %v5533_v15  ;;  %5248 = vmatpush3.bf16.msra.mxu1 %v5534_v19  ;;  %v5567_v15 = vld [vmem:[#allocation8 + $0x148] sm:$0xff]  }
 0x303   :  { %4353 = vmatprep.mubr.bf16.mxu0 %v3106_v27  ;;  %4393 = vmatprep.mubr.bf16.mxu1 %v3108_v30  ;;  %v5570_v19 = vld [vmem:[#allocation8 + $0x188] sm:$0xff]   ;;  %v5573_v27 = vld [vmem:[#allocation8 + $0x110] sm:$0xff]   ;;  %v5575_v30 = vld [vmem:[#allocation8 + $0x158] sm:$0xff]  }
 0x304   :  { %5227 = vmatprep.subr.bf16.mxu0 %v5535_v21  ;;  %5249 = vmatprep.subr.bf16.mxu1 %v5536_v22  ;;  %v5572_v21 = vld [vmem:[#allocation8 + $0x1d0] sm:$0xff]  }
 0x305   :  { %v5574_v22 = vld [vmem:[#allocation8 + $0x190] sm:$0xff]  }
 0x306   :  { %5228 = vmatpush3.bf16.msra.mxu0 %v5537_v23  ;;  %5250 = vmatpush3.bf16.msra.mxu1 %v5538_v24  ;;  %v5576_v23 = vld [vmem:[#allocation8 + $0x1d8] sm:$0xff]  }
 0x307   :  { %5229 = vmatprep.subr.bf16.mxu0 %v5539_v26  ;;  %5251 = vmatprep.subr.bf16.mxu1 %v5540_v29  ;;  %v5577_v24 = vld [vmem:[#allocation8 + $0x118] sm:$0xff]   ;;  %v5579_v29 = vld [vmem:[#allocation8 + $0x160] sm:$0xff]  }
 0x308   :  { %v5578_v26 = vld [vmem:[#allocation8 + $0x198] sm:$0xff]  }
 0x30a   :  { %5230 = vmatpush3.bf16.msra.mxu0 %v5541_v32  ;;  %5252 = vmatpush3.bf16.msra.mxu1 %v5542_v33  ;;  %v5580_v32 = vld [vmem:[#allocation8 + $0x1e0] sm:$0xff]  }
 0x30b   :  { %5231 = vmatprep.subr.bf16.mxu0 %v5543_v34  ;;  %5253 = vmatprep.subr.bf16.mxu1 %v5544_v35  ;;  %v5581_v33 = vld [vmem:[#allocation8 + $0x120] sm:$0xff]   ;;  %v5583_v35 = vld [vmem:[#allocation8 + $0x168] sm:$0xff]  }
 0x30c   :  { %v5582_v34 = vld [vmem:[#allocation8 + $0x1a0] sm:$0xff]  }
 0x30e   :  { %5232 = vmatpush3.bf16.msra.mxu0 %v5545_v36  ;;  %5254 = vmatpush3.bf16.msra.mxu1 %v5546_v39  ;;  %v5584_v36 = vld [vmem:[#allocation8 + $0x1e8] sm:$0xff]  }
 0x30f   :  { %5233 = vmatprep.subr.bf16.mxu0 %v5547_v40  ;;  %5255 = vmatprep.subr.bf16.mxu1 %v5548_v41  ;;  %v5585_v39 = vld [vmem:[#allocation8 + $0x128] sm:$0xff]   ;;  %v5587_v41 = vld [vmem:[#allocation8 + $0x170] sm:$0xff]  }
 0x310   :  { %v5586_v40 = vld [vmem:[#allocation8 + $0x1a8] sm:$0xff]  }
 0x312   :  { %5234 = vmatpush3.bf16.msra.mxu0 %v5549_v42  ;;  %5256 = vmatpush3.bf16.msra.mxu1 %v5550_v43  ;;  %v5588_v42 = vld [vmem:[#allocation8 + $0x1f0] sm:$0xff]  }
 0x313   :  { %5235 = vmatprep.subr.bf16.mxu0 %v5551_v44  ;;  %5257 = vmatprep.subr.bf16.mxu1 %v5552_v31  ;;  %v5589_v43 = vld [vmem:[#allocation8 + $0x130] sm:$0xff]   ;;  %v3093_v44 = vmax.f32 %v6015_v59, 0.0 }
 0x314   :  { %v5153_v48 = vpop.f32.mrb[8].mxu0  ;;  %v5590_v31 = vld [vmem:[#allocation8 + $0x1b0] sm:$0xff]  }
 0x315   :  { %v5175_v38 = vpop.f32.mrb[8].mxu1  ;;  %v5154_v50 = vpop.f32.mrb[9].mxu0 }
 0x316   :  { %v5155_v51 = vadd.f32 %v5154_v50, %v5153_v48  ;;  %v5176_v52 = vpop.f32.mrb[9].mxu1  ;;  %5236 = vmatpush3.bf16.msra.mxu0 %v5553_v45  ;;  %v5156_v53 = vpop.f32.mrb[10].mxu0  ;;  %5258 = vmatpush3.bf16.msra.mxu1 %v5554_v46  ;;  %v5591_v45 = vld [vmem:[#allocation8 + $0x178] sm:$0xff]   ;;  %v3095_v46 = vmax.f32 %v6018_v62, 0.0  ;;  %v5804_v62 = vmov 0.0|0.0  }
 0x317   :  { %v5177_v56 = vadd.f32 %v5176_v52, %v5175_v38  ;;  %v5178_v57 = vpop.f32.mrb[10].mxu1  ;;  %v5157_v58 = vpop.f32.mrb[11].mxu0  ;;  %5237 = vmatprep.subr.bf16.mxu0 %v5555_v47  ;;  %5259 = vmatprep.subr.bf16.mxu1 %v5556_v49  ;;  %v5592_v47 = vld [vmem:[#allocation8 + $0x1f8] sm:$0xff]   ;;  %v3101_v49 = vmin.f32 %v3093_v44, 1.0  ;;  %v4491_v52 = vld [vmem:[#allocation11] sm:$0xff]  ;;  %v4492_v53 = vld [vmem:[#allocation11 + $0x8] sm:$0xff] }
 0x318   :  { %v5179_v2 = vpop.f32.mrb[11].mxu1  ;;  %v5593_v48 = vld [vmem:[#allocation8 + $0x138] sm:$0xff]   ;;  %v3103_v50 = vmin.f32 %v3095_v46, 1.0 }
 0x319   :  { %v6032_v37 = vadd.f32 %v5177_v56, %v5155_v51  ;;  %v5594_v38 = vld [vmem:[#allocation8 + $0x1b8] sm:$0xff]   ;;  %v3109_v51 = vpack.c.bf16 %v3101_v49, %v3101_v49  ;;  %v5366_v56 = vpack.c.bf16 %v4492_v53, %v4491_v52 }
 0x31a   :  { %5238 = vmatpush3.bf16.msra.mxu0 %v5557_v55  ;;  %5260 = vmatpush3.bf16.msra.mxu1 %v5558_v60  ;;  %v3111_v59 = vpack.c.bf16 %v3103_v50, %v3103_v50  ;;  %v4493_v55 = vld [vmem:[#allocation11 + $0x10] sm:$0xff]  ;;  %v4494_v57 = vld [vmem:[#allocation11 + $0x18] sm:$0xff]  ;;  %v4495_v60 = vld [vmem:[#allocation11 + $0x20] sm:$0xff] }
 0x31b   :  { %5239 = vmatprep.subr.bf16.mxu0 %v5559_v61  ;;  %5261 = vmatprep.subr.bf16.mxu1 %v5560_v3  ;;  %v5369_v58 = vpack.c.bf16 %v4494_v57, %v4493_v55  ;;  %v4496_v61 = vld [vmem:[#allocation11 + $0x28] sm:$0xff]  ;;  %v4497_v2 = vld [vmem:[#allocation11 + $0x30] sm:$0xff]  ;;  %v4498_v3 = vld [vmem:[#allocation11 + $0x38] sm:$0xff] }
 0x31c   :  { %v5372_v0 = vpack.c.bf16 %v4496_v61, %v4495_v60  ;;  %v5375_v4 = vpack.c.bf16 %v4498_v3, %v4497_v2  ;;  %v5133_v50 = vld [vmem:[#allocation10] ss:$0 sm:$0xff]  ;;  %v5134_v55 = vld [vmem:[#allocation13] ss:$0 sm:$0xff]  ;;  %v5135_v60 = vld [vmem:[#allocation14] ss:$0 sm:$0xff] }
 0x31d   :  { %v5136_v2 = vld [vmem:[#allocation2] ss:$0 sm:$0xff] }
 0x31e   :  { %5240 = vmatpush3.bf16.msra.mxu0 %v5561_v6  ;;  %5262 = vmatpush3.bf16.msra.mxu1 %v5562_v7  ;;  %v4500_v6 = vld [vmem:[#allocation11 + $0x48] sm:$0xff]  ;;  %v4501_v7 = vld [vmem:[#allocation11 + $0x50] sm:$0xff] }
 0x31f   :  { %5269 = vmatprep.subr.bf16.mxu0 %v5563_v9  ;;  %5291 = vmatprep.subr.bf16.mxu1 %v5564_v10  ;;  %v5378_v54 = vpack.c.bf16 %v4500_v6, %v4499_v5  ;;  %v5381_v9 = vpack.c.bf16 %v4502_v8, %v4501_v7  ;;  %v4504_v10 = vld [vmem:[#allocation11 + $0x68] sm:$0xff] }
 0x320   :  { %v5384_v11 = vpack.c.bf16 %v4504_v10, %v4503_v25 }
 0x321   :  { %4354 = vmatmul.mubr.bf16.vlgmr.msra.gmra.mrb[16].mxu0 %v3105_v13  ;;  %4394 = vmatmul.mubr.bf16.vlgmr.msra.gmra.mrb[16].mxu1 %v3107_v14 }
 0x322   :  { %5270 = vmatpush3.bf16.msra.mxu0 %v5565_v12  ;;  %4433 = vmatprep.mubr.bf16.mxu0 %v3110_v1  ;;  %v4505_v12 = vld [vmem:[#allocation11 + $0x70] sm:$0xff] }
 0x323   :  { %5292 = vmatpush3.bf16.msra.mxu1 %v5566_v63  ;;  %4473 = vmatprep.mubr.bf16.mxu1 %v3112_v17  ;;  %v5387_v13 = vpack.c.bf16 %v4506_v28, %v4505_v12  ;;  %v5806_v63 = vmov 0.0  }
 0x324   :  { %5271 = vmatprep.subr.bf16.mxu0 %v5567_v15  ;;  %5293 = vmatprep.subr.bf16.mxu1 %v5568_v16 }
 0x326   :  { %5272 = vmatpush3.bf16.msra.mxu0 %v5569_v18 }
 0x327   :  { %5294 = vmatpush3.bf16.msra.mxu1 %v5570_v19  ;;  %5273 = vmatprep.subr.bf16.mxu0 %v5571_v20 }
 0x328   :  { %5295 = vmatprep.subr.bf16.mxu1 %v5572_v21 }
 0x32a   :  { %5274 = vmatpush3.bf16.msra.mxu0 %v5573_v27 }
 0x32b   :  { %5296 = vmatpush3.bf16.msra.mxu1 %v5574_v22  ;;  %5275 = vmatprep.subr.bf16.mxu0 %v5575_v30 }
 0x32c   :  { %5297 = vmatprep.subr.bf16.mxu1 %v5576_v23 }
 0x32e   :  { %5276 = vmatpush3.bf16.msra.mxu0 %v5577_v24 }
 0x32f   :  { %5298 = vmatpush3.bf16.msra.mxu1 %v5578_v26  ;;  %5277 = vmatprep.subr.bf16.mxu0 %v5579_v29 }
 0x330   :  { %5299 = vmatprep.subr.bf16.mxu1 %v5580_v32 }
 0x332   :  { %5278 = vmatpush3.bf16.msra.mxu0 %v5581_v33 }
 0x333   :  { %5300 = vmatpush3.bf16.msra.mxu1 %v5582_v34  ;;  %5279 = vmatprep.subr.bf16.mxu0 %v5583_v35 }
 0x334   :  { %5301 = vmatprep.subr.bf16.mxu1 %v5584_v36 }
 0x336   :  { %5280 = vmatpush3.bf16.msra.mxu0 %v5585_v39 }
 0x337   :  { %5302 = vmatpush3.bf16.msra.mxu1 %v5586_v40  ;;  %5281 = vmatprep.subr.bf16.mxu0 %v5587_v41 }
 0x338   :  { %5303 = vmatprep.subr.bf16.mxu1 %v5588_v42 }
 0x33a   :  { %5282 = vmatpush3.bf16.msra.mxu0 %v5589_v43 }
 0x33b   :  { %5304 = vmatpush3.bf16.msra.mxu1 %v5590_v31  ;;  %5283 = vmatprep.subr.bf16.mxu0 %v5591_v45 }
 0x33c   :  { %5305 = vmatprep.subr.bf16.mxu1 %v5592_v47 }
 0x33e   :  { %5284 = vmatpush3.bf16.msra.mxu0 %v5593_v48 }
 0x33f   :  { %5306 = vmatpush3.bf16.msra.mxu1 %v5594_v38  ;;  %5365 = vmatprep.subr.bf16.mxu0 %v5804_v62 }
 0x341   :  { %4434 = vmatmul.mubr.bf16.vlgmr.msra.gmra.mrb[20].mxu0 %v3109_v51 }
 0x342   :  { %4474 = vmatmul.mubr.bf16.vlgmr.msra.gmra.mrb[20].mxu1 %v3111_v59  ;;  %5367 = vmatpush3.bf16.msra.mxu0 %v5366_v56 }
 0x343   :  { %5368 = vmatprep.subr.bf16.mxu0 %v5804_v62  ;;  %5362 = vmatprep.mubr.msk.f32.mxu0 %vm5805_vm0, %v5806_v63 }
 0x346   :  { %5370 = vmatpush3.bf16.msra.mxu0 %v5369_v58 }
 0x347   :  { %5371 = vmatprep.subr.bf16.mxu0 %v5804_v62 }
 0x34a   :  { %5373 = vmatpush3.bf16.msra.mxu0 %v5372_v0 }
 0x34b   :  { %5374 = vmatprep.subr.bf16.mxu0 %v5804_v62 }
 0x34e   :  { %5376 = vmatpush3.bf16.msra.mxu0 %v5375_v4 }
 0x34f   :  { %5377 = vmatprep.subr.bf16.mxu0 %v5804_v62 }
 0x352   :  { %5379 = vmatpush3.bf16.msra.mxu0 %v5378_v54 }
 0x353   :  { %5380 = vmatprep.subr.bf16.mxu0 %v5804_v62 }
 0x356   :  { %5382 = vmatpush3.bf16.msra.mxu0 %v5381_v9 }
 0x357   :  { %5383 = vmatprep.subr.bf16.mxu0 %v5804_v62 }
 0x35a   :  { %5385 = vmatpush3.bf16.msra.mxu0 %v5384_v11 }
 0x35b   :  { %5386 = vmatprep.subr.bf16.mxu0 %v5804_v62 }
 0x35e   :  { %5388 = vmatpush3.bf16.msra.mxu0 %v5387_v13 }
 0x3d4   :  { %v5197_v14 = vpop.f32.mrb[12].mxu0  ;;  %v5219_v15 = vpop.f32.mrb[12].mxu1 }
 0x3d5   :  { %v5198_v1 = vpop.f32.mrb[13].mxu0  ;;  %v5220_v17 = vpop.f32.mrb[13].mxu1 }
 0x3d6   :  { %v5199_v16 = vadd.f32 %v5198_v1, %v5197_v14  ;;  %v5200_v18 = vpop.f32.mrb[14].mxu0  ;;  %v5221_v19 = vadd.f32 %v5220_v17, %v5219_v15  ;;  %v5222_v20 = vpop.f32.mrb[14].mxu1 }
 0x3d7   :  { %v5201_v21 = vpop.f32.mrb[15].mxu0  ;;  %v5223_v22 = vpop.f32.mrb[15].mxu1 }
 0x3d8   :  { %v3892_v27 = vadd.f32 %v5199_v16, %v6032_v37 }
 0x3da   :  { %v3932_v30 = vadd.f32 %v5221_v19, %v3892_v27 }
 0x3f4   :  { %v5241_v23 = vpop.f32.mrb[16].mxu0  ;;  %v5263_v24 = vpop.f32.mrb[16].mxu1 }
 0x3f5   :  { %v5242_v26 = vpop.f32.mrb[17].mxu0  ;;  %v5264_v32 = vpop.f32.mrb[17].mxu1 }
 0x3f6   :  { %v5243_v29 = vadd.f32 %v5242_v26, %v5241_v23  ;;  %v5244_v33 = vpop.f32.mrb[18].mxu0  ;;  %v5265_v34 = vadd.f32 %v5264_v32, %v5263_v24  ;;  %v5266_v35 = vpop.f32.mrb[18].mxu1 }
 0x3f7   :  { %v5245_v36 = vpop.f32.mrb[19].mxu0  ;;  %v5267_v40 = vpop.f32.mrb[19].mxu1 }
 0x3f8   :  { %v4356_v39 = vadd.f32 %v5243_v29, %v3932_v30 }
 0x3fa   :  { %v4396_v41 = vadd.f32 %v5265_v34, %v4356_v39 }
 0x414   :  { %v5285_v42 = vpop.f32.mrb[20].mxu0 }
 0x415   :  { %v5307_v43 = vpop.f32.mrb[20].mxu1  ;;  %v5286_v44 = vpop.f32.mrb[21].mxu0 }
 0x416   :  { %v5287_v31 = vadd.f32 %v5286_v44, %v5285_v42  ;;  %v5308_v45 = vpop.f32.mrb[21].mxu1  ;;  %v5288_v37 = vpop.f32.mrb[22].mxu0 }
 0x417   :  { %v5309_v46 = vadd.f32 %v5308_v45, %v5307_v43  ;;  %v5310_v47 = vpop.f32.mrb[22].mxu1  ;;  %v5289_v48 = vpop.f32.mrb[23].mxu0 }
 0x418   :  { %v4436_v49 = vadd.f32 %v5287_v31, %v4396_v41  ;;  %v5311_v38 = vpop.f32.mrb[23].mxu1 }
 0x41a   :  { %v4476_v51 = vadd.f32 %v5309_v46, %v4436_v49 }
 0x41c   :  { %v4488_v59 = vadd.f32 %v5133_v50, %v4476_v51 }
 0x41e   :  { %v4489_v52 = vmax.f32 %v4488_v59, 0.0 }
 0x420   :  { %v4490_v53 = vmin.f32 %v4489_v52, 1.0 }
 0x422   :  { %5363 = vmatmul.mubr.f32.vlgmr.msra.gmra.mrb[24].mxu0 %v4490_v53 }
 0x4f5   :  { %v4580_v62 = vpop.f32.mrb[24].mxu0 }
 0x4f6   :  { %v4581_v56 = vadd.f32 %v5134_v55, %v4580_v62  ;;  %v5364_v57 = vpop.f32.mrb[25].mxu0 }
 0x4f8   :  { %v4584_v58 = vmax.f32 %v4581_v56, 0.0 }
 0x4fa   :  { %v4585_v61 = vmin.f32 %v4584_v58, 1.0 }
 0x4fc   :  { %v4593_v0 = vmul.f32 %v5135_v60, %v4585_v61 }
 0x4fe   :  { %4594 = vadd.xlane.f32.xlu1 %v4593_v0 }
 0x58b   :  { %v4595_v3 = vpop.xlane.xlu1 %4594 }
 0x58c   :  { %v4603_v4 = vadd.f32 %v5136_v2, %v4595_v3 }
 0x58e   :  { %4605 = vst.msk [vmem:[%s6052_s10] sm:$0xff] %vm4604_vm1, %v4603_v4 }
 0x58f   :  { %4610 = vsyncpa [#allocation4], 1 }
 0x590   :  { %4611 = vsyncpa [#allocation6], 1 }
 0x591   :  { %4612 = vsyncpa [#allocation9], 1 }
 0x592   :  { %4613 = vsyncpa [#allocation12], 1 }
 0x593   :  { %4614 = vsyncpa [#allocation15], 1 }

</bundles_post_ra>
